<compile_context>
chip_gen: v7x
topology: tpu7x:2x2x1
jax: 0.10.0
libtpu: 0.0.40
codegen_flags: <defaults>
</compile_context>

<pallas_src>
import jax
import jax.numpy as jnp
from jax import lax
from jax.experimental import pallas as pl
from jax.experimental.pallas import tpu as pltpu

EPS = 1e-5
LANE = 128
MXU_DTYPE = jnp.bfloat16      # matmul-input / intermediate-storage dtype
ACC_DTYPE = jnp.float32       # accumulation & BN/ReLU math dtype


def _round_up(x, m):
    return (x + m - 1) // m * m


# --------------------------------------------------------------------------- #
# kernel helpers
# --------------------------------------------------------------------------- #
def _fill_padded(pad_ref, interior, H, W):
    """Write `interior` (H, W, C) into the centre of pad_ref, zero only the halo."""
    C = pad_ref.shape[-1]
    zrow = jnp.zeros((1, W + 2, C), pad_ref.dtype)
    zcol = jnp.zeros((H + 2, 1, C), pad_ref.dtype)
    pad_ref[0:1, :, :] = zrow
    pad_ref[H + 1:H + 2, :, :] = zrow
    pad_ref[:, 0:1, :] = zcol
    pad_ref[:, W + 1:W + 2, :] = zcol
    pad_ref[1:H + 1, 1:W + 1, :] = interior.astype(pad_ref.dtype)


def _conv3x3_im2col(pad_ref, w_ref, H, W):
    """3x3 'valid' conv over a (H+2, W+2, C) padded VMEM tile as ONE MXU matmul.

    Builds the (H*W, 9*C) im2col patch once, casts it to bf16 and contracts it
    against the (9*C, Cp) bf16 weight matrix with f32 accumulation.
    """
    C = pad_ref.shape[-1]
    cols = []
    for dy in range(3):
        for dx in range(3):
            cols.append(pad_ref[dy:dy + H, dx:dx + W, :].reshape(H * W, C))
    patch = jnp.concatenate(cols, axis=-1).astype(MXU_DTYPE)        # (H*W, 9*C)
    return jnp.dot(patch, w_ref[...], preferred_element_type=ACC_DTYPE)


def _store_stats(st_ref, acc):
    """One-pass BN stats: per-channel sum and sum-of-squares of this tile."""
    s = jnp.sum(acc, axis=0, keepdims=True)                          # (1, Cp)
    ss = jnp.sum(acc * acc, axis=0, keepdims=True)                   # (1, Cp)
    st_ref[...] = jnp.concatenate([s, ss], axis=0).reshape(1, 2, acc.shape[-1])


# --------------------------------------------------------------------------- #
# kernels
# --------------------------------------------------------------------------- #
def _conv1_kernel(x_ref, w_ref, y_ref, st_ref, pad_ref):
    """conv1 (no bias: cancelled exactly by training-mode BN) + per-image stats."""
    _, H, W, _ = x_ref.shape
    Cp = y_ref.shape[-1]
    _fill_padded(pad_ref, x_ref[0], H, W)
    acc = _conv3x3_im2col(pad_ref, w_ref, H, W)                      # (H*W, Cp) f32
    y_ref[...] = acc.reshape(1, H, W, Cp).astype(y_ref.dtype)        # bf16 store
    _store_stats(st_ref, acc)


def _bn_relu_conv2_kernel(y1_ref, sc_ref, sh_ref, w_ref, y2_ref, st_ref, pad_ref):
    """BN1 (folded scale/shift) + ReLU + conv2 + per-image stats."""
    _, H, W, Cp = y1_ref.shape
    Cout = pad_ref.shape[-1]
    y = y1_ref[0].reshape(H * W, Cp).astype(ACC_DTYPE)
    yn = jnp.maximum(y * sc_ref[...] + sh_ref[...], 0.0)             # f32 BN + ReLU
    _fill_padded(pad_ref, yn[:, :Cout].reshape(H, W, Cout), H, W)
    acc = _conv3x3_im2col(pad_ref, w_ref, H, W)
    y2_ref[...] = acc.reshape(1, H, W, Cp).astype(y2_ref.dtype)      # bf16 store
    _store_stats(st_ref, acc)


def _bn_relu_kernel(y2_ref, sc_ref, sh_ref, o_ref):
    """BN2 (folded) + ReLU, lane-dense pointwise f32 store."""
    Cp = y2_ref.shape[-1]
    sc = sc_ref[...].reshape(1, 1, 1, Cp)
    sh = sh_ref[...].reshape(1, 1, 1, Cp)
    y = y2_ref[...].astype(ACC_DTYPE)
    o_ref[...] = jnp.maximum(y * sc + sh, 0.0)


# --------------------------------------------------------------------------- #
# wrapper
# --------------------------------------------------------------------------- #
def _pack_weight(w_hwio, Cp):
    """(3,3,Ci,Co) HWIO -> (9*Ci, Cp) bf16, Co zero-padded to the lane width."""
    kh, kw, ci, co = w_hwio.shape
    m = w_hwio.reshape(kh * kw * ci, co).astype(jnp.float32)
    m = jnp.pad(m, ((0, 0), (0, Cp - co)))
    return m.astype(MXU_DTYPE)


def _pad_lanes(v, Cp):
    return jnp.pad(v.astype(jnp.float32), (0, Cp - v.shape[0]))


def _bn_scale_shift(sum_, sumsq, count, gamma, beta, Cp):
    """Fold batch-stats BN into y*scale + shift (biased variance, PyTorch train)."""
    mean = sum_ / count
    var = jnp.maximum(sumsq / count - mean * mean, 0.0)
    inv = lax.rsqrt(var + EPS)
    scale = _pad_lanes(gamma, Cp) * inv
    shift = _pad_lanes(beta, Cp) - mean * scale
    return scale.reshape(1, Cp), shift.reshape(1, Cp)


def double_conv(x_nchw, params):
    """x_nchw: (B, Cin, H, W) float32 -> (B, Cout, H, W) float32."""
    w1, b1, g1, be1, w2, b2, g2, be2 = params
    del b1, b2                      # conv biases are cancelled by training-mode BN
    B, Cin, H, W = x_nchw.shape
    Cout = w1.shape[-1]
    Cp = _round_up(Cout, LANE)      # lane-dense channel width
    n = float(B * H * W)

    # NHWC, bf16 for HBM traffic + MXU (conv would cast to bf16 anyway).
    x = jnp.transpose(x_nchw, (0, 2, 3, 1)).astype(MXU_DTYPE)
    w1m = _pack_weight(w1, Cp)                                       # (9*Cin,  Cp) bf16
    w2m = _pack_weight(w2, Cp)                                       # (9*Cout, Cp) bf16

    cparams = pltpu.CompilerParams(
        dimension_semantics=("parallel",),        # batch axis -> both TCs on v7x
        vmem_limit_bytes=32 * 1024 * 1024,        # fits v5e/v6e/v7x scoped VMEM
    )

    def img_spec(c):
        return pl.BlockSpec((1, H, W, c), lambda b: (b, 0, 0, 0))

    vec_spec = pl.BlockSpec((1, Cp), lambda b: (0, 0))
    st_spec = pl.BlockSpec((1, 2, Cp), lambda b: (b, 0, 0))

    # ---- pass A: conv1 + per-image stats ------------------------------------
    y1, st1 = pl.pallas_call(
        _conv1_kernel,
        grid=(B,),
        in_specs=[img_spec(Cin),
                  pl.BlockSpec((9 * Cin, Cp), lambda b: (0, 0))],
        out_specs=[img_spec(Cp), st_spec],
        out_shape=[jax.ShapeDtypeStruct((B, H, W, Cp), MXU_DTYPE),
                   jax.ShapeDtypeStruct((B, 2, Cp), jnp.float32)],
        scratch_shapes=[pltpu.VMEM((H + 2, W + 2, Cin), jnp.float32)],
        compiler_params=cparams,
    )(x, w1m)

    scale1, shift1 = _bn_scale_shift(jnp.sum(st1[:, 0, :], axis=0),
                                     jnp.sum(st1[:, 1, :], axis=0), n, g1, be1, Cp)

    # ---- pass B: BN1 + ReLU + conv2 + per-image stats ------------------------
    y2, st2 = pl.pallas_call(
        _bn_relu_conv2_kernel,
        grid=(B,),
        in_specs=[img_spec(Cp), vec_spec, vec_spec,
                  pl.BlockSpec((9 * Cout, Cp), lambda b: (0, 0))],
        out_specs=[img_spec(Cp), st_spec],
        out_shape=[jax.ShapeDtypeStruct((B, H, W, Cp), MXU_DTYPE),
                   jax.ShapeDtypeStruct((B, 2, Cp), jnp.float32)],
        scratch_shapes=[pltpu.VMEM((H + 2, W + 2, Cout), jnp.float32)],
        compiler_params=cparams,
    )(y1, scale1, shift1, w2m)

    scale2, shift2 = _bn_scale_shift(jnp.sum(st2[:, 0, :], axis=0),
                                     jnp.sum(st2[:, 1, :], axis=0), n, g2, be2, Cp)

    # ---- pass C: BN2 + ReLU ---------------------------------------------------
    out = pl.pallas_call(
        _bn_relu_kernel,
        grid=(B,),
        in_specs=[img_spec(Cp), vec_spec, vec_spec],
        out_specs=img_spec(Cp),
        out_shape=jax.ShapeDtypeStruct((B, H, W, Cp), jnp.float32),
        compiler_params=cparams,
    )(y2, scale2, shift2)

    return jnp.transpose(out[..., :Cout], (0, 3, 1, 2))              # back to NCHW


# --------------------------------------------------------------------------- #
# reference & test
# --------------------------------------------------------------------------- #
def _ref_double_conv(x_nchw, params):
    """Plain-JAX f32 reference (lax.conv, with bias) + training-mode BatchNorm."""
    w1, b1, g1, be1, w2, b2, g2, be2 = params
    dn = ('NHWC', 'HWIO', 'NHWC')

    def block(x, w, b, g, be):
        y = lax.conv_general_dilated(x, w, (1, 1), 'SAME', dimension_numbers=dn) + b
        mean = jnp.mean(y, axis=(0, 1, 2))
        var = jnp.mean((y - mean) ** 2, axis=(0, 1, 2))
        y = (y - mean) * lax.rsqrt(var + EPS) * g + be
        return jnp.maximum(y, 0.0)

    x = jnp.transpose(x_nchw, (0, 2, 3, 1)).astype(jnp.float32)
    x = block(x, w1, b1, g1, be1)
    x = block(x, w2, b2, g2, be2)
    return jnp.transpose(x, (0, 3, 1, 2))


def init_params(key, in_channels, out_channels):
    """Deterministic synthetic parameters (PyTorch-shaped, stored as HWIO)."""
    ks = jax.random.split(key, 4)
    fan1 = in_channels * 9
    fan2 = out_channels * 9
    w1 = jax.random.uniform(ks[0], (3, 3, in_channels, out_channels),
                            jnp.float32, -1.0, 1.0) / jnp.sqrt(fan1)
    b1 = jax.random.uniform(ks[1], (out_channels,), jnp.float32, -1.0, 1.0) / jnp.sqrt(fan1)
    w2 = jax.random.uniform(ks[2], (3, 3, out_channels, out_channels),
                            jnp.float32, -1.0, 1.0) / jnp.sqrt(fan2)
    b2 = jax.random.uniform(ks[3], (out_channels,), jnp.float32, -1.0, 1.0) / jnp.sqrt(fan2)
    g1 = jnp.ones((out_channels,), jnp.float32)
    be1 = jnp.zeros((out_channels,), jnp.float32)
    g2 = jnp.ones((out_channels,), jnp.float32)
    be2 = jnp.zeros((out_channels,), jnp.float32)
    return (w1, b1, g1, be1, w2, b2, g2, be2)


if __name__ == "__main__":
    key = jax.random.PRNGKey(0)
    kx, kp = jax.random.split(key)

    B, Cin, Cout, H, W = 2, 4, 8, 16, 16
    x = jax.random.normal(kx, (B, Cin, H, W), jnp.float32)
    params = init_params(kp, Cin, Cout)

    out = jax.block_until_ready(jax.jit(double_conv)(x, params))
    ref = jax.block_until_ready(_ref_double_conv(x, params))

    assert out.shape == (B, Cout, H, W)
    # bf16 MXU inputs / bf16 intermediates (f32 accumulation & BN math) plus two
    # BatchNorm normalisations amplify rounding to ~1e-2 absolute.
    assert jnp.allclose(out, ref, rtol=5e-2, atol=5e-2), "mismatch vs JAX reference"

    print("KERNEL_OK")
</pallas_src>

<mosaic_0001>
module attributes {stable_mosaic.version = 11 : i64} {
  func.func @_conv1_kernel(%arg0: i32, %arg1: memref<1x16x16x4xbf16, #tpu.memory_space<vmem>>, %arg2: memref<36x128xbf16, #tpu.memory_space<vmem>>, %arg3: memref<1x16x16x128xbf16, #tpu.memory_space<vmem>>, %arg4: memref<1x2x128xf32, #tpu.memory_space<vmem>>, %arg5: memref<18x18x4xf32, #tpu.memory_space<vmem>>) attributes {dimension_semantics = [#tpu.dimension_semantics<parallel>], iteration_bounds = array<i64: 2>, scalar_prefetch = 0 : i64, scratch_operands = 1 : i64, tpu.core_type = #tpu.core_type<tc>, window_params = [{transform_indices = @transform_0, window_bounds = array<i64: 1, 16, 16, 4>}, {pipeline_mode = #tpu.pipeline_mode<synchronous>, transform_indices = @transform_1, window_bounds = array<i64: 36, 128>}, {transform_indices = @transform_2, window_bounds = array<i64: 1, 16, 16, 128>}, {transform_indices = @transform_3, window_bounds = array<i64: 1, 2, 128>}]} {
    %c0 = arith.constant 0 : index
    %c0_0 = arith.constant 0 : index
    %c0_1 = arith.constant 0 : index
    %c0_2 = arith.constant 0 : index
    %0 = vector.load %arg1[%c0, %c0_0, %c0_1, %c0_2] : memref<1x16x16x4xbf16, #tpu.memory_space<vmem>>, vector<1x16x16x4xbf16>
    %1 = vector.shape_cast %0 : vector<1x16x16x4xbf16> to vector<16x16x4xbf16>
    %cst = arith.constant 0.000000e+00 : f32
    %2 = vector.broadcast %cst : f32 to vector<1x18x4xf32>
    %cst_3 = arith.constant 0.000000e+00 : f32
    %3 = vector.broadcast %cst_3 : f32 to vector<18x1x4xf32>
    %c0_4 = arith.constant 0 : index
    %c0_5 = arith.constant 0 : index
    %c0_6 = arith.constant 0 : index
    %4 = vector.load %arg5[%c0_4, %c0_5, %c0_6] : memref<18x18x4xf32, #tpu.memory_space<vmem>>, vector<1x18x4xf32>
    tpu.vector_store %arg5[%c0_4, %c0_5, %c0_6], %2 {strides = array<i32>} : memref<18x18x4xf32, #tpu.memory_space<vmem>>, vector<1x18x4xf32>,
    %c17 = arith.constant 17 : index
    %c0_7 = arith.constant 0 : index
    %c0_8 = arith.constant 0 : index
    %5 = vector.load %arg5[%c17, %c0_7, %c0_8] : memref<18x18x4xf32, #tpu.memory_space<vmem>>, vector<1x18x4xf32>
    tpu.vector_store %arg5[%c17, %c0_7, %c0_8], %2 {strides = array<i32>} : memref<18x18x4xf32, #tpu.memory_space<vmem>>, vector<1x18x4xf32>,
    %c0_9 = arith.constant 0 : index
    %c0_10 = arith.constant 0 : index
    %c0_11 = arith.constant 0 : index
    %6 = vector.load %arg5[%c0_9, %c0_10, %c0_11] : memref<18x18x4xf32, #tpu.memory_space<vmem>>, vector<18x1x4xf32>
    tpu.vector_store %arg5[%c0_9, %c0_10, %c0_11], %3 {strides = array<i32>} : memref<18x18x4xf32, #tpu.memory_space<vmem>>, vector<18x1x4xf32>,
    %c0_12 = arith.constant 0 : index
    %c17_13 = arith.constant 17 : index
    %c0_14 = arith.constant 0 : index
    %7 = vector.load %arg5[%c0_12, %c17_13, %c0_14] : memref<18x18x4xf32, #tpu.memory_space<vmem>>, vector<18x1x4xf32>
    tpu.vector_store %arg5[%c0_12, %c17_13, %c0_14], %3 {strides = array<i32>} : memref<18x18x4xf32, #tpu.memory_space<vmem>>, vector<18x1x4xf32>,
    %8 = arith.extf %1 : vector<16x16x4xbf16> to vector<16x16x4xf32>
    %c1 = arith.constant 1 : index
    %c1_15 = arith.constant 1 : index
    %c0_16 = arith.constant 0 : index
    %9 = vector.load %arg5[%c1, %c1_15, %c0_16] : memref<18x18x4xf32, #tpu.memory_space<vmem>>, vector<16x16x4xf32>
    tpu.vector_store %arg5[%c1, %c1_15, %c0_16], %8 {strides = array<i32>} : memref<18x18x4xf32, #tpu.memory_space<vmem>>, vector<16x16x4xf32>,
    %c0_17 = arith.constant 0 : index
    %c0_18 = arith.constant 0 : index
    %c0_19 = arith.constant 0 : index
    %10 = vector.load %arg5[%c0_17, %c0_18, %c0_19] : memref<18x18x4xf32, #tpu.memory_space<vmem>>, vector<16x16x4xf32>
    %11 = vector.shape_cast %10 : vector<16x16x4xf32> to vector<256x4xf32>
    %c0_20 = arith.constant 0 : index
    %c1_21 = arith.constant 1 : index
    %c0_22 = arith.constant 0 : index
    %12 = vector.load %arg5[%c0_20, %c1_21, %c0_22] : memref<18x18x4xf32, #tpu.memory_space<vmem>>, vector<16x16x4xf32>
    %13 = vector.shape_cast %12 : vector<16x16x4xf32> to vector<256x4xf32>
    %c0_23 = arith.constant 0 : index
    %c2 = arith.constant 2 : index
    %c0_24 = arith.constant 0 : index
    %14 = vector.load %arg5[%c0_23, %c2, %c0_24] : memref<18x18x4xf32, #tpu.memory_space<vmem>>, vector<16x16x4xf32>
    %15 = vector.shape_cast %14 : vector<16x16x4xf32> to vector<256x4xf32>
    %c1_25 = arith.constant 1 : index
    %c0_26 = arith.constant 0 : index
    %c0_27 = arith.constant 0 : index
    %16 = vector.load %arg5[%c1_25, %c0_26, %c0_27] : memref<18x18x4xf32, #tpu.memory_space<vmem>>, vector<16x16x4xf32>
    %17 = vector.shape_cast %16 : vector<16x16x4xf32> to vector<256x4xf32>
    %c1_28 = arith.constant 1 : index
    %c1_29 = arith.constant 1 : index
    %c0_30 = arith.constant 0 : index
    %18 = vector.load %arg5[%c1_28, %c1_29, %c0_30] : memref<18x18x4xf32, #tpu.memory_space<vmem>>, vector<16x16x4xf32>
    %19 = vector.shape_cast %18 : vector<16x16x4xf32> to vector<256x4xf32>
    %c1_31 = arith.constant 1 : index
    %c2_32 = arith.constant 2 : index
    %c0_33 = arith.constant 0 : index
    %20 = vector.load %arg5[%c1_31, %c2_32, %c0_33] : memref<18x18x4xf32, #tpu.memory_space<vmem>>, vector<16x16x4xf32>
    %21 = vector.shape_cast %20 : vector<16x16x4xf32> to vector<256x4xf32>
    %c2_34 = arith.constant 2 : index
    %c0_35 = arith.constant 0 : index
    %c0_36 = arith.constant 0 : index
    %22 = vector.load %arg5[%c2_34, %c0_35, %c0_36] : memref<18x18x4xf32, #tpu.memory_space<vmem>>, vector<16x16x4xf32>
    %23 = vector.shape_cast %22 : vector<16x16x4xf32> to vector<256x4xf32>
    %c2_37 = arith.constant 2 : index
    %c1_38 = arith.constant 1 : index
    %c0_39 = arith.constant 0 : index
    %24 = vector.load %arg5[%c2_37, %c1_38, %c0_39] : memref<18x18x4xf32, #tpu.memory_space<vmem>>, vector<16x16x4xf32>
    %25 = vector.shape_cast %24 : vector<16x16x4xf32> to vector<256x4xf32>
    %c2_40 = arith.constant 2 : index
    %c2_41 = arith.constant 2 : index
    %c0_42 = arith.constant 0 : index
    %26 = vector.load %arg5[%c2_40, %c2_41, %c0_42] : memref<18x18x4xf32, #tpu.memory_space<vmem>>, vector<16x16x4xf32>
    %27 = vector.shape_cast %26 : vector<16x16x4xf32> to vector<256x4xf32>
    %28 = tpu.concatenate %11, %13, %15, %17, %19, %21, %23, %25, %27 in 1 : vector<256x4xf32>, vector<256x4xf32>, vector<256x4xf32>, vector<256x4xf32>, vector<256x4xf32>, vector<256x4xf32>, vector<256x4xf32>, vector<256x4xf32>, vector<256x4xf32> -> vector<256x36xf32>
    %29 = arith.truncf %28 : vector<256x36xf32> to vector<256x36xbf16>
    %c0_43 = arith.constant 0 : index
    %c0_44 = arith.constant 0 : index
    %30 = vector.load %arg2[%c0_43, %c0_44] : memref<36x128xbf16, #tpu.memory_space<vmem>>, vector<36x128xbf16>
    %cst_45 = arith.constant dense<0.000000e+00> : vector<256x128xf32>
    %31 = tpu.matmul %29, %30, %cst_45 {dimension_numbers = #tpu.dot_dimension_numbers<[1], [0], [0], [1], [0, 0, 1, 1], [], []>} : vector<256x36xbf16>, vector<36x128xbf16>, vector<256x128xf32> -> vector<256x128xf32>
    %32 = vector.shape_cast %31 : vector<256x128xf32> to vector<1x16x16x128xf32>
    %33 = arith.truncf %32 : vector<1x16x16x128xf32> to vector<1x16x16x128xbf16>
    %c0_46 = arith.constant 0 : index
    %c0_47 = arith.constant 0 : index
    %c0_48 = arith.constant 0 : index
    %c0_49 = arith.constant 0 : index
    %34 = vector.load %arg3[%c0_46, %c0_47, %c0_48, %c0_49] : memref<1x16x16x128xbf16, #tpu.memory_space<vmem>>, vector<1x16x16x128xbf16>
    tpu.vector_store %arg3[%c0_46, %c0_47, %c0_48, %c0_49], %33 {strides = array<i32>} : memref<1x16x16x128xbf16, #tpu.memory_space<vmem>>, vector<1x16x16x128xbf16>,
    %cst_50 = arith.constant dense<0.000000e+00> : vector<128xf32>
    %35 = vector.multi_reduction <add>, %31, %cst_50 [0] : vector<256x128xf32> to vector<128xf32>
    %36 = vector.shape_cast %35 : vector<128xf32> to vector<1x128xf32>
    %37 = arith.mulf %31, %31 : vector<256x128xf32>
    %cst_51 = arith.constant dense<0.000000e+00> : vector<128xf32>
    %38 = vector.multi_reduction <add>, %37, %cst_51 [0] : vector<256x128xf32> to vector<128xf32>
    %39 = vector.shape_cast %38 : vector<128xf32> to vector<1x128xf32>
    %40 = tpu.concatenate %36, %39 in 0 : vector<1x128xf32>, vector<1x128xf32> -> vector<2x128xf32>
    %41 = vector.shape_cast %40 : vector<2x128xf32> to vector<1x2x128xf32>
    %c0_52 = arith.constant 0 : index
    %c0_53 = arith.constant 0 : index
    %c0_54 = arith.constant 0 : index
    %42 = vector.load %arg4[%c0_52, %c0_53, %c0_54] : memref<1x2x128xf32, #tpu.memory_space<vmem>>, vector<1x2x128xf32>
    tpu.vector_store %arg4[%c0_52, %c0_53, %c0_54], %41 {strides = array<i32>} : memref<1x2x128xf32, #tpu.memory_space<vmem>>, vector<1x2x128xf32>,
    return
  }
  func.func @transform_0(%arg0: i32) -> (i32, i32, i32, i32) {
    %c0_i32 = arith.constant 0 : i32
    %c0_i32_0 = arith.constant 0 : i32
    %c0_i32_1 = arith.constant 0 : i32
    %c0_i32_2 = arith.constant 0 : i32
    return %arg0, %c0_i32, %c0_i32_0, %c0_i32_1 : i32, i32, i32, i32
  }
  func.func @transform_1(%arg0: i32) -> (i32, i32) {
    %c0_i32 = arith.constant 0 : i32
    %c0_i32_0 = arith.constant 0 : i32
    %c0_i32_1 = arith.constant 0 : i32
    return %c0_i32, %c0_i32_0 : i32, i32
  }
  func.func @transform_2(%arg0: i32) -> (i32, i32, i32, i32) {
    %c0_i32 = arith.constant 0 : i32
    %c0_i32_0 = arith.constant 0 : i32
    %c0_i32_1 = arith.constant 0 : i32
    %c0_i32_2 = arith.constant 0 : i32
    return %arg0, %c0_i32, %c0_i32_0, %c0_i32_1 : i32, i32, i32, i32
  }
  func.func @transform_3(%arg0: i32) -> (i32, i32, i32) {
    %c0_i32 = arith.constant 0 : i32
    %c0_i32_0 = arith.constant 0 : i32
    %c0_i32_1 = arith.constant 0 : i32
    return %arg0, %c0_i32, %c0_i32_0 : i32, i32, i32
  }
}

module attributes {stable_mosaic.version = 11 : i64} {
  func.func @_bn_relu_kernel(%arg0: i32, %arg1: memref<1x16x16x128xbf16, #tpu.memory_space<vmem>>, %arg2: memref<1x128xf32, #tpu.memory_space<vmem>>, %arg3: memref<1x128xf32, #tpu.memory_space<vmem>>, %arg4: memref<1x16x16x128xf32, #tpu.memory_space<vmem>>) attributes {dimension_semantics = [#tpu.dimension_semantics<parallel>], iteration_bounds = array<i64: 2>, scalar_prefetch = 0 : i64, scratch_operands = 0 : i64, tpu.core_type = #tpu.core_type<tc>, window_params = [{transform_indices = @transform_0, window_bounds = array<i64: 1, 16, 16, 128>}, {pipeline_mode = #tpu.pipeline_mode<synchronous>, transform_indices = @transform_1, window_bounds = array<i64: 1, 128>}, {pipeline_mode = #tpu.pipeline_mode<synchronous>, transform_indices = @transform_2, window_bounds = array<i64: 1, 128>}, {transform_indices = @transform_3, window_bounds = array<i64: 1, 16, 16, 128>}]} {
    %c0 = arith.constant 0 : index
    %c0_0 = arith.constant 0 : index
    %0 = vector.load %arg2[%c0, %c0_0] : memref<1x128xf32, #tpu.memory_space<vmem>>, vector<1x128xf32>
    %1 = vector.shape_cast %0 : vector<1x128xf32> to vector<1x1x1x128xf32>
    %c0_1 = arith.constant 0 : index
    %c0_2 = arith.constant 0 : index
    %2 = vector.load %arg3[%c0_1, %c0_2] : memref<1x128xf32, #tpu.memory_space<vmem>>, vector<1x128xf32>
    %3 = vector.shape_cast %2 : vector<1x128xf32> to vector<1x1x1x128xf32>
    %c0_3 = arith.constant 0 : index
    %c0_4 = arith.constant 0 : index
    %c0_5 = arith.constant 0 : index
    %c0_6 = arith.constant 0 : index
    %4 = vector.load %arg1[%c0_3, %c0_4, %c0_5, %c0_6] : memref<1x16x16x128xbf16, #tpu.memory_space<vmem>>, vector<1x16x16x128xbf16>
    %5 = arith.extf %4 : vector<1x16x16x128xbf16> to vector<1x16x16x128xf32>
    %6 = vector.broadcast %1 : vector<1x1x1x128xf32> to vector<1x16x16x128xf32>
    %7 = arith.mulf %5, %6 : vector<1x16x16x128xf32>
    %8 = vector.broadcast %3 : vector<1x1x1x128xf32> to vector<1x16x16x128xf32>
    %9 = arith.addf %7, %8 : vector<1x16x16x128xf32>
    %cst = arith.constant 0.000000e+00 : f32
    %10 = vector.broadcast %cst : f32 to vector<1x16x16x128xf32>
    %11 = arith.maximumf %9, %10 : vector<1x16x16x128xf32>
    %c0_7 = arith.constant 0 : index
    %c0_8 = arith.constant 0 : index
    %c0_9 = arith.constant 0 : index
    %c0_10 = arith.constant 0 : index
    %12 = vector.load %arg4[%c0_7, %c0_8, %c0_9, %c0_10] : memref<1x16x16x128xf32, #tpu.memory_space<vmem>>, vector<1x16x16x128xf32>
    tpu.vector_store %arg4[%c0_7, %c0_8, %c0_9, %c0_10], %11 {strides = array<i32>} : memref<1x16x16x128xf32, #tpu.memory_space<vmem>>, vector<1x16x16x128xf32>,
    return
  }
  func.func @transform_0(%arg0: i32) -> (i32, i32, i32, i32) {
    %c0_i32 = arith.constant 0 : i32
    %c0_i32_0 = arith.constant 0 : i32
    %c0_i32_1 = arith.constant 0 : i32
    %c0_i32_2 = arith.constant 0 : i32
    return %arg0, %c0_i32, %c0_i32_0, %c0_i32_1 : i32, i32, i32, i32
  }
  func.func @transform_1(%arg0: i32) -> (i32, i32) {
    %c0_i32 = arith.constant 0 : i32
    %c0_i32_0 = arith.constant 0 : i32
    %c0_i32_1 = arith.constant 0 : i32
    return %c0_i32, %c0_i32_0 : i32, i32
  }
  func.func @transform_2(%arg0: i32) -> (i32, i32) {
    %c0_i32 = arith.constant 0 : i32
    %c0_i32_0 = arith.constant 0 : i32
    %c0_i32_1 = arith.constant 0 : i32
    return %c0_i32, %c0_i32_0 : i32, i32
  }
  func.func @transform_3(%arg0: i32) -> (i32, i32, i32, i32) {
    %c0_i32 = arith.constant 0 : i32
    %c0_i32_0 = arith.constant 0 : i32
    %c0_i32_1 = arith.constant 0 : i32
    %c0_i32_2 = arith.constant 0 : i32
    return %arg0, %c0_i32, %c0_i32_0, %c0_i32_1 : i32, i32, i32, i32
  }
}

module attributes {stable_mosaic.version = 11 : i64} {
  func.func @_bn_relu_conv2_kernel(%arg0: i32, %arg1: memref<1x16x16x128xbf16, #tpu.memory_space<vmem>>, %arg2: memref<1x128xf32, #tpu.memory_space<vmem>>, %arg3: memref<1x128xf32, #tpu.memory_space<vmem>>, %arg4: memref<72x128xbf16, #tpu.memory_space<vmem>>, %arg5: memref<1x16x16x128xbf16, #tpu.memory_space<vmem>>, %arg6: memref<1x2x128xf32, #tpu.memory_space<vmem>>, %arg7: memref<18x18x8xf32, #tpu.memory_space<vmem>>) attributes {dimension_semantics = [#tpu.dimension_semantics<parallel>], iteration_bounds = array<i64: 2>, scalar_prefetch = 0 : i64, scratch_operands = 1 : i64, tpu.core_type = #tpu.core_type<tc>, window_params = [{transform_indices = @transform_0, window_bounds = array<i64: 1, 16, 16, 128>}, {pipeline_mode = #tpu.pipeline_mode<synchronous>, transform_indices = @transform_1, window_bounds = array<i64: 1, 128>}, {pipeline_mode = #tpu.pipeline_mode<synchronous>, transform_indices = @transform_2, window_bounds = array<i64: 1, 128>}, {pipeline_mode = #tpu.pipeline_mode<synchronous>, transform_indices = @transform_3, window_bounds = array<i64: 72, 128>}, {transform_indices = @transform_4, window_bounds = array<i64: 1, 16, 16, 128>}, {transform_indices = @transform_5, window_bounds = array<i64: 1, 2, 128>}]} {
    %c0 = arith.constant 0 : index
    %c0_0 = arith.constant 0 : index
    %c0_1 = arith.constant 0 : index
    %c0_2 = arith.constant 0 : index
    %0 = vector.load %arg1[%c0, %c0_0, %c0_1, %c0_2] : memref<1x16x16x128xbf16, #tpu.memory_space<vmem>>, vector<1x16x16x128xbf16>
    %1 = vector.shape_cast %0 : vector<1x16x16x128xbf16> to vector<16x16x128xbf16>
    %2 = vector.shape_cast %1 : vector<16x16x128xbf16> to vector<256x128xbf16>
    %3 = arith.extf %2 : vector<256x128xbf16> to vector<256x128xf32>
    %c0_3 = arith.constant 0 : index
    %c0_4 = arith.constant 0 : index
    %4 = vector.load %arg2[%c0_3, %c0_4] : memref<1x128xf32, #tpu.memory_space<vmem>>, vector<1x128xf32>
    %5 = vector.broadcast %4 : vector<1x128xf32> to vector<256x128xf32>
    %6 = arith.mulf %3, %5 : vector<256x128xf32>
    %c0_5 = arith.constant 0 : index
    %c0_6 = arith.constant 0 : index
    %7 = vector.load %arg3[%c0_5, %c0_6] : memref<1x128xf32, #tpu.memory_space<vmem>>, vector<1x128xf32>
    %8 = vector.broadcast %7 : vector<1x128xf32> to vector<256x128xf32>
    %9 = arith.addf %6, %8 : vector<256x128xf32>
    %cst = arith.constant 0.000000e+00 : f32
    %10 = vector.broadcast %cst : f32 to vector<256x128xf32>
    %11 = arith.maximumf %9, %10 : vector<256x128xf32>
    %12 = vector.extract_strided_slice %11 {offsets = [0, 0], sizes = [256, 8], strides = [1, 1]} : vector<256x128xf32> to vector<256x8xf32>
    %13 = vector.shape_cast %12 : vector<256x8xf32> to vector<16x16x8xf32>
    %cst_7 = arith.constant 0.000000e+00 : f32
    %14 = vector.broadcast %cst_7 : f32 to vector<1x18x8xf32>
    %cst_8 = arith.constant 0.000000e+00 : f32
    %15 = vector.broadcast %cst_8 : f32 to vector<18x1x8xf32>
    %c0_9 = arith.constant 0 : index
    %c0_10 = arith.constant 0 : index
    %c0_11 = arith.constant 0 : index
    %16 = vector.load %arg7[%c0_9, %c0_10, %c0_11] : memref<18x18x8xf32, #tpu.memory_space<vmem>>, vector<1x18x8xf32>
    tpu.vector_store %arg7[%c0_9, %c0_10, %c0_11], %14 {strides = array<i32>} : memref<18x18x8xf32, #tpu.memory_space<vmem>>, vector<1x18x8xf32>,
    %c17 = arith.constant 17 : index
    %c0_12 = arith.constant 0 : index
    %c0_13 = arith.constant 0 : index
    %17 = vector.load %arg7[%c17, %c0_12, %c0_13] : memref<18x18x8xf32, #tpu.memory_space<vmem>>, vector<1x18x8xf32>
    tpu.vector_store %arg7[%c17, %c0_12, %c0_13], %14 {strides = array<i32>} : memref<18x18x8xf32, #tpu.memory_space<vmem>>, vector<1x18x8xf32>,
    %c0_14 = arith.constant 0 : index
    %c0_15 = arith.constant 0 : index
    %c0_16 = arith.constant 0 : index
    %18 = vector.load %arg7[%c0_14, %c0_15, %c0_16] : memref<18x18x8xf32, #tpu.memory_space<vmem>>, vector<18x1x8xf32>
    tpu.vector_store %arg7[%c0_14, %c0_15, %c0_16], %15 {strides = array<i32>} : memref<18x18x8xf32, #tpu.memory_space<vmem>>, vector<18x1x8xf32>,
    %c0_17 = arith.constant 0 : index
    %c17_18 = arith.constant 17 : index
    %c0_19 = arith.constant 0 : index
    %19 = vector.load %arg7[%c0_17, %c17_18, %c0_19] : memref<18x18x8xf32, #tpu.memory_space<vmem>>, vector<18x1x8xf32>
    tpu.vector_store %arg7[%c0_17, %c17_18, %c0_19], %15 {strides = array<i32>} : memref<18x18x8xf32, #tpu.memory_space<vmem>>, vector<18x1x8xf32>,
    %c1 = arith.constant 1 : index
    %c1_20 = arith.constant 1 : index
    %c0_21 = arith.constant 0 : index
    %20 = vector.load %arg7[%c1, %c1_20, %c0_21] : memref<18x18x8xf32, #tpu.memory_space<vmem>>, vector<16x16x8xf32>
    tpu.vector_store %arg7[%c1, %c1_20, %c0_21], %13 {strides = array<i32>} : memref<18x18x8xf32, #tpu.memory_space<vmem>>, vector<16x16x8xf32>,
    %c0_22 = arith.constant 0 : index
    %c0_23 = arith.constant 0 : index
    %c0_24 = arith.constant 0 : index
    %21 = vector.load %arg7[%c0_22, %c0_23, %c0_24] : memref<18x18x8xf32, #tpu.memory_space<vmem>>, vector<16x16x8xf32>
    %22 = vector.shape_cast %21 : vector<16x16x8xf32> to vector<256x8xf32>
    %c0_25 = arith.constant 0 : index
    %c1_26 = arith.constant 1 : index
    %c0_27 = arith.constant 0 : index
    %23 = vector.load %arg7[%c0_25, %c1_26, %c0_27] : memref<18x18x8xf32, #tpu.memory_space<vmem>>, vector<16x16x8xf32>
    %24 = vector.shape_cast %23 : vector<16x16x8xf32> to vector<256x8xf32>
    %c0_28 = arith.constant 0 : index
    %c2 = arith.constant 2 : index
    %c0_29 = arith.constant 0 : index
    %25 = vector.load %arg7[%c0_28, %c2, %c0_29] : memref<18x18x8xf32, #tpu.memory_space<vmem>>, vector<16x16x8xf32>
    %26 = vector.shape_cast %25 : vector<16x16x8xf32> to vector<256x8xf32>
    %c1_30 = arith.constant 1 : index
    %c0_31 = arith.constant 0 : index
    %c0_32 = arith.constant 0 : index
    %27 = vector.load %arg7[%c1_30, %c0_31, %c0_32] : memref<18x18x8xf32, #tpu.memory_space<vmem>>, vector<16x16x8xf32>
    %28 = vector.shape_cast %27 : vector<16x16x8xf32> to vector<256x8xf32>
    %c1_33 = arith.constant 1 : index
    %c1_34 = arith.constant 1 : index
    %c0_35 = arith.constant 0 : index
    %29 = vector.load %arg7[%c1_33, %c1_34, %c0_35] : memref<18x18x8xf32, #tpu.memory_space<vmem>>, vector<16x16x8xf32>
    %30 = vector.shape_cast %29 : vector<16x16x8xf32> to vector<256x8xf32>
    %c1_36 = arith.constant 1 : index
    %c2_37 = arith.constant 2 : index
    %c0_38 = arith.constant 0 : index
    %31 = vector.load %arg7[%c1_36, %c2_37, %c0_38] : memref<18x18x8xf32, #tpu.memory_space<vmem>>, vector<16x16x8xf32>
    %32 = vector.shape_cast %31 : vector<16x16x8xf32> to vector<256x8xf32>
    %c2_39 = arith.constant 2 : index
    %c0_40 = arith.constant 0 : index
    %c0_41 = arith.constant 0 : index
    %33 = vector.load %arg7[%c2_39, %c0_40, %c0_41] : memref<18x18x8xf32, #tpu.memory_space<vmem>>, vector<16x16x8xf32>
    %34 = vector.shape_cast %33 : vector<16x16x8xf32> to vector<256x8xf32>
    %c2_42 = arith.constant 2 : index
    %c1_43 = arith.constant 1 : index
    %c0_44 = arith.constant 0 : index
    %35 = vector.load %arg7[%c2_42, %c1_43, %c0_44] : memref<18x18x8xf32, #tpu.memory_space<vmem>>, vector<16x16x8xf32>
    %36 = vector.shape_cast %35 : vector<16x16x8xf32> to vector<256x8xf32>
    %c2_45 = arith.constant 2 : index
    %c2_46 = arith.constant 2 : index
    %c0_47 = arith.constant 0 : index
    %37 = vector.load %arg7[%c2_45, %c2_46, %c0_47] : memref<18x18x8xf32, #tpu.memory_space<vmem>>, vector<16x16x8xf32>
    %38 = vector.shape_cast %37 : vector<16x16x8xf32> to vector<256x8xf32>
    %39 = tpu.concatenate %22, %24, %26, %28, %30, %32, %34, %36, %38 in 1 : vector<256x8xf32>, vector<256x8xf32>, vector<256x8xf32>, vector<256x8xf32>, vector<256x8xf32>, vector<256x8xf32>, vector<256x8xf32>, vector<256x8xf32>, vector<256x8xf32> -> vector<256x72xf32>
    %40 = arith.truncf %39 : vector<256x72xf32> to vector<256x72xbf16>
    %c0_48 = arith.constant 0 : index
    %c0_49 = arith.constant 0 : index
    %41 = vector.load %arg4[%c0_48, %c0_49] : memref<72x128xbf16, #tpu.memory_space<vmem>>, vector<72x128xbf16>
    %cst_50 = arith.constant dense<0.000000e+00> : vector<256x128xf32>
    %42 = tpu.matmul %40, %41, %cst_50 {dimension_numbers = #tpu.dot_dimension_numbers<[1], [0], [0], [1], [0, 0, 1, 1], [], []>} : vector<256x72xbf16>, vector<72x128xbf16>, vector<256x128xf32> -> vector<256x128xf32>
    %43 = vector.shape_cast %42 : vector<256x128xf32> to vector<1x16x16x128xf32>
    %44 = arith.truncf %43 : vector<1x16x16x128xf32> to vector<1x16x16x128xbf16>
    %c0_51 = arith.constant 0 : index
    %c0_52 = arith.constant 0 : index
    %c0_53 = arith.constant 0 : index
    %c0_54 = arith.constant 0 : index
    %45 = vector.load %arg5[%c0_51, %c0_52, %c0_53, %c0_54] : memref<1x16x16x128xbf16, #tpu.memory_space<vmem>>, vector<1x16x16x128xbf16>
    tpu.vector_store %arg5[%c0_51, %c0_52, %c0_53, %c0_54], %44 {strides = array<i32>} : memref<1x16x16x128xbf16, #tpu.memory_space<vmem>>, vector<1x16x16x128xbf16>,
    %cst_55 = arith.constant dense<0.000000e+00> : vector<128xf32>
    %46 = vector.multi_reduction <add>, %42, %cst_55 [0] : vector<256x128xf32> to vector<128xf32>
    %47 = vector.shape_cast %46 : vector<128xf32> to vector<1x128xf32>
    %48 = arith.mulf %42, %42 : vector<256x128xf32>
    %cst_56 = arith.constant dense<0.000000e+00> : vector<128xf32>
    %49 = vector.multi_reduction <add>, %48, %cst_56 [0] : vector<256x128xf32> to vector<128xf32>
    %50 = vector.shape_cast %49 : vector<128xf32> to vector<1x128xf32>
    %51 = tpu.concatenate %47, %50 in 0 : vector<1x128xf32>, vector<1x128xf32> -> vector<2x128xf32>
    %52 = vector.shape_cast %51 : vector<2x128xf32> to vector<1x2x128xf32>
    %c0_57 = arith.constant 0 : index
    %c0_58 = arith.constant 0 : index
    %c0_59 = arith.constant 0 : index
    %53 = vector.load %arg6[%c0_57, %c0_58, %c0_59] : memref<1x2x128xf32, #tpu.memory_space<vmem>>, vector<1x2x128xf32>
    tpu.vector_store %arg6[%c0_57, %c0_58, %c0_59], %52 {strides = array<i32>} : memref<1x2x128xf32, #tpu.memory_space<vmem>>, vector<1x2x128xf32>,
    return
  }
  func.func @transform_0(%arg0: i32) -> (i32, i32, i32, i32) {
    %c0_i32 = arith.constant 0 : i32
    %c0_i32_0 = arith.constant 0 : i32
    %c0_i32_1 = arith.constant 0 : i32
    %c0_i32_2 = arith.constant 0 : i32
    return %arg0, %c0_i32, %c0_i32_0, %c0_i32_1 : i32, i32, i32, i32
  }
  func.func @transform_1(%arg0: i32) -> (i32, i32) {
    %c0_i32 = arith.constant 0 : i32
    %c0_i32_0 = arith.constant 0 : i32
    %c0_i32_1 = arith.constant 0 : i32
    return %c0_i32, %c0_i32_0 : i32, i32
  }
  func.func @transform_2(%arg0: i32) -> (i32, i32) {
    %c0_i32 = arith.constant 0 : i32
    %c0_i32_0 = arith.constant 0 : i32
    %c0_i32_1 = arith.constant 0 : i32
    return %c0_i32, %c0_i32_0 : i32, i32
  }
  func.func @transform_3(%arg0: i32) -> (i32, i32) {
    %c0_i32 = arith.constant 0 : i32
    %c0_i32_0 = arith.constant 0 : i32
    %c0_i32_1 = arith.constant 0 : i32
    return %c0_i32, %c0_i32_0 : i32, i32
  }
  func.func @transform_4(%arg0: i32) -> (i32, i32, i32, i32) {
    %c0_i32 = arith.constant 0 : i32
    %c0_i32_0 = arith.constant 0 : i32
    %c0_i32_1 = arith.constant 0 : i32
    %c0_i32_2 = arith.constant 0 : i32
    return %arg0, %c0_i32, %c0_i32_0, %c0_i32_1 : i32, i32, i32, i32
  }
  func.func @transform_5(%arg0: i32) -> (i32, i32, i32) {
    %c0_i32 = arith.constant 0 : i32
    %c0_i32_0 = arith.constant 0 : i32
    %c0_i32_1 = arith.constant 0 : i32
    return %arg0, %c0_i32, %c0_i32_0 : i32, i32, i32
  }
}

</mosaic_0001>

<bundles_post_ra>
// kernel: double_conv.5
= control target key start
LH: loop header
LB: loop body
LE: loop exit
PB: predicated region body
PF: predicated region fallthrough
CT: control target
= control target key end

     0   :  { %s562_s12 = smov 0   ;;  %s709_s0 = inlined_call_operand.vmem [shape: bf16[2,16,16,128], index: 0, kind: input, shape index: {}]   ;;  %s710_s1 = inlined_call_operand.vmem [shape: f32[1,128], index: 1, kind: input, shape index: {}]   ;;  %s711_s2 = inlined_call_operand.vmem [shape: f32[1,128], index: 2, kind: input, shape index: {}]   ;;  %s712_s3 = inlined_call_operand.vmem [shape: f32[2,16,16,128], index: 3, kind: output, shape index: {}]  }
   0x1 LB: > { %s432_s13 = sadd.s32 4294967295, %s540_s12   ;;  %p436_p0 = scmp.ge.s32.totalorder %s540_s12, 1  ;;  %s540_s12 = sphi %s562_s12, %s13_s12  }
   0x2   : > { %p137_p1 = scmp.lt.s32.totalorder %s540_s12, 3 }
   0x4   : > { %p138_p2 = pnand %p436_p0, %p137_p1 }
   0x5   : > { %p161_p3 = scmp.lt.s32.totalorder (!%p138_p2), %s432_s13, 1  ;;  %v581_v0 = vld [vmem:[%s710_s1] ss:$0 sm:$0xff] (!%p138_p2) }
   0x6   : > { %141 = sbr.rel (%p138_p2) target bundleno = 53 (0x35), region = 32  ;;  %v590_v9 = vld [vmem:[%s711_s2] ss:$0 sm:$0xff] (!%p138_p2) }
   0xd   : > { %s714_s13 = smov (!%p161_p3, %s432_s13), 1 }
   0xe   : > { %s445_s14 = sshll.u32 %s714_s13, 7  ;;  %s446_s22 = sshll.u32 %s714_s13, 8 }
   0xf   : > { %s576_s17 = scalar_lea.vmem %s709_s0, %s445_s14  ;;  %s608_s25 = scalar_lea.vmem %s712_s3, %s446_s22 }
  0x10   : > { %v448_v1 = vld [vmem:[%s576_s17] sm:$0xff]   ;;  %v511_v2 = vld [vmem:[%s576_s17 + $0x8] sm:$0xff]   ;;  %v512_v3 = vld [vmem:[%s576_s17 + $0x10] sm:$0xff]  }
  0x11   : > { %v449_v4 = vunpack.c.l.bf16 %v448_v1  ;;  %v450_v5 = vunpack.c.h.bf16 %v448_v1  ;;  %v453_v6 = vunpack.c.l.bf16 %v511_v2  ;;  %v454_v7 = vunpack.c.h.bf16 %v511_v2  ;;  %v513_v8 = vld [vmem:[%s576_s17 + $0x18] sm:$0xff]   ;;  %v514_v30 = vld [vmem:[%s576_s17 + $0x20] sm:$0xff]   ;;  %v515_v31 = vld [vmem:[%s576_s17 + $0x28] sm:$0xff]  }
  0x12   : > { %v457_v10 = vunpack.c.l.bf16 %v512_v3  ;;  %v458_v11 = vunpack.c.h.bf16 %v512_v3  ;;  %v461_v12 = vunpack.c.l.bf16 %v513_v8  ;;  %v462_v13 = vunpack.c.h.bf16 %v513_v8  ;;  %v516_v36 = vld [vmem:[%s576_s17 + $0x30] sm:$0xff]   ;;  %v517_v37 = vld [vmem:[%s576_s17 + $0x38] sm:$0xff]   ;;  %v518_v3 = vld [vmem:[%s576_s17 + $0x40] sm:$0xff]  }
  0x13   : > { %v243_v14 = vmul.f32 %v449_v4, %v581_v0  ;;  %v244_v15 = vmul.f32 %v450_v5, %v581_v0  ;;  %v245_v16 = vmul.f32 %v453_v6, %v581_v0  ;;  %v246_v17 = vmul.f32 %v454_v7, %v581_v0  ;;  %v519_v4 = vld [vmem:[%s576_s17 + $0x48] sm:$0xff]  }
  0x14   : > { %v247_v18 = vmul.f32 %v457_v10, %v581_v0  ;;  %v248_v19 = vmul.f32 %v458_v11, %v581_v0  ;;  %v249_v20 = vmul.f32 %v461_v12, %v581_v0  ;;  %v250_v21 = vmul.f32 %v462_v13, %v581_v0  ;;  %v520_v10 = vld [vmem:[%s576_s17 + $0x50] sm:$0xff]   ;;  %v521_v11 = vld [vmem:[%s576_s17 + $0x58] sm:$0xff]  }
  0x15   : > { %v281_v22 = vadd.f32 %v590_v9, %v243_v14  ;;  %v282_v23 = vadd.f32 %v590_v9, %v244_v15  ;;  %v283_v24 = vadd.f32 %v590_v9, %v245_v16  ;;  %v284_v25 = vadd.f32 %v590_v9, %v246_v17 }
  0x16   : > { %v285_v26 = vadd.f32 %v590_v9, %v247_v18  ;;  %v286_v27 = vadd.f32 %v590_v9, %v248_v19  ;;  %v287_v28 = vadd.f32 %v590_v9, %v249_v20  ;;  %v288_v29 = vadd.f32 %v590_v9, %v250_v21 }
  0x17   : > { %v313_v32 = vmax.f32 %v281_v22, 0.0  ;;  %v314_v33 = vmax.f32 %v282_v23, 0.0  ;;  %v315_v34 = vmax.f32 %v283_v24, 0.0  ;;  %v316_v35 = vmax.f32 %v284_v25, 0.0 }
  0x18   : > { %v317_v38 = vmax.f32 %v285_v26, 0.0  ;;  %v318_v39 = vmax.f32 %v286_v27, 0.0  ;;  %v319_v40 = vmax.f32 %v287_v28, 0.0  ;;  %v320_v41 = vmax.f32 %v288_v29, 0.0 }
  0x19   : > { %345 = vst [vmem:[%s608_s25] sm:$0xff] %v313_v32  ;;  %346 = vst [vmem:[%s608_s25 + $0x8] sm:$0xff] %v314_v33  ;;  %v465_v42 = vunpack.c.l.bf16 %v514_v30  ;;  %v466_v43 = vunpack.c.h.bf16 %v514_v30  ;;  %v469_v44 = vunpack.c.l.bf16 %v515_v31  ;;  %v470_v45 = vunpack.c.h.bf16 %v515_v31 }
  0x1a   : > { %347 = vst [vmem:[%s608_s25 + $0x10] sm:$0xff] %v315_v34  ;;  %348 = vst [vmem:[%s608_s25 + $0x18] sm:$0xff] %v316_v35  ;;  %v473_v46 = vunpack.c.l.bf16 %v516_v36  ;;  %v474_v47 = vunpack.c.h.bf16 %v516_v36  ;;  %v477_v48 = vunpack.c.l.bf16 %v517_v37  ;;  %v478_v49 = vunpack.c.h.bf16 %v517_v37 }
  0x1b   : > { %349 = vst [vmem:[%s608_s25 + $0x20] sm:$0xff] %v317_v38  ;;  %350 = vst [vmem:[%s608_s25 + $0x28] sm:$0xff] %v318_v39  ;;  %v251_v50 = vmul.f32 %v465_v42, %v581_v0  ;;  %v252_v51 = vmul.f32 %v466_v43, %v581_v0  ;;  %v253_v52 = vmul.f32 %v469_v44, %v581_v0  ;;  %v481_v16 = vunpack.c.l.bf16 %v518_v3 }
  0x1c   : > { %351 = vst [vmem:[%s608_s25 + $0x30] sm:$0xff] %v319_v40  ;;  %352 = vst [vmem:[%s608_s25 + $0x38] sm:$0xff] %v320_v41  ;;  %v254_v53 = vmul.f32 %v470_v45, %v581_v0  ;;  %v255_v54 = vmul.f32 %v473_v46, %v581_v0  ;;  %v256_v55 = vmul.f32 %v474_v47, %v581_v0  ;;  %v482_v17 = vunpack.c.h.bf16 %v518_v3  ;;  %v522_v40 = vld [vmem:[%s576_s17 + $0x60] sm:$0xff]   ;;  %v523_v41 = vld [vmem:[%s576_s17 + $0x68] sm:$0xff]  }
  0x1d   : > { %v257_v56 = vmul.f32 %v477_v48, %v581_v0  ;;  %v258_v57 = vmul.f32 %v478_v49, %v581_v0  ;;  %v289_v58 = vadd.f32 %v590_v9, %v251_v50  ;;  %v290_v59 = vadd.f32 %v590_v9, %v252_v51  ;;  %v524_v46 = vld [vmem:[%s576_s17 + $0x70] sm:$0xff]   ;;  %v525_v47 = vld [vmem:[%s576_s17 + $0x78] sm:$0xff]  }
  0x1e   : > { %v291_v60 = vadd.f32 %v590_v9, %v253_v52  ;;  %v292_v61 = vadd.f32 %v590_v9, %v254_v53  ;;  %v293_v62 = vadd.f32 %v590_v9, %v255_v54  ;;  %v294_v63 = vadd.f32 %v590_v9, %v256_v55 }
  0x1f   : > { %v295_v1 = vadd.f32 %v590_v9, %v257_v56  ;;  %v296_v2 = vadd.f32 %v590_v9, %v258_v57  ;;  %v321_v5 = vmax.f32 %v289_v58, 0.0  ;;  %v322_v6 = vmax.f32 %v290_v59, 0.0 }
  0x20   : > { %v323_v7 = vmax.f32 %v291_v60, 0.0  ;;  %v324_v8 = vmax.f32 %v292_v61, 0.0  ;;  %v325_v12 = vmax.f32 %v293_v62, 0.0  ;;  %v326_v13 = vmax.f32 %v294_v63, 0.0 }
  0x21   : > { %v327_v14 = vmax.f32 %v295_v1, 0.0  ;;  %v328_v15 = vmax.f32 %v296_v2, 0.0  ;;  %353 = vst [vmem:[%s608_s25 + $0x40] sm:$0xff] %v321_v5  ;;  %354 = vst [vmem:[%s608_s25 + $0x48] sm:$0xff] %v322_v6  ;;  %v485_v18 = vunpack.c.l.bf16 %v519_v4  ;;  %v486_v19 = vunpack.c.h.bf16 %v519_v4 }
  0x22   : > { %355 = vst [vmem:[%s608_s25 + $0x50] sm:$0xff] %v323_v7  ;;  %356 = vst [vmem:[%s608_s25 + $0x58] sm:$0xff] %v324_v8  ;;  %v489_v20 = vunpack.c.l.bf16 %v520_v10  ;;  %v490_v21 = vunpack.c.h.bf16 %v520_v10  ;;  %v493_v22 = vunpack.c.l.bf16 %v521_v11  ;;  %v494_v23 = vunpack.c.h.bf16 %v521_v11 }
  0x23   : > { %357 = vst [vmem:[%s608_s25 + $0x60] sm:$0xff] %v325_v12  ;;  %358 = vst [vmem:[%s608_s25 + $0x68] sm:$0xff] %v326_v13  ;;  %v259_v24 = vmul.f32 %v481_v16, %v581_v0  ;;  %v260_v25 = vmul.f32 %v482_v17, %v581_v0  ;;  %v261_v26 = vmul.f32 %v485_v18, %v581_v0  ;;  %v497_v52 = vunpack.c.l.bf16 %v522_v40 }
  0x24   : > { %359 = vst [vmem:[%s608_s25 + $0x70] sm:$0xff] %v327_v14  ;;  %360 = vst [vmem:[%s608_s25 + $0x78] sm:$0xff] %v328_v15  ;;  %v262_v27 = vmul.f32 %v486_v19, %v581_v0  ;;  %v263_v28 = vmul.f32 %v489_v20, %v581_v0  ;;  %v264_v29 = vmul.f32 %v490_v21, %v581_v0  ;;  %v498_v53 = vunpack.c.h.bf16 %v522_v40 }
  0x25   : > { %v265_v30 = vmul.f32 %v493_v22, %v581_v0  ;;  %v266_v31 = vmul.f32 %v494_v23, %v581_v0  ;;  %v297_v32 = vadd.f32 %v590_v9, %v259_v24  ;;  %v298_v33 = vadd.f32 %v590_v9, %v260_v25 }
  0x26   : > { %v299_v34 = vadd.f32 %v590_v9, %v261_v26  ;;  %v300_v35 = vadd.f32 %v590_v9, %v262_v27  ;;  %v301_v36 = vadd.f32 %v590_v9, %v263_v28  ;;  %v302_v37 = vadd.f32 %v590_v9, %v264_v29 }
  0x27   : > { %v303_v38 = vadd.f32 %v590_v9, %v265_v30  ;;  %v304_v39 = vadd.f32 %v590_v9, %v266_v31  ;;  %v329_v42 = vmax.f32 %v297_v32, 0.0  ;;  %v330_v43 = vmax.f32 %v298_v33, 0.0 }
  0x28   : > { %v331_v44 = vmax.f32 %v299_v34, 0.0  ;;  %v332_v45 = vmax.f32 %v300_v35, 0.0  ;;  %v333_v48 = vmax.f32 %v301_v36, 0.0  ;;  %v334_v49 = vmax.f32 %v302_v37, 0.0 }
  0x29   : > { %v335_v50 = vmax.f32 %v303_v38, 0.0  ;;  %v336_v51 = vmax.f32 %v304_v39, 0.0  ;;  %361 = vst [vmem:[%s608_s25 + $0x80] sm:$0xff] %v329_v42  ;;  %362 = vst [vmem:[%s608_s25 + $0x88] sm:$0xff] %v330_v43  ;;  %v501_v54 = vunpack.c.l.bf16 %v523_v41  ;;  %v502_v55 = vunpack.c.h.bf16 %v523_v41 }
  0x2a   : > { %363 = vst [vmem:[%s608_s25 + $0x90] sm:$0xff] %v331_v44  ;;  %364 = vst [vmem:[%s608_s25 + $0x98] sm:$0xff] %v332_v45  ;;  %v505_v56 = vunpack.c.l.bf16 %v524_v46  ;;  %v506_v57 = vunpack.c.h.bf16 %v524_v46  ;;  %v509_v58 = vunpack.c.l.bf16 %v525_v47  ;;  %v510_v59 = vunpack.c.h.bf16 %v525_v47 }
  0x2b   : > { %365 = vst [vmem:[%s608_s25 + $0xa0] sm:$0xff] %v333_v48  ;;  %366 = vst [vmem:[%s608_s25 + $0xa8] sm:$0xff] %v334_v49  ;;  %v267_v60 = vmul.f32 %v497_v52, %v581_v0  ;;  %v268_v61 = vmul.f32 %v498_v53, %v581_v0  ;;  %v269_v62 = vmul.f32 %v501_v54, %v581_v0 }
  0x2c   : > { %367 = vst [vmem:[%s608_s25 + $0xb0] sm:$0xff] %v335_v50  ;;  %368 = vst [vmem:[%s608_s25 + $0xb8] sm:$0xff] %v336_v51  ;;  %v270_v63 = vmul.f32 %v502_v55, %v581_v0  ;;  %v271_v1 = vmul.f32 %v505_v56, %v581_v0  ;;  %v272_v2 = vmul.f32 %v506_v57, %v581_v0 }
  0x2d   : > { %v273_v3 = vmul.f32 %v509_v58, %v581_v0  ;;  %v274_v4 = vmul.f32 %v510_v59, %v581_v0  ;;  %v305_v5 = vadd.f32 %v590_v9, %v267_v60  ;;  %v306_v6 = vadd.f32 %v590_v9, %v268_v61 }
  0x2e   : > { %v307_v7 = vadd.f32 %v590_v9, %v269_v62  ;;  %v308_v8 = vadd.f32 %v590_v9, %v270_v63  ;;  %v309_v10 = vadd.f32 %v590_v9, %v271_v1  ;;  %v310_v11 = vadd.f32 %v590_v9, %v272_v2 }
  0x2f   : > { %v311_v0 = vadd.f32 %v590_v9, %v273_v3  ;;  %v312_v12 = vadd.f32 %v590_v9, %v274_v4  ;;  %v337_v13 = vmax.f32 %v305_v5, 0.0  ;;  %v338_v14 = vmax.f32 %v306_v6, 0.0 }
  0x30   : > { %v339_v15 = vmax.f32 %v307_v7, 0.0  ;;  %v340_v16 = vmax.f32 %v308_v8, 0.0  ;;  %v341_v17 = vmax.f32 %v309_v10, 0.0  ;;  %v342_v18 = vmax.f32 %v310_v11, 0.0 }
  0x31   : > { %v343_v19 = vmax.f32 %v311_v0, 0.0  ;;  %v344_v20 = vmax.f32 %v312_v12, 0.0  ;;  %369 = vst [vmem:[%s608_s25 + $0xc0] sm:$0xff] %v337_v13  ;;  %370 = vst [vmem:[%s608_s25 + $0xc8] sm:$0xff] %v338_v14 }
  0x32   : > { %371 = vst [vmem:[%s608_s25 + $0xd0] sm:$0xff] %v339_v15  ;;  %372 = vst [vmem:[%s608_s25 + $0xd8] sm:$0xff] %v340_v16 }
  0x33   : > { %373 = vst [vmem:[%s608_s25 + $0xe0] sm:$0xff] %v341_v17  ;;  %374 = vst [vmem:[%s608_s25 + $0xe8] sm:$0xff] %v342_v18 }
  0x34   : > { %375 = vst [vmem:[%s608_s25 + $0xf0] sm:$0xff] %v343_v19  ;;  %376 = vst [vmem:[%s608_s25 + $0xf8] sm:$0xff] %v344_v20 }
  0x35 PF: > { %s13_s12 = sadd.s32 1, %s540_s12  }
  0x36   : > { %p10_p4 = scmp.ge.s32.totalorder %s13_s12, 4  }
  0x38   :  { %12 = sbr.rel (!%p10_p4) target bundleno = 1 (0x1), region = 62 }

// kernel: double_conv.3
= control target key start
LH: loop header
LB: loop body
LE: loop exit
PB: predicated region body
PF: predicated region fallthrough
CT: control target
= control target key end

     0   :  { %s3552_s12 = smov 0   ;;  %s4539_s0 = inlined_call_operand.vmem [shape: bf16[2,16,16,4], index: 0, kind: input, shape index: {}]   ;;  %s4540_s1 = inlined_call_operand.vmem [shape: bf16[36,128], index: 1, kind: input, shape index: {}]   ;;  %s4541_s2 = inlined_call_operand.vmem [shape: bf16[2,16,16,128], index: 2, kind: output, shape index: {0}]   ;;  %s4542_s3 = inlined_call_operand.vmem [shape: f32[2,2,128], index: 3, kind: output, shape index: {1}]  }
   0x1 LB: > { %s2507_s13 = sadd.s32 4294967295, %s3521_s12   ;;  %p2511_p0 = scmp.ge.s32.totalorder %s3521_s12, 1  ;;  %s3521_s12 = sphi %s3552_s12, %s14_s12  }
   0x2   : > { %p140_p1 = scmp.lt.s32.totalorder %s3521_s12, 3 }
   0x4   : > { %p141_p2 = pnand %p2511_p0, %p140_p1 }
   0x6   : > { %144 = sbr.rel (%p141_p2) target bundleno = 654 (0x28e), region = 28 }
   0xd   : > { %vm215_vm0 = vcmask 31744   ;;  %vm218_vm1 = vcmask 25600   ;;  %vm224_vm2 = vcmask 24576   ;;  %p3562_p3 = scmp.lt.s32.totalorder %s2507_s13, 1  ;;  %v3523_v0 = vmov 0.0   ;;  %s3524_s19 = smov 4  }
   0xe   : > { %216 = vst.msk [vmem:[#allocation2] sm:$0xff] %vm215_vm0, %v3523_v0  ;;  %217 = vst.msk [vmem:[#allocation2 + $0x8] sm:$0xff] %vm215_vm0, %v3523_v0  ;;  %s3525_s20 = smov 8   ;;  %s3526_s21 = smov 12   ;;  %vm1987_vm3 = vcmask 1041408   ;;  %vm1671_vm4 = vcmask 64512  }
   0xf   : > { %219 = vst.msk [vmem:[#allocation2 + $0x10] sm:$0x3] %vm218_vm1, %v3523_v0  ;;  %223 = vst.msk [vmem:[#allocation2 + $0x1a8] sm:$0x3] %vm218_vm1, %v3523_v0  ;;  %s4598_s13 = smov (!%p3562_p3, %s2507_s13), 1  ;;  %s3527_s24 = smov 16  }
  0x10   : > { %221 = vst.msk [vmem:[#allocation2 + $0x198] sm:$0xff] %vm215_vm0, %v3523_v0  ;;  %222 = vst.msk [vmem:[#allocation2 + $0x1a0] sm:$0xff] %vm215_vm0, %v3523_v0  ;;  %s2570_s15 = sshll.u32 %s4598_s13, 7  ;;  %s3528_s27 = smov 20   ;;  %vm1704_vm5 = vcmask 97280   ;;  %vm1737_vm6 = vcmask 130048  }
  0x11   : > { %226 = vst.msk [vmem:[#allocation2 + $0x18] sm:$0x1] %vm224_vm2, %v3523_v0  ;;  %227 = vst.msk [vmem:[#allocation2 + $0x30] sm:$0x1] %vm224_vm2, %v3523_v0  ;;  %s3618_s18 = scalar_lea.vmem %s4539_s0, %s2570_s15  ;;  %s3529_s30 = smov 24   ;;  %vm1770_vm7 = vcmask 162816  }
  0x12   : > { %228 = vst.msk [vmem:[#allocation2 + $0x48] sm:$0x1] %vm224_vm2, %v3523_v0  ;;  %229 = vst.msk [vmem:[#allocation2 + $0x60] sm:$0x1] %vm224_vm2, %v3523_v0  ;;  %v2748_v1 = vld [vmem:[%s3618_s18 + $0x8] sm:$0xff]   ;;  %v2605_v2 = vld [vmem:[%s3618_s18] sm:$0xff]   ;;  %s4514_s8 = scalar_lea.vmem %s4541_s2, %s2570_s15 }
  0x13   : > { %230 = vst.msk [vmem:[#allocation2 + $0x78] sm:$0x1] %vm224_vm2, %v3523_v0  ;;  %231 = vst.msk [vmem:[#allocation2 + $0x90] sm:$0x1] %vm224_vm2, %v3523_v0  ;;  %v2749_v3 = vld [vmem:[%s3618_s18 + $0x10] sm:$0xff]   ;;  %v2610_v4 = vunpack.c.l.bf16 %v2748_v1  ;;  %v2611_v5 = vunpack.c.h.bf16 %v2748_v1  ;;  %v2606_v6 = vunpack.c.l.bf16 %v2605_v2  ;;  %v2607_v7 = vunpack.c.h.bf16 %v2605_v2  ;;  %v2750_v8 = vld [vmem:[%s3618_s18 + $0x18] sm:$0xff]  }
  0x14   : > { %232 = vst.msk [vmem:[#allocation2 + $0xa8] sm:$0x1] %vm224_vm2, %v3523_v0  ;;  %233 = vst.msk [vmem:[#allocation2 + $0xc0] sm:$0x1] %vm224_vm2, %v3523_v0  ;;  %v2751_v9 = vld [vmem:[%s3618_s18 + $0x20] sm:$0xff]   ;;  %v2752_v10 = vld [vmem:[%s3618_s18 + $0x28] sm:$0xff]   ;;  %v2614_v13 = vunpack.c.l.bf16 %v2749_v3  ;;  %v2615_v14 = vunpack.c.h.bf16 %v2749_v3  ;;  %v2618_v15 = vunpack.c.l.bf16 %v2750_v8  ;;  %v2619_v16 = vunpack.c.h.bf16 %v2750_v8 }
  0x15   : > { %234 = vst.msk [vmem:[#allocation2 + $0xd8] sm:$0x1] %vm224_vm2, %v3523_v0  ;;  %235 = vst.msk [vmem:[#allocation2 + $0xf0] sm:$0x1] %vm224_vm2, %v3523_v0  ;;  %v358_v11 = vld [vmem:[#allocation2 + $0x1] sm:$0xff]  ;;  %v2753_v17 = vld [vmem:[%s3618_s18 + $0x30] sm:$0xff]   ;;  %v2622_v19 = vunpack.c.l.bf16 %v2751_v9  ;;  %v2623_v20 = vunpack.c.h.bf16 %v2751_v9  ;;  %v2626_v21 = vunpack.c.l.bf16 %v2752_v10  ;;  %v2627_v25 = vunpack.c.h.bf16 %v2752_v10 }
  0x16   : > { %236 = vst.msk [vmem:[#allocation2 + $0x108] sm:$0x1] %vm224_vm2, %v3523_v0  ;;  %237 = vst.msk [vmem:[#allocation2 + $0x120] sm:$0x1] %vm224_vm2, %v3523_v0  ;;  %v359_v12 = vld [vmem:[#allocation2 + $0x9] sm:$0xff]  ;;  %v2754_v22 = vld [vmem:[%s3618_s18 + $0x38] sm:$0xff]   ;;  %v2630_v26 = vunpack.c.l.bf16 %v2753_v17  ;;  %v2631_v27 = vunpack.c.h.bf16 %v2753_v17 }
  0x17   : > { %238 = vst.msk [vmem:[#allocation2 + $0x138] sm:$0x1] %vm224_vm2, %v3523_v0  ;;  %239 = vst.msk [vmem:[#allocation2 + $0x150] sm:$0x1] %vm224_vm2, %v3523_v0  ;;  %v2860_v18 = vpack.i.bf16 %v359_v12, %v358_v11  ;;  %v2755_v23 = vld [vmem:[%s3618_s18 + $0x40] sm:$0xff]   ;;  %v2756_v24 = vld [vmem:[%s3618_s18 + $0x48] sm:$0xff]   ;;  %v2634_v28 = vunpack.c.l.bf16 %v2754_v22  ;;  %v2635_v32 = vunpack.c.h.bf16 %v2754_v22 }
  0x18   : > { %240 = vst.msk [vmem:[#allocation2 + $0x168] sm:$0x1] %vm224_vm2, %v3523_v0  ;;  %241 = vst.msk [vmem:[#allocation2 + $0x180] sm:$0x1] %vm224_vm2, %v3523_v0  ;;  %v2757_v29 = vld [vmem:[%s3618_s18 + $0x50] sm:$0xff]   ;;  %v2758_v30 = vld [vmem:[%s3618_s18 + $0x58] sm:$0xff]   ;;  %v2638_v33 = vunpack.c.l.bf16 %v2755_v23  ;;  %v2639_v34 = vunpack.c.h.bf16 %v2755_v23  ;;  %v2642_v35 = vunpack.c.l.bf16 %v2756_v24  ;;  %v2643_v38 = vunpack.c.h.bf16 %v2756_v24 }
  0x19   : > { %244 = vst.msk [vmem:[#allocation2 + $0x29] sm:$0x1] %vm224_vm2, %v3523_v0  ;;  %245 = vst.msk [vmem:[#allocation2 + $0x41] sm:$0x1] %vm224_vm2, %v3523_v0  ;;  %v2759_v31 = vld [vmem:[%s3618_s18 + $0x60] sm:$0xff]   ;;  %2861 = vrot.lane.b32.xlu0 %v2860_v18, %s3524_s19  ;;  %v2760_v36 = vld [vmem:[%s3618_s18 + $0x68] sm:$0xff]   ;;  %v2646_v39 = vunpack.c.l.bf16 %v2757_v29  ;;  %v2647_v40 = vunpack.c.h.bf16 %v2757_v29  ;;  %v2650_v41 = vunpack.c.l.bf16 %v2758_v30  ;;  %v2651_v42 = vunpack.c.h.bf16 %v2758_v30 }
  0x1a   : > { %246 = vst.msk [vmem:[#allocation2 + $0x59] sm:$0x1] %vm224_vm2, %v3523_v0  ;;  %247 = vst.msk [vmem:[#allocation2 + $0x71] sm:$0x1] %vm224_vm2, %v3523_v0  ;;  %v2761_v37 = vld [vmem:[%s3618_s18 + $0x70] sm:$0xff]   ;;  %v2654_v43 = vunpack.c.l.bf16 %v2759_v31  ;;  %v2655_v44 = vunpack.c.h.bf16 %v2759_v31  ;;  %v2658_v45 = vunpack.c.l.bf16 %v2760_v36  ;;  %v2659_v46 = vunpack.c.h.bf16 %v2760_v36  ;;  %v390_v29 = vld [vmem:[#allocation2 + $0x2] sm:$0xff] }
  0x1b   : > { %248 = vst.msk [vmem:[#allocation2 + $0x89] sm:$0x1] %vm224_vm2, %v3523_v0  ;;  %249 = vst.msk [vmem:[#allocation2 + $0xa1] sm:$0x1] %vm224_vm2, %v3523_v0  ;;  %v2662_v47 = vunpack.c.l.bf16 %v2761_v37  ;;  %v2663_v48 = vunpack.c.h.bf16 %v2761_v37  ;;  %s3530_s4 = smov 28   ;;  %s3531_s5 = smov 32  }
  0x1c   : > { %250 = vst.msk [vmem:[#allocation2 + $0xb9] sm:$0x1] %vm224_vm2, %v3523_v0  ;;  %251 = vst.msk [vmem:[#allocation2 + $0xd1] sm:$0x1] %vm224_vm2, %v3523_v0  ;;  %vm1803_vm8 = vcmask 195584   ;;  %vm1836_vm9 = vcmask 228352  }
  0x1d   : > { %252 = vst.msk [vmem:[#allocation2 + $0xe9] sm:$0x1] %vm224_vm2, %v3523_v0  ;;  %253 = vst.msk [vmem:[#allocation2 + $0x101] sm:$0x1] %vm224_vm2, %v3523_v0  ;;  %vm1869_vm10 = vcmask 261120   ;;  %vm1938_vm11 = vcmask 293888  }
  0x1e   : > { %254 = vst.msk [vmem:[#allocation2 + $0x119] sm:$0x1] %vm224_vm2, %v3523_v0  ;;  %255 = vst.msk [vmem:[#allocation2 + $0x131] sm:$0x1] %vm224_vm2, %v3523_v0  ;;  %s2516_s9 = sshll.u32 %s4598_s13, 1  ;;  %vm2418_vm12 = vcmask 1040384  }
  0x1f   : > { %256 = vst.msk [vmem:[#allocation2 + $0x149] sm:$0x1] %vm224_vm2, %v3523_v0  ;;  %257 = vst.msk [vmem:[#allocation2 + $0x161] sm:$0x1] %vm224_vm2, %v3523_v0  ;;  %s181_s14 = scalar_lea.vmem %s4542_s3, %s2516_s9 }
  0x20   : > { %258 = vst.msk [vmem:[#allocation2 + $0x179] sm:$0x1] %vm224_vm2, %v3523_v0  ;;  %259 = vst.msk [vmem:[#allocation2 + $0x191] sm:$0x1] %vm224_vm2, %v3523_v0 }
  0x21   : > { %243 = vst.msk [vmem:[#allocation2 + $0x11] sm:$0x1] %vm224_vm2, %v3523_v0  ;;  %260 = vst.msk [vmem:[#allocation2 + $0x1a9] sm:$0x1] %vm224_vm2, %v3523_v0 }
  0x22   : > { %225 = vst.msk [vmem:[#allocation2] sm:$0x1] %vm224_vm2, %v3523_v0  ;;  %242 = vst.msk [vmem:[#allocation2 + $0x198] sm:$0x1] %vm224_vm2, %v3523_v0 }
  0x23   : > { %296 = vst.msk [vmem:[#allocation2 + $0x31] sm:$0xff] %vm215_vm0, %v2610_v4  ;;  %297 = vst.msk [vmem:[#allocation2 + $0x39] sm:$0xff] %vm215_vm0, %v2611_v5 }
  0x24   : > { %294 = vst.msk [vmem:[#allocation2 + $0x19] sm:$0xff] %vm215_vm0, %v2606_v6  ;;  %295 = vst.msk [vmem:[#allocation2 + $0x21] sm:$0xff] %vm215_vm0, %v2607_v7 }
  0x25   : > { %298 = vst.msk [vmem:[#allocation2 + $0x49] sm:$0xff] %vm215_vm0, %v2614_v13  ;;  %299 = vst.msk [vmem:[#allocation2 + $0x51] sm:$0xff] %vm215_vm0, %v2615_v14 }
  0x26   : > { %300 = vst.msk [vmem:[#allocation2 + $0x61] sm:$0xff] %vm215_vm0, %v2618_v15  ;;  %301 = vst.msk [vmem:[#allocation2 + $0x69] sm:$0xff] %vm215_vm0, %v2619_v16 }
  0x27   : > { %302 = vst.msk [vmem:[#allocation2 + $0x79] sm:$0xff] %vm215_vm0, %v2622_v19  ;;  %303 = vst.msk [vmem:[#allocation2 + $0x81] sm:$0xff] %vm215_vm0, %v2623_v20 }
  0x28   : > { %304 = vst.msk [vmem:[#allocation2 + $0x91] sm:$0xff] %vm215_vm0, %v2626_v21  ;;  %305 = vst.msk [vmem:[#allocation2 + $0x99] sm:$0xff] %vm215_vm0, %v2627_v25  ;;  %v391_v30 = vld [vmem:[#allocation2 + $0xa] sm:$0xff] }
  0x29   : > { %306 = vst.msk [vmem:[#allocation2 + $0xa9] sm:$0xff] %vm215_vm0, %v2630_v26  ;;  %307 = vst.msk [vmem:[#allocation2 + $0xb1] sm:$0xff] %vm215_vm0, %v2631_v27 }
  0x2a   : > { %308 = vst.msk [vmem:[#allocation2 + $0xc1] sm:$0xff] %vm215_vm0, %v2634_v28  ;;  %309 = vst.msk [vmem:[#allocation2 + $0xc9] sm:$0xff] %vm215_vm0, %v2635_v32  ;;  %v362_v49 = vld [vmem:[#allocation2 + $0x31] sm:$0xff]  ;;  %v363_v50 = vld [vmem:[#allocation2 + $0x39] sm:$0xff]  ;;  %v2940_v32 = vpack.i.bf16 %v391_v30, %v390_v29 }
  0x2b   : > { %310 = vst.msk [vmem:[#allocation2 + $0xd9] sm:$0xff] %vm215_vm0, %v2638_v33  ;;  %311 = vst.msk [vmem:[#allocation2 + $0xe1] sm:$0xff] %vm215_vm0, %v2639_v34  ;;  %v360_v51 = vld [vmem:[#allocation2 + $0x19] sm:$0xff]  ;;  %v3666_v52 = vpack.i.bf16 %v363_v50, %v362_v49  ;;  %v361_v53 = vld [vmem:[#allocation2 + $0x21] sm:$0xff] }
  0x2c   : > { %312 = vst.msk [vmem:[#allocation2 + $0xf1] sm:$0xff] %vm215_vm0, %v2642_v35  ;;  %313 = vst.msk [vmem:[#allocation2 + $0xf9] sm:$0xff] %vm215_vm0, %v2643_v38  ;;  %v364_v54 = vld [vmem:[#allocation2 + $0x49] sm:$0xff]  ;;  %v365_v55 = vld [vmem:[#allocation2 + $0x51] sm:$0xff]  ;;  %v3668_v56 = vpack.i.bf16 %v361_v53, %v360_v51 }
  0x2d   : > { %314 = vst.msk [vmem:[#allocation2 + $0x109] sm:$0xff] %vm215_vm0, %v2646_v39  ;;  %315 = vst.msk [vmem:[#allocation2 + $0x111] sm:$0xff] %vm215_vm0, %v2647_v40  ;;  %v366_v57 = vld [vmem:[#allocation2 + $0x61] sm:$0xff]  ;;  %v367_v58 = vld [vmem:[#allocation2 + $0x69] sm:$0xff]  ;;  %2871 = vrot.lane.b32.xlu1 %v3666_v52, %s3524_s19  ;;  %v3672_v59 = vpack.i.bf16 %v365_v55, %v364_v54 }
  0x2e   : > { %316 = vst.msk [vmem:[#allocation2 + $0x121] sm:$0xff] %vm215_vm0, %v2650_v41  ;;  %317 = vst.msk [vmem:[#allocation2 + $0x129] sm:$0xff] %vm215_vm0, %v2651_v42  ;;  %2866 = vrot.lane.b32.xlu0 %v3668_v56, %s3524_s19  ;;  %v3676_v60 = vpack.i.bf16 %v367_v58, %v366_v57  ;;  %v368_v61 = vld [vmem:[#allocation2 + $0x79] sm:$0xff]  ;;  %v369_v62 = vld [vmem:[#allocation2 + $0x81] sm:$0xff] }
  0x2f   : > { %318 = vst.msk [vmem:[#allocation2 + $0x139] sm:$0xff] %vm215_vm0, %v2654_v43  ;;  %319 = vst.msk [vmem:[#allocation2 + $0x141] sm:$0xff] %vm215_vm0, %v2655_v44  ;;  %v370_v63 = vld [vmem:[#allocation2 + $0x91] sm:$0xff]  ;;  %v371_v0 = vld [vmem:[#allocation2 + $0x99] sm:$0xff]  ;;  %v3680_v1 = vpack.i.bf16 %v369_v62, %v368_v61 }
  0x30   : > { %320 = vst.msk [vmem:[#allocation2 + $0x151] sm:$0xff] %vm215_vm0, %v2658_v45  ;;  %321 = vst.msk [vmem:[#allocation2 + $0x159] sm:$0xff] %vm215_vm0, %v2659_v46  ;;  %v3684_v2 = vpack.i.bf16 %v371_v0, %v370_v63  ;;  %v372_v3 = vld [vmem:[#allocation2 + $0xa9] sm:$0xff]  ;;  %v373_v4 = vld [vmem:[#allocation2 + $0xb1] sm:$0xff] }
  0x31   : > { %322 = vst.msk [vmem:[#allocation2 + $0x169] sm:$0xff] %vm215_vm0, %v2662_v47  ;;  %323 = vst.msk [vmem:[#allocation2 + $0x171] sm:$0xff] %vm215_vm0, %v2663_v48  ;;  %2876 = vrot.lane.b32.xlu1 %v3672_v59, %s3524_s19  ;;  %v374_v5 = vld [vmem:[#allocation2 + $0xc1] sm:$0xff]  ;;  %v375_v6 = vld [vmem:[#allocation2 + $0xc9] sm:$0xff]  ;;  %v3688_v7 = vpack.i.bf16 %v373_v4, %v372_v3 }
  0x32   : > { %2881 = vrot.lane.b32.xlu0 %v3676_v60, %s3524_s19  ;;  %v3692_v8 = vpack.i.bf16 %v375_v6, %v374_v5  ;;  %v376_v9 = vld [vmem:[#allocation2 + $0xd9] sm:$0xff]  ;;  %v377_v10 = vld [vmem:[#allocation2 + $0xe1] sm:$0xff]  ;;  %v396_v39 = vld [vmem:[#allocation2 + $0x4a] sm:$0xff] }
  0x33   : > { %v378_v11 = vld [vmem:[#allocation2 + $0xf1] sm:$0xff]  ;;  %v379_v12 = vld [vmem:[#allocation2 + $0xf9] sm:$0xff]  ;;  %v3696_v13 = vpack.i.bf16 %v377_v10, %v376_v9  ;;  %v393_v34 = vld [vmem:[#allocation2 + $0x22] sm:$0xff] }
  0x34   : > { %v3700_v14 = vpack.i.bf16 %v379_v12, %v378_v11  ;;  %v380_v15 = vld [vmem:[#allocation2 + $0x109] sm:$0xff]  ;;  %v381_v16 = vld [vmem:[#allocation2 + $0x111] sm:$0xff]  ;;  %v392_v33 = vld [vmem:[#allocation2 + $0x1a] sm:$0xff] }
  0x35   : > { %2886 = vrot.lane.b32.xlu1 %v3680_v1, %s3524_s19  ;;  %v382_v17 = vld [vmem:[#allocation2 + $0x121] sm:$0xff]  ;;  %v383_v18 = vld [vmem:[#allocation2 + $0x129] sm:$0xff]  ;;  %v2915_v19 = vpack.i.bf16 %v381_v16, %v380_v15  ;;  %v394_v35 = vld [vmem:[#allocation2 + $0x32] sm:$0xff]  ;;  %v3711_v37 = vpack.i.bf16 %v393_v34, %v392_v33 }
  0x36   : > { %2891 = vrot.lane.b32.xlu0 %v3684_v2, %s3524_s19  ;;  %v2920_v20 = vpack.i.bf16 %v383_v18, %v382_v17  ;;  %v384_v21 = vld [vmem:[#allocation2 + $0x139] sm:$0xff]  ;;  %v385_v22 = vld [vmem:[#allocation2 + $0x141] sm:$0xff]  ;;  %v399_v42 = vld [vmem:[#allocation2 + $0x6a] sm:$0xff] }
  0x37   : > { %v386_v23 = vld [vmem:[#allocation2 + $0x151] sm:$0xff]  ;;  %v387_v24 = vld [vmem:[#allocation2 + $0x159] sm:$0xff]  ;;  %v2925_v25 = vpack.i.bf16 %v385_v22, %v384_v21  ;;  %v398_v41 = vld [vmem:[#allocation2 + $0x62] sm:$0xff] }
  0x38   : > { %v2930_v26 = vpack.i.bf16 %v387_v24, %v386_v23  ;;  %v388_v27 = vld [vmem:[#allocation2 + $0x169] sm:$0xff]  ;;  %v389_v28 = vld [vmem:[#allocation2 + $0x171] sm:$0xff]  ;;  %v395_v36 = vld [vmem:[#allocation2 + $0x3a] sm:$0xff]  ;;  %v3722_v44 = vpack.i.bf16 %v399_v42, %v398_v41 }
  0x39   : > { %2896 = vrot.lane.b32.xlu1 %v3688_v7, %s3524_s19  ;;  %v2935_v31 = vpack.i.bf16 %v389_v28, %v388_v27  ;;  %v3714_v38 = vpack.i.bf16 %v395_v36, %v394_v35  ;;  %v397_v40 = vld [vmem:[#allocation2 + $0x52] sm:$0xff]  ;;  %v400_v45 = vld [vmem:[#allocation2 + $0x7a] sm:$0xff]  ;;  %v401_v46 = vld [vmem:[#allocation2 + $0x82] sm:$0xff] }
  0x3a   : > { %2901 = vrot.lane.b32.xlu0 %v3692_v8, %s3524_s19  ;;  %v3718_v43 = vpack.i.bf16 %v397_v40, %v396_v39  ;;  %v402_v47 = vld [vmem:[#allocation2 + $0x92] sm:$0xff]  ;;  %v403_v48 = vld [vmem:[#allocation2 + $0x9a] sm:$0xff]  ;;  %v3726_v49 = vpack.i.bf16 %v401_v46, %v400_v45  ;;  %v404_v51 = vld [vmem:[#allocation2 + $0xaa] sm:$0xff] }
  0x3b   : > { %v3730_v50 = vpack.i.bf16 %v403_v48, %v402_v47  ;;  %v405_v53 = vld [vmem:[#allocation2 + $0xb2] sm:$0xff]  ;;  %v406_v54 = vld [vmem:[#allocation2 + $0xc2] sm:$0xff]  ;;  %v407_v55 = vld [vmem:[#allocation2 + $0xca] sm:$0xff] }
  0x3c   : > { %v3734_v57 = vpack.i.bf16 %v405_v53, %v404_v51  ;;  %v3738_v58 = vpack.i.bf16 %v407_v55, %v406_v54  ;;  %v408_v61 = vld [vmem:[#allocation2 + $0xda] sm:$0xff]  ;;  %v409_v62 = vld [vmem:[#allocation2 + $0xe2] sm:$0xff]  ;;  %v410_v63 = vld [vmem:[#allocation2 + $0xf2] sm:$0xff] }
  0x3d   : > { %2906 = vrot.lane.b32.xlu1 %v3696_v13, %s3524_s19  ;;  %v411_v0 = vld [vmem:[#allocation2 + $0xfa] sm:$0xff]  ;;  %v3742_v3 = vpack.i.bf16 %v409_v62, %v408_v61  ;;  %v412_v5 = vld [vmem:[#allocation2 + $0x10a] sm:$0xff]  ;;  %v413_v6 = vld [vmem:[#allocation2 + $0x112] sm:$0xff] }
  0x3e   : > { %2911 = vrot.lane.b32.xlu0 %v3700_v14, %s3524_s19  ;;  %v3746_v4 = vpack.i.bf16 %v411_v0, %v410_v63  ;;  %v414_v9 = vld [vmem:[#allocation2 + $0x122] sm:$0xff]  ;;  %v415_v10 = vld [vmem:[#allocation2 + $0x12a] sm:$0xff]  ;;  %v3750_v11 = vpack.i.bf16 %v413_v6, %v412_v5  ;;  %v416_v15 = vld [vmem:[#allocation2 + $0x13a] sm:$0xff] }
  0x3f   : > { %v3000_v12 = vpack.i.bf16 %v415_v10, %v414_v9  ;;  %v417_v16 = vld [vmem:[#allocation2 + $0x142] sm:$0xff]  ;;  %v418_v17 = vld [vmem:[#allocation2 + $0x152] sm:$0xff]  ;;  %v419_v18 = vld [vmem:[#allocation2 + $0x15a] sm:$0xff] }
  0x40   : > { %v420_v21 = vld [vmem:[#allocation2 + $0x16a] sm:$0xff]  ;;  %v421_v22 = vld [vmem:[#allocation2 + $0x172] sm:$0xff]  ;;  %v3759_v24 = vld [vmem:[#allocation2 + $0x20] sm:$0xff] }
  0x41   : > { %2916 = vrot.lane.b32.xlu1 %v2915_v19, %s3524_s19  ;;  %v3005_v19 = vpack.i.bf16 %v417_v16, %v416_v15  ;;  %v3757_v23 = vld [vmem:[#allocation2 + $0x18] sm:$0xff]  ;;  %v3765_v27 = vld [vmem:[#allocation2 + $0x30] sm:$0xff]  ;;  %v3769_v29 = vld [vmem:[#allocation2 + $0x48] sm:$0xff] }
  0x42   : > { %2921 = vrot.lane.b32.xlu0 %v2920_v20, %s3524_s19  ;;  %v3010_v20 = vpack.i.bf16 %v419_v18, %v418_v17  ;;  %v3767_v28 = vld [vmem:[#allocation2 + $0x38] sm:$0xff]  ;;  %v3771_v30 = vld [vmem:[#allocation2 + $0x50] sm:$0xff]  ;;  %v3779_v33 = vld [vmem:[#allocation2 + $0x60] sm:$0xff] }
  0x43   : > { %v3781_v34 = vld [vmem:[#allocation2 + $0x68] sm:$0xff]  ;;  %v3783_v35 = vld [vmem:[#allocation2 + $0x78] sm:$0xff]  ;;  %v3785_v36 = vld [vmem:[#allocation2 + $0x80] sm:$0xff] }
  0x44   : > { %v3035_v39 = vpack.i.bf16 %v3781_v34, %v3779_v33  ;;  %v3040_v40 = vpack.i.bf16 %v3785_v36, %v3783_v35  ;;  %v432_v41 = vld [vmem:[#allocation2 + $0x90] sm:$0xff]  ;;  %v3793_v42 = vld [vmem:[#allocation2 + $0x98] sm:$0xff]  ;;  %v434_v45 = vld [vmem:[#allocation2 + $0xa8] sm:$0xff] }
  0x45   : > { %2926 = vrot.lane.b32.xlu1 %v2925_v25, %s3524_s19  ;;  %v3015_v25 = vpack.i.bf16 %v421_v22, %v420_v21  ;;  %v3795_v46 = vld [vmem:[#allocation2 + $0xb0] sm:$0xff]  ;;  %v3045_v47 = vpack.i.bf16 %v3793_v42, %v432_v41  ;;  %v3500_v51 = vld [vmem:[%s4540_s1] sm:$0xff]   ;;  %v3501_v53 = vld [vmem:[%s4540_s1 + $0x8] sm:$0xff]  }
  0x46   : > { %2931 = vrot.lane.b32.xlu0 %v2930_v26, %s3524_s19  ;;  %v3020_v26 = vpack.i.bf16 %v3759_v24, %v3757_v23  ;;  %4559 = vst [vmem:[#allocation3_spill] sm:$0xff] %v3795_v46  ;;  %v3050_v48 = vpack.i.bf16 %v3795_v46, %v434_v45  ;;  %2797 = vmatprep.subr.bf16.mxu0 %v3500_v51  ;;  %v3502_v54 = vld [vmem:[%s4540_s1 + $0x10] ss:$0 sps:$4 sm:$0x33]   ;;  %v342_v0 = vld [vmem:[#allocation2 + $0xc0] sm:$0xff]  ;;  %v343_v5 = vld [vmem:[#allocation2 + $0xc8] sm:$0xff] }
  0x47   : > { %2835 = vmatprep.subr.bf16.mxu1 %v3500_v51  ;;  %2798 = vmatpush3.bf16.msra.mxu0 %v3500_v51  ;;  %v3205_v9 = vpack.i.bf16 %v343_v5, %v342_v0  ;;  %v3906_v16 = vld [vmem:[#allocation2 + $0xd8] sm:$0xff]  ;;  %v3908_v17 = vld [vmem:[#allocation2 + $0xe0] sm:$0xff] }
  0x48   : > { %2838 = vmatpush3.bf16.msra.mxu1 %v3500_v51  ;;  %2799 = vmatprep.subr.bf16.mxu0 %v3501_v53  ;;  %4566 = vst [vmem:[#allocation10_spill] sm:$0xff] %v3906_v16  ;;  %4567 = vst [vmem:[#allocation11_spill] sm:$0xff] %v3908_v17  ;;  %v567_v45 = vld [vmem:[#allocation2 + $0xf1] sm:$0xff] }
  0x49   : > { %2936 = vrot.lane.b32.xlu1 %v2935_v31, %s3524_s19  ;;  %v3025_v31 = vpack.i.bf16 %v3767_v28, %v3765_v27  ;;  %2836 = vmatprep.subr.bf16.mxu1 %v3501_v53  ;;  %v349_v51 = vld [vmem:[#allocation2 + $0x110] sm:$0xff] }
  0x4a   : > { %2941 = vrot.lane.b32.xlu0 %v2940_v32, %s3525_s20  ;;  %v3030_v32 = vpack.i.bf16 %v3771_v30, %v3769_v29 }
  0x4b   : > { %2800 = vmatpush3.bf16.msra.mxu0 %v3501_v53 }
  0x4c   : > { %2839 = vmatpush3.bf16.msra.mxu1 %v3501_v53  ;;  %2841 = vmatprep.subr.msk.bf16.mxu0 %vm1987_vm3, %v3502_v54 }
  0x4d   : > { %2946 = vrot.lane.b32.xlu1 %v3711_v37, %s3525_s20  ;;  %2842 = vmatprep.subr.msk.bf16.mxu1 %vm1987_vm3, %v3502_v54 }
  0x4e   : > { %2951 = vrot.lane.b32.xlu0 %v3714_v38, %s3525_s20 }
  0x51   : > { %2956 = vrot.lane.b32.xlu1 %v3718_v43, %s3525_s20 }
  0x52   : > { %2961 = vrot.lane.b32.xlu0 %v3722_v44, %s3525_s20 }
  0x55   : > { %2966 = vrot.lane.b32.xlu1 %v3726_v49, %s3525_s20 }
  0x56   : > { %2971 = vrot.lane.b32.xlu0 %v3730_v50, %s3525_s20 }
  0x59   : > { %2976 = vrot.lane.b32.xlu1 %v3734_v57, %s3525_s20 }
  0x5a   : > { %2981 = vrot.lane.b32.xlu0 %v3738_v58, %s3525_s20 }
  0x5d   : > { %2986 = vrot.lane.b32.xlu1 %v3742_v3, %s3525_s20 }
  0x5e   : > { %2991 = vrot.lane.b32.xlu0 %v3746_v4, %s3525_s20 }
  0x61   : > { %2996 = vrot.lane.b32.xlu1 %v3750_v11, %s3525_s20 }
  0x62   : > { %3001 = vrot.lane.b32.xlu0 %v3000_v12, %s3525_s20 }
  0x65   : > { %3006 = vrot.lane.b32.xlu1 %v3005_v19, %s3525_s20 }
  0x66   : > { %3011 = vrot.lane.b32.xlu0 %v3010_v20, %s3525_s20 }
  0x69   : > { %3016 = vrot.lane.b32.xlu1 %v3015_v25, %s3525_s20  ;;  %v346_v25 = vld [vmem:[#allocation2 + $0xf0] sm:$0xff] }
  0x6a   : > { %3021 = vrot.lane.b32.xlu0 %v3020_v26, %s3526_s21  ;;  %v347_v26 = vld [vmem:[#allocation2 + $0xf8] sm:$0xff] }
  0x6d   : > { %3026 = vrot.lane.b32.xlu1 %v3025_v31, %s3526_s21 }
  0x6e   : > { %3031 = vrot.lane.b32.xlu0 %v3030_v32, %s3526_s21 }
  0x71   : > { %3036 = vrot.lane.b32.xlu1 %v3035_v39, %s3526_s21 }
  0x72   : > { %3041 = vrot.lane.b32.xlu0 %v3040_v40, %s3526_s21 }
  0x75   : > { %3046 = vrot.lane.b32.xlu1 %v3045_v47, %s3526_s21 }
  0x76   : > { %3051 = vrot.lane.b32.xlu0 %v3050_v48, %s3526_s21 }
  0x79   : > { %3056 = vrot.lane.b32.xlu1 %v3668_v56, %s3527_s24  ;;  %v1989_v56 = vsel %vm1987_vm3, %v3502_v54, 0  ;;  %v569_v54 = vld [vmem:[#allocation2 + $0x109] sm:$0xff] }
  0x7a   : > { %3061 = vrot.lane.b32.xlu0 %v3666_v52, %s3527_s24  ;;  %2802 = vmatpush3.bf16.msra.mxu0 %v1989_v56 }
  0x7b   : > { %2840 = vmatpush3.bf16.msra.mxu1 %v1989_v56  ;;  %v570_v56 = vld [vmem:[#allocation2 + $0x111] sm:$0xff] }
  0x7d   : > { %3066 = vrot.lane.b32.xlu1 %v3711_v37, %s3528_s27  ;;  %v2762_v37 = vld [vmem:[%s3618_s18 + $0x78] sm:$0xff]  }
  0x7e   : > { %3071 = vrot.lane.b32.xlu0 %v3714_v38, %s3528_s27  ;;  %v2666_v55 = vunpack.c.l.bf16 %v2762_v37  ;;  %v2667_v61 = vunpack.c.h.bf16 %v2762_v37 }
  0x80   : > { %324 = vst.msk [vmem:[#allocation2 + $0x181] sm:$0xff] %vm215_vm0, %v2666_v55  ;;  %325 = vst.msk [vmem:[#allocation2 + $0x189] sm:$0xff] %vm215_vm0, %v2667_v61  ;;  %v3963_v61 = vld [vmem:[#allocation2 + $0x158] sm:$0xff] }
  0x81   : > { %3076 = vrot.lane.b32.xlu1 %v3025_v31, %s3529_s30 }
  0x82   : > { %3081 = vrot.lane.b32.xlu0 %v3030_v32, %s3529_s30 }
  0x85   : > { %3086 = vrot.lane.b32.xlu1 %v3666_v52, %s3530_s4 }
  0x86   : > { %3091 = vrot.lane.b32.xlu0 %v3672_v59, %s3530_s4 }
  0x89   : > { %3096 = vrot.lane.b32.xlu1 %v3714_v38, %s3531_s5 }
  0x8a   : > { %3101 = vrot.lane.b32.xlu0 %v3718_v43, %s3531_s5 }
  0x8b   : > { %v3847_v52 = vpop.permute.xlu0 %2861 }
  0x8d   : > { %3106 = vrot.lane.b32.xlu1 %v3672_v59, %s3527_s24 }
  0x8e   : > { %3111 = vrot.lane.b32.xlu0 %v3676_v60, %s3527_s24 }
  0x91   : > { %3116 = vrot.lane.b32.xlu1 %v3718_v43, %s3528_s27 }
  0x92   : > { %3121 = vrot.lane.b32.xlu0 %v3722_v44, %s3528_s27 }
  0x95   : > { %3126 = vrot.lane.b32.xlu1 %v3035_v39, %s3529_s30 }
  0x96   : > { %3131 = vrot.lane.b32.xlu0 %v3040_v40, %s3529_s30 }
  0x99   : > { %3136 = vrot.lane.b32.xlu1 %v3676_v60, %s3530_s4 }
  0x9a   : > { %3141 = vrot.lane.b32.xlu0 %v3680_v1, %s3530_s4 }
  0x9d   : > { %3146 = vrot.lane.b32.xlu1 %v3722_v44, %s3531_s5 }
  0x9e   : > { %3151 = vrot.lane.b32.xlu0 %v3726_v49, %s3531_s5 }
  0x9f   : > { %v3853_v59 = vpop.permute.xlu1 %2871 }
  0xa0   : > { %v3855_v38 = vpop.permute.xlu0 %2866 }
  0xa1   : > { %3156 = vrot.lane.b32.xlu1 %v3680_v1, %s3527_s24 }
  0xa2   : > { %3161 = vrot.lane.b32.xlu0 %v3684_v2, %s3527_s24 }
  0xa3   : > { %v3861_v60 = vpop.permute.xlu1 %2876 }
  0xa4   : > { %v3863_v43 = vpop.permute.xlu0 %2881 }
  0xa5   : > { %3166 = vrot.lane.b32.xlu1 %v3726_v49, %s3528_s27 }
  0xa6   : > { %3171 = vrot.lane.b32.xlu0 %v3730_v50, %s3528_s27 }
  0xa7   : > { %v3869_v44 = vpop.permute.xlu1 %2886 }
  0xa8   : > { %v3871_v62 = vpop.permute.xlu0 %2891 }
  0xa9   : > { %3176 = vrot.lane.b32.xlu1 %v3045_v47, %s3529_s30  ;;  %v568_v47 = vld [vmem:[#allocation2 + $0xf9] sm:$0xff] }
  0xaa   : > { %3181 = vrot.lane.b32.xlu0 %v3050_v48, %s3529_s30  ;;  %v348_v48 = vld [vmem:[#allocation2 + $0x108] sm:$0xff] }
  0xab   : > { %v3875_v1 = vpop.permute.xlu1 %2896 }
  0xac   : > { %v3877_v63 = vpop.permute.xlu0 %2901 }
  0xad   : > { %4560 = vst [vmem:[#allocation4_spill] sm:$0xff] %v3877_v63  ;;  %3186 = vrot.lane.b32.xlu1 %v3684_v2, %s3530_s4 }
  0xae   : > { %3191 = vrot.lane.b32.xlu0 %v3688_v7, %s3530_s4 }
  0xaf   : > { %v3883_v49 = vpop.permute.xlu1 %2906 }
  0xb0   : > { %4561 = vst [vmem:[#allocation5_spill] sm:$0xff] %v3883_v49  ;;  %v3885_v6 = vpop.permute.xlu0 %2911 }
  0xb1   : > { %4562 = vst [vmem:[#allocation6_spill] sm:$0xff] %v3885_v6  ;;  %3196 = vrot.lane.b32.xlu1 %v3730_v50, %s3531_s5  ;;  %v2869_v6 = vunpack.i.h.bf16 %v3855_v38 }
  0xb2   : > { %3201 = vrot.lane.b32.xlu0 %v3734_v57, %s3531_s5 }
  0xb3   : > { %v3891_v10 = vpop.permute.xlu1 %2916 }
  0xb4   : > { %4563 = vst [vmem:[#allocation7_spill] sm:$0xff] %v3891_v10  ;;  %v3893_v12 = vpop.permute.xlu0 %2921  ;;  %v326_v10 = vld [vmem:[#allocation2] sm:$0xff] }
  0xb5   : > { %4564 = vst [vmem:[#allocation8_spill] sm:$0xff] %v3893_v12  ;;  %3206 = vrot.lane.b32.xlu1 %v3205_v9, %s3526_s21  ;;  %v606_v12 = vld [vmem:[#allocation2 + $0x142] sm:$0xff] }
  0xb6   : > { %3211 = vrot.lane.b32.xlu0 %v3688_v7, %s3527_s24  ;;  %v3235_v7 = vpack.i.bf16 %v3908_v17, %v3906_v16 }
  0xb7   : > { %v3898_v2 = vpop.permute.xlu1 %2926 }
  0xb8   : > { %4565 = vst [vmem:[#allocation9_spill] sm:$0xff] %v3898_v2  ;;  %v2932_v15 = vpop.permute.xlu0 %2931  ;;  %v605_v2 = vld [vmem:[#allocation2 + $0x13a] sm:$0xff] }
  0xb9   : > { %3216 = vrot.lane.b32.xlu1 %v3692_v8, %s3527_s24  ;;  %v2934_v37 = vunpack.i.h.bf16 %v2932_v15  ;;  %v2933_v55 = vunpack.i.l.bf16 %v2932_v15  ;;  %v4041_v49 = vpack.i.bf16 %v606_v12, %v605_v2 }
  0xba   : > { %3221 = vrot.lane.b32.xlu0 %v3734_v57, %s3528_s27 }
  0xbb   : > { %v3904_v50 = vpop.permute.xlu1 %2936  ;;  %v1668_v15 = vsel %vm215_vm0, %v3963_v61, %v2934_v37 }
  0xbc   : > { %v3910_v18 = vpop.permute.xlu0 %2941 }
  0xbd   : > { %3226 = vrot.lane.b32.xlu1 %v3738_v58, %s3528_s27  ;;  %v2943_v16 = vunpack.i.l.bf16 %v3910_v18 }
  0xbe   : > { %3231 = vrot.lane.b32.xlu0 %v3205_v9, %s3529_s30  ;;  %v3305_v9 = vpack.i.bf16 %v570_v56, %v569_v54 }
  0xbf   : > { %v3917_v19 = vpop.permute.xlu1 %2946 }
  0xc0   : > { %v3919_v20 = vpop.permute.xlu0 %2951 }
  0xc1   : > { %3236 = vrot.lane.b32.xlu1 %v3235_v7, %s3529_s30 }
  0xc2   : > { %3241 = vrot.lane.b32.xlu0 %v3692_v8, %s3530_s4  ;;  %v3265_v8 = vpack.i.bf16 %v347_v26, %v346_v25  ;;  %v2938_v25 = vunpack.i.l.bf16 %v3904_v50 }
  0xc3   : > { %v3924_v57 = vpop.permute.xlu1 %2956 }
  0xc4   : > { %v3926_v21 = vpop.permute.xlu0 %2961 }
  0xc5   : > { %3246 = vrot.lane.b32.xlu1 %v3696_v13, %s3530_s4 }
  0xc6   : > { %3251 = vrot.lane.b32.xlu0 %v3738_v58, %s3531_s5 }
  0xc7   : > { %v3932_v22 = vpop.permute.xlu1 %2966 }
  0xc8   : > { %v3934_v31 = vpop.permute.xlu0 %2971 }
  0xc9   : > { %3256 = vrot.lane.b32.xlu1 %v3742_v3, %s3531_s5 }
  0xca   : > { %3261 = vrot.lane.b32.xlu0 %v3235_v7, %s3526_s21  ;;  %v2939_v7 = vunpack.i.h.bf16 %v3904_v50 }
  0xcb   : > { %v3939_v32 = vpop.permute.xlu1 %2976 }
  0xcc   : > { %v3941_v39 = vpop.permute.xlu0 %2981 }
  0xcd   : > { %4568 = vst [vmem:[#allocation12_spill] sm:$0xff] %v3941_v39  ;;  %3266 = vrot.lane.b32.xlu1 %v3265_v8, %s3526_s21 }
  0xce   : > { %3271 = vrot.lane.b32.xlu0 %v3696_v13, %s3527_s24  ;;  %v3295_v13 = vpack.i.bf16 %v349_v51, %v348_v48 }
  0xcf   : > { %v3946_v58 = vpop.permute.xlu1 %2986 }
  0xd0   : > { %4569 = vst [vmem:[#allocation13_spill] sm:$0xff] %v3946_v58  ;;  %v3948_v40 = vpop.permute.xlu0 %2991  ;;  %v2948_v58 = vunpack.i.l.bf16 %v3917_v19 }
  0xd1   : > { %4570 = vst [vmem:[#allocation14_spill] sm:$0xff] %v3948_v40  ;;  %3276 = vrot.lane.b32.xlu1 %v3700_v14, %s3527_s24  ;;  %v3300_v14 = vpack.i.bf16 %v568_v47, %v567_v45  ;;  %v3974_v45 = vld [vmem:[#allocation2 + $0x168] sm:$0xff]  ;;  %v3976_v47 = vld [vmem:[#allocation2 + $0x170] sm:$0xff] }
  0xd2   : > { %3281 = vrot.lane.b32.xlu0 %v3742_v3, %s3528_s27  ;;  %v3961_v3 = vld [vmem:[#allocation2 + $0x150] sm:$0xff]  ;;  %v327_v40 = vld [vmem:[#allocation2 + $0x8] sm:$0xff] }
  0xd3   : > { %v3954_v41 = vpop.permute.xlu1 %2996 }
  0xd4   : > { %4571 = vst [vmem:[#allocation15_spill] sm:$0xff] %v3954_v41  ;;  %v3956_v53 = vpop.permute.xlu0 %3001  ;;  %v481_v41 = vld [vmem:[#allocation2 + $0x159] sm:$0xff] }
  0xd5   : > { %4572 = vst [vmem:[#allocation16_spill] sm:$0xff] %v3956_v53  ;;  %3286 = vrot.lane.b32.xlu1 %v3746_v4, %s3528_s27  ;;  %v574_v53 = vld [vmem:[#allocation2 + $0x141] sm:$0xff] }
  0xd6   : > { %3291 = vrot.lane.b32.xlu0 %v3265_v8, %s3529_s30  ;;  %v1667_v8 = vsel %vm215_vm0, %v3961_v3, %v2933_v55  ;;  %v1670_v55 = vsel %vm215_vm0, %v3976_v47, %v2939_v7 }
  0xd7   : > { %v3965_v0 = vpop.permute.xlu1 %3006 }
  0xd8   : > { %4573 = vst [vmem:[#allocation17_spill] sm:$0xff] %v3965_v0  ;;  %v3012_v5 = vpop.permute.xlu0 %3011  ;;  %v1669_v0 = vsel %vm215_vm0, %v3974_v45, %v2938_v25  ;;  %v476_v25 = vld [vmem:[#allocation2 + $0x121] sm:$0xff] }
  0xd9   : > { %v3014_v26 = vunpack.i.h.bf16 %v3012_v5  ;;  %v3013_v48 = vunpack.i.l.bf16 %v3012_v5  ;;  %3296 = vrot.lane.b32.xlu1 %v3295_v13, %s3529_s30 }
  0xda   : > { %3301 = vrot.lane.b32.xlu0 %v3300_v14, %s3530_s4 }
  0xdb   : > { %v3980_v51 = vsel %vm1671_vm4, %v1667_v8, %v3013_v48  ;;  %v3983_v50 = vsel %vm1671_vm4, %v1668_v15, %v3014_v26  ;;  %v3017_v54 = vpop.permute.xlu1 %3016  ;;  %v350_v15 = vld [vmem:[#allocation2 + $0x120] sm:$0xff]  ;;  %v351_v8 = vld [vmem:[#allocation2 + $0x128] sm:$0xff] }
  0xdc   : > { %4574 = vst [vmem:[#allocation18_spill] sm:$0xff] %v3980_v51  ;;  %4575 = vst [vmem:[#allocation19_spill] sm:$0xff] %v3983_v50  ;;  %v3019_v56 = vunpack.i.h.bf16 %v3017_v54  ;;  %v3018_v5 = vunpack.i.l.bf16 %v3017_v54  ;;  %v3985_v37 = vpop.permute.xlu0 %3021  ;;  %v3325_v7 = vpack.i.bf16 %v351_v8, %v350_v15  ;;  %v352_v8 = vld [vmem:[#allocation2 + $0x138] sm:$0xff]  ;;  %v353_v51 = vld [vmem:[#allocation2 + $0x140] sm:$0xff] }
  0xdd   : > { %3306 = vrot.lane.b32.xlu1 %v3305_v9, %s3530_s4  ;;  %v3024_v63 = vunpack.i.h.bf16 %v3985_v37 }
  0xde   : > { %v3993_v14 = vsel %vm1671_vm4, %v1670_v55, %v3019_v56  ;;  %v3996_v48 = vsel %vm1671_vm4, %v1669_v0, %v3018_v5  ;;  %3311 = vrot.lane.b32.xlu0 %v3746_v4, %s3531_s5  ;;  %v477_v56 = vld [vmem:[#allocation2 + $0x129] sm:$0xff] }
  0xdf   : > { %4576 = vst [vmem:[#allocation20_spill] sm:$0xff] %v3993_v14  ;;  %4577 = vst [vmem:[#allocation21_spill] sm:$0xff] %v3996_v48  ;;  %v4000_v26 = vpop.permute.xlu1 %3026  ;;  %v3335_v4 = vpack.i.bf16 %v477_v56, %v476_v25  ;;  %v508_v5 = vld [vmem:[#allocation2 + $0x122] sm:$0xff]  ;;  %v509_v14 = vld [vmem:[#allocation2 + $0x12a] sm:$0xff]  ;;  %v4028_v56 = vpack.i.bf16 %v353_v51, %v352_v8  ;;  %v2868_v51 = vunpack.i.l.bf16 %v3855_v38  ;;  %v2944_v8 = vunpack.i.h.bf16 %v3910_v18 }
  0xe0   : > { %v4002_v54 = vpop.permute.xlu0 %3031  ;;  %v3023_v38 = vunpack.i.l.bf16 %v3985_v37  ;;  %v4049_v18 = vpack.i.bf16 %v3963_v61, %v3961_v3  ;;  %v3029_v12 = vunpack.i.h.bf16 %v4000_v26  ;;  %v3028_v2 = vunpack.i.l.bf16 %v4000_v26 }
  0xe1   : > { %3316 = vrot.lane.b32.xlu1 %v3750_v11, %s3531_s5  ;;  %v1641_v37 = vsel %vm215_vm0, %v3757_v23, %v2868_v51  ;;  %v1642_v3 = vsel %vm215_vm0, %v3759_v24, %v2869_v6 }
  0xe2   : > { %3321 = vrot.lane.b32.xlu0 %v3295_v13, %s3526_s21  ;;  %v4018_v13 = vpack.i.bf16 %v509_v14, %v508_v5  ;;  %v2864_v14 = vunpack.i.h.bf16 %v3847_v52  ;;  %v2863_v5 = vunpack.i.l.bf16 %v3847_v52  ;;  %v2949_v52 = vunpack.i.h.bf16 %v3917_v19 }
  0xe3   : > { %v4007_v55 = vpop.permute.xlu1 %3036 }
  0xe4   : > { %v4009_v0 = vpop.permute.xlu0 %3041  ;;  %v1640_v19 = vsel %vm215_vm0, %v327_v40, %v2864_v14 }
  0xe5   : > { %3326 = vrot.lane.b32.xlu1 %v3325_v7, %s3526_s21 }
  0xe6   : > { %3331 = vrot.lane.b32.xlu0 %v3305_v9, %s3527_s24  ;;  %v573_v9 = vld [vmem:[#allocation2 + $0x139] sm:$0xff] }
  0xe7   : > { %v4013_v48 = vpop.permute.xlu1 %3046 }
  0xe8   : > { %v4015_v50 = vpop.permute.xlu0 %3051 }
  0xe9   : > { %3336 = vrot.lane.b32.xlu1 %v3335_v4, %s3527_s24 }
  0xea   : > { %3341 = vrot.lane.b32.xlu0 %v3750_v11, %s3528_s27  ;;  %v480_v11 = vld [vmem:[#allocation2 + $0x151] sm:$0xff] }
  0xeb   : > { %v4022_v15 = vpop.permute.xlu1 %3056  ;;  %v4051_v46 = vpack.i.bf16 %v481_v41, %v480_v11  ;;  %v1673_v41 = vsel %vm1671_vm4, %v1640_v19, %v2944_v8 }
  0xec   : > { %v4024_v25 = vpop.permute.xlu0 %3061  ;;  %v3059_v26 = vunpack.i.h.bf16 %v4022_v15 }
  0xed   : > { %3346 = vrot.lane.b32.xlu1 %v4018_v13, %s3528_s27  ;;  %v3064_v24 = vunpack.i.h.bf16 %v4024_v25  ;;  %v3063_v6 = vunpack.i.l.bf16 %v4024_v25 }
  0xee   : > { %3351 = vrot.lane.b32.xlu0 %v3325_v7, %s3529_s30  ;;  %v4039_v7 = vpack.i.bf16 %v574_v53, %v573_v9  ;;  %v1639_v53 = vsel %vm215_vm0, %v326_v10, %v2863_v5  ;;  %v1674_v10 = vsel %vm1671_vm4, %v1641_v37, %v2948_v58  ;;  %v1675_v9 = vsel %vm1671_vm4, %v1642_v3, %v2949_v52 }
  0xef   : > { %v3067_v17 = vpop.permute.xlu1 %3066  ;;  %v1672_v61 = vsel %vm1671_vm4, %v1639_v53, %v2943_v16  ;;  %v1706_v5 = vsel %vm1704_vm5, %v1673_v41, %v3024_v63  ;;  %v1707_v16 = vsel %vm1704_vm5, %v1674_v10, %v3028_v2  ;;  %v1708_v58 = vsel %vm1704_vm5, %v1675_v9, %v3029_v12 }
  0xf0   : > { %v3072_v39 = vpop.permute.xlu0 %3071  ;;  %v1705_v23 = vsel %vm1704_vm5, %v1672_v61, %v3023_v38  ;;  %v3069_v11 = vunpack.i.h.bf16 %v3067_v17  ;;  %v3068_v51 = vunpack.i.l.bf16 %v3067_v17  ;;  %v1739_v19 = vsel %vm1737_vm6, %v1706_v5, %v3059_v26 }
  0xf1   : > { %3356 = vrot.lane.b32.xlu1 %v4028_v56, %s3529_s30  ;;  %v3073_v8 = vunpack.i.l.bf16 %v3072_v39  ;;  %v1740_v12 = vsel %vm1737_vm6, %v1707_v16, %v3063_v6  ;;  %v1741_v17 = vsel %vm1737_vm6, %v1708_v58, %v3064_v24 }
  0xf2   : > { %3361 = vrot.lane.b32.xlu0 %v3335_v4, %s3530_s4  ;;  %v3058_v4 = vunpack.i.l.bf16 %v4022_v15  ;;  %v3074_v15 = vunpack.i.h.bf16 %v3072_v39 }
  0xf3   : > { %v3077_v40 = vpop.permute.xlu1 %3076  ;;  %v1773_v10 = vsel %vm1770_vm7, %v1740_v12, %v3073_v8 }
  0xf4   : > { %v3082_v14 = vpop.permute.xlu0 %3081  ;;  %v3079_v63 = vunpack.i.h.bf16 %v3077_v40  ;;  %v3078_v52 = vunpack.i.l.bf16 %v3077_v40  ;;  %v1738_v25 = vsel %vm1737_vm6, %v1705_v23, %v3058_v4  ;;  %v1774_v9 = vsel %vm1770_vm7, %v1741_v17, %v3074_v15 }
  0xf5   : > { %3366 = vrot.lane.b32.xlu1 %v4039_v7, %s3530_s4  ;;  %v3084_v53 = vunpack.i.h.bf16 %v3082_v14  ;;  %v3083_v37 = vunpack.i.l.bf16 %v3082_v14  ;;  %v1771_v39 = vsel %vm1770_vm7, %v1738_v25, %v3068_v51  ;;  %v513_v25 = vld [vmem:[#allocation2 + $0x15a] sm:$0xff] }
  0xf6   : > { %3371 = vrot.lane.b32.xlu0 %v4018_v13, %s3531_s5  ;;  %v1772_v13 = vsel %vm1770_vm7, %v1739_v19, %v3069_v11  ;;  %v1804_v26 = vsel %vm1803_vm8, %v1771_v39, %v3078_v52  ;;  %v609_v39 = vld [vmem:[#allocation2 + $0x16a] sm:$0xff] }
  0xf7   : > { %v3087_v38 = vpop.permute.xlu1 %3086  ;;  %v1805_v4 = vsel %vm1803_vm8, %v1772_v13, %v3079_v63  ;;  %v1806_v23 = vsel %vm1803_vm8, %v1773_v10, %v3083_v37  ;;  %v1807_v5 = vsel %vm1803_vm8, %v1774_v9, %v3084_v53  ;;  %v2874_v13 = vunpack.i.h.bf16 %v3853_v59  ;;  %v452_v10 = vld [vmem:[#allocation2 + $0x180] sm:$0xff]  ;;  %v453_v9 = vld [vmem:[#allocation2 + $0x188] sm:$0xff] }
  0xf8   : > { %v3092_v2 = vpop.permute.xlu0 %3091  ;;  %v3089_v3 = vunpack.i.h.bf16 %v3087_v38  ;;  %v3088_v41 = vunpack.i.l.bf16 %v3087_v38  ;;  %v512_v38 = vld [vmem:[#allocation2 + $0x152] sm:$0xff] }
  0xf9   : > { %3376 = vrot.lane.b32.xlu1 %v4041_v49, %s3531_s5  ;;  %v3094_v61 = vunpack.i.h.bf16 %v3092_v2  ;;  %v3093_v40 = vunpack.i.l.bf16 %v3092_v2 }
  0xfa   : > { %3381 = vrot.lane.b32.xlu0 %v4028_v56, %s3526_s21  ;;  %v1837_v56 = vsel %vm1836_vm9, %v1804_v26, %v3088_v41  ;;  %v1838_v51 = vsel %vm1836_vm9, %v1805_v4, %v3089_v3  ;;  %v577_v3 = vld [vmem:[#allocation2 + $0x169] sm:$0xff]  ;;  %v578_v41 = vld [vmem:[#allocation2 + $0x171] sm:$0xff]  ;;  %v2879_v26 = vunpack.i.h.bf16 %v3861_v60  ;;  %v2878_v4 = vunpack.i.l.bf16 %v3861_v60 }
  0xfb   : > { %v3097_v14 = vpop.permute.xlu1 %3096  ;;  %v1839_v15 = vsel %vm1836_vm9, %v1806_v23, %v3093_v40  ;;  %v1840_v8 = vsel %vm1836_vm9, %v1807_v5, %v3094_v61  ;;  %v2873_v61 = vunpack.i.l.bf16 %v3853_v59  ;;  %v610_v40 = vld [vmem:[#allocation2 + $0x172] sm:$0xff]  ;;  %v2953_v23 = vunpack.i.l.bf16 %v3919_v20 }
  0xfc   : > { %v3099_v24 = vunpack.i.h.bf16 %v3097_v14  ;;  %v3098_v6 = vunpack.i.l.bf16 %v3097_v14  ;;  %v3102_v16 = vpop.permute.xlu0 %3101  ;;  %v2954_v14 = vunpack.i.h.bf16 %v3919_v20  ;;  %v2958_v59 = vunpack.i.l.bf16 %v3924_v57 }
  0xfd   : > { %v3104_v58 = vunpack.i.h.bf16 %v3102_v16  ;;  %v3103_v11 = vunpack.i.l.bf16 %v3102_v16  ;;  %3386 = vrot.lane.b32.xlu1 %v4049_v18, %s3526_s21  ;;  %v4130_v16 = vpack.i.bf16 %v578_v41, %v577_v3  ;;  %v3033_v60 = vunpack.i.l.bf16 %v4002_v54 }
  0xfe   : > { %3391 = vrot.lane.b32.xlu0 %v4039_v7, %s3527_s24  ;;  %v1870_v63 = vsel %vm1869_vm10, %v1837_v56, %v3098_v6  ;;  %v1871_v52 = vsel %vm1869_vm10, %v1838_v51, %v3099_v24  ;;  %v4113_v7 = vpack.i.bf16 %v513_v25, %v512_v38  ;;  %v2959_v24 = vunpack.i.h.bf16 %v3924_v57 }
  0xff   : > { %v1872_v19 = vsel %vm1869_vm10, %v1839_v15, %v3103_v11  ;;  %v1873_v53 = vsel %vm1869_vm10, %v1840_v8, %v3104_v58  ;;  %v4106_v37 = vpop.permute.xlu1 %3106  ;;  %v1902_v2 = vpack.c.bf16 %v1871_v52, %v1870_v63  ;;  %v3034_v58 = vunpack.i.h.bf16 %v4002_v54 }
 0x100   : > { %v1903_v12 = vpack.c.bf16 %v1873_v53, %v1872_v19  ;;  %v4108_v17 = vpop.permute.xlu0 %3111  ;;  %v4136_v20 = vpack.i.bf16 %v610_v40, %v609_v39  ;;  %v4138_v11 = vpack.i.bf16 %v453_v9, %v452_v10  ;;  %v1643_v57 = vsel %vm215_vm0, %v3765_v27, %v2873_v61 }
 0x101   : > { %3396 = vrot.lane.b32.xlu1 %v4051_v46, %s3527_s24  ;;  %2803 = vmatprep.mubr.msk.bf16.mxu0 %vm1938_vm11, %v1902_v2  ;;  %v3038_v56 = vunpack.i.l.bf16 %v4007_v55  ;;  %v1646_v54 = vsel %vm215_vm0, %v3771_v30, %v2879_v26  ;;  %v1645_v51 = vsel %vm215_vm0, %v3769_v29, %v2878_v4  ;;  %v1676_v27 = vsel %vm1671_vm4, %v1643_v57, %v2953_v23 }
 0x102   : > { %3401 = vrot.lane.b32.xlu0 %v4041_v49, %s3528_s27  ;;  %2804 = vmatmul.mubr.msk.bf16.vlgmr.msra.gmra.mrb[0].mxu0 %vm1938_vm11, %v1903_v12  ;;  %v4128_v49 = vpack.i.bf16 %v3976_v47, %v3974_v45  ;;  %v1644_v45 = vsel %vm215_vm0, %v3767_v28, %v2874_v13  ;;  %v3039_v47 = vunpack.i.h.bf16 %v4007_v55  ;;  %v1679_v28 = vsel %vm1671_vm4, %v1646_v54, %v2959_v24 }
 0x103   : > { %v3117_v5 = vpop.permute.xlu1 %3116  ;;  %v1677_v15 = vsel %vm1671_vm4, %v1644_v45, %v2954_v14  ;;  %v1678_v63 = vsel %vm1671_vm4, %v1645_v51, %v2958_v59  ;;  %v3109_v55 = vunpack.i.h.bf16 %v4106_v37  ;;  %v3108_v52 = vunpack.i.l.bf16 %v4106_v37 }
 0x104   : > { %v3122_v6 = vpop.permute.xlu0 %3121  ;;  %v1709_v38 = vsel %vm1704_vm5, %v1676_v27, %v3033_v60  ;;  %v1710_v30 = vsel %vm1704_vm5, %v1677_v15, %v3034_v58  ;;  %v3114_v29 = vunpack.i.h.bf16 %v4108_v17  ;;  %v3113_v25 = vunpack.i.l.bf16 %v4108_v17 }
 0x105   : > { %3406 = vrot.lane.b32.xlu1 %v4113_v7, %s3528_s27  ;;  %v1711_v19 = vsel %vm1704_vm5, %v1678_v63, %v3038_v56  ;;  %v1712_v53 = vsel %vm1704_vm5, %v1679_v28, %v3039_v47  ;;  %v3119_v2 = vunpack.i.h.bf16 %v3117_v5  ;;  %v3118_v12 = vunpack.i.l.bf16 %v3117_v5 }
 0x106   : > { %3411 = vrot.lane.b32.xlu0 %v4049_v18, %s3529_s30  ;;  %v3124_v37 = vunpack.i.h.bf16 %v3122_v6  ;;  %v3123_v3 = vunpack.i.l.bf16 %v3122_v6  ;;  %v1742_v61 = vsel %vm1737_vm6, %v1709_v38, %v3108_v52  ;;  %v1743_v17 = vsel %vm1737_vm6, %v1710_v30, %v3109_v55  ;;  %v484_v38 = vld [vmem:[#allocation2 + $0x181] sm:$0xff]  ;;  %v485_v30 = vld [vmem:[#allocation2 + $0x189] sm:$0xff] }
 0x107   : > { %v3127_v8 = vpop.permute.xlu1 %3126  ;;  %v1745_v26 = vsel %vm1737_vm6, %v1712_v53, %v3114_v29  ;;  %v1744_v4 = vsel %vm1737_vm6, %v1711_v19, %v3113_v25  ;;  %v1776_v5 = vsel %vm1770_vm7, %v1743_v17, %v3119_v2  ;;  %v4212_v17 = vld [vmem:[#allocation2 + $0x199] sm:$0xff] }
 0x108   : > { %v3132_v18 = vpop.permute.xlu0 %3131  ;;  %v3129_v41 = vunpack.i.h.bf16 %v3127_v8  ;;  %v3128_v39 = vunpack.i.l.bf16 %v3127_v8  ;;  %v1777_v6 = vsel %vm1770_vm7, %v1744_v4, %v3123_v3  ;;  %v1778_v58 = vsel %vm1770_vm7, %v1745_v26, %v3124_v37  ;;  %v516_v37 = vld [vmem:[#allocation2 + $0x182] sm:$0xff] }
 0x109   : > { %3416 = vrot.lane.b32.xlu1 %v4128_v49, %s3529_s30  ;;  %v3134_v40 = vunpack.i.h.bf16 %v3132_v18  ;;  %v3133_v10 = vunpack.i.l.bf16 %v3132_v18  ;;  %v2884_v3 = vunpack.i.h.bf16 %v3863_v43  ;;  %v2964_v26 = vunpack.i.h.bf16 %v3926_v21 }
 0x10a   : > { %3421 = vrot.lane.b32.xlu0 %v4051_v46, %s3530_s4  ;;  %v1775_v46 = vsel %vm1770_vm7, %v1742_v61, %v3118_v12  ;;  %v1809_v57 = vsel %vm1803_vm8, %v1776_v5, %v3129_v41  ;;  %v517_v41 = vld [vmem:[#allocation2 + $0x18a] sm:$0xff]  ;;  %v2883_v61 = vunpack.i.l.bf16 %v3863_v43  ;;  %v2963_v4 = vunpack.i.l.bf16 %v3926_v21  ;;  %v4222_v43 = vld [vmem:[#allocation2 + $0x1a2] sm:$0xff] }
 0x10b   : > { %v3137_v13 = vpop.permute.xlu1 %3136  ;;  %v1808_v60 = vsel %vm1803_vm8, %v1775_v46, %v3128_v39  ;;  %v1810_v47 = vsel %vm1803_vm8, %v1777_v6, %v3133_v10  ;;  %v1811_v56 = vsel %vm1803_vm8, %v1778_v58, %v3134_v40  ;;  %v4206_v39 = vld [vmem:[#allocation2 + $0x198] sm:$0xff]  ;;  %v4214_v40 = vld [vmem:[#allocation2 + $0x1a1] sm:$0xff]  ;;  %v2889_v10 = vunpack.i.h.bf16 %v3869_v44 }
 0x10c   : > { %v3142_v9 = vpop.permute.xlu0 %3141  ;;  %v3139_v14 = vunpack.i.h.bf16 %v3137_v13  ;;  %v3138_v23 = vunpack.i.l.bf16 %v3137_v13  ;;  %v550_v13 = vld [vmem:[#allocation2 + $0x1a0] sm:$0xff]  ;;  %v2968_v46 = vunpack.i.l.bf16 %v3932_v22  ;;  %v3044_v6 = vunpack.i.h.bf16 %v4009_v0 }
 0x10d   : > { %3426 = vrot.lane.b32.xlu1 %v4130_v16, %s3530_s4  ;;  %v3144_v24 = vunpack.i.h.bf16 %v3142_v9  ;;  %v3143_v59 = vunpack.i.l.bf16 %v3142_v9  ;;  %v2888_v9 = vunpack.i.l.bf16 %v3869_v44  ;;  %v1648_v44 = vsel %vm215_vm0, %v3781_v34, %v2884_v3 }
 0x10e   : > { %3431 = vrot.lane.b32.xlu0 %v4113_v7, %s3531_s5  ;;  %v1841_v27 = vsel %vm1836_vm9, %v1808_v60, %v3138_v23  ;;  %v1842_v7 = vsel %vm1836_vm9, %v1809_v57, %v3139_v14  ;;  %v4220_v23 = vld [vmem:[#allocation2 + $0x19a] sm:$0xff]  ;;  %v3043_v21 = vunpack.i.l.bf16 %v4009_v0  ;;  %v3485_v58 = vpack.i.bf16 %v4214_v40, %v4212_v17 }
 0x10f   : > { %v3147_v45 = vpop.permute.xlu1 %3146  ;;  %v1843_v63 = vsel %vm1836_vm9, %v1810_v47, %v3143_v59  ;;  %v1844_v55 = vsel %vm1836_vm9, %v1811_v56, %v3144_v24  ;;  %v4226_v24 = vpack.i.bf16 %v517_v41, %v516_v37  ;;  %v3475_v59 = vpack.i.bf16 %v550_v13, %v4206_v39 }
 0x110   : > { %v3149_v54 = vunpack.i.h.bf16 %v3147_v45  ;;  %v3148_v51 = vunpack.i.l.bf16 %v3147_v45  ;;  %v3152_v15 = vpop.permute.xlu0 %3151  ;;  %v3049_v60 = vunpack.i.h.bf16 %v4013_v48  ;;  %v3048_v57 = vunpack.i.l.bf16 %v4013_v48 }
 0x111   : > { %v3154_v8 = vunpack.i.h.bf16 %v3152_v15  ;;  %v3153_v28 = vunpack.i.l.bf16 %v3152_v15  ;;  %3436 = vrot.lane.b32.xlu1 %v4136_v20, %s3531_s5  ;;  %v3495_v34 = vpack.i.bf16 %v4222_v43, %v4220_v23  ;;  %v1650_v0 = vsel %vm215_vm0, %v3785_v36, %v2889_v10 }
 0x112   : > { %v1874_v52 = vsel %vm1869_vm10, %v1841_v27, %v3148_v51  ;;  %v1875_v18 = vsel %vm1869_vm10, %v1842_v7, %v3149_v54  ;;  %3441 = vrot.lane.b32.xlu0 %v4128_v49, %s3526_s21  ;;  %v4204_v49 = vpack.i.bf16 %v485_v30, %v484_v38  ;;  %v1649_v45 = vsel %vm215_vm0, %v3783_v35, %v2888_v9 }
 0x113   : > { %v1904_v29 = vpack.c.bf16 %v1875_v18, %v1874_v52  ;;  %v1876_v25 = vsel %vm1869_vm10, %v1843_v63, %v3153_v28  ;;  %v1877_v19 = vsel %vm1869_vm10, %v1844_v55, %v3154_v8  ;;  %v4196_v53 = vpop.permute.xlu1 %3156  ;;  %v1682_v48 = vsel %vm1671_vm4, %v1649_v45, %v2968_v46 }
 0x114   : > { %v1905_v2 = vpack.c.bf16 %v1877_v19, %v1876_v25  ;;  %v4198_v12 = vpop.permute.xlu0 %3161  ;;  %v3158_v51 = vunpack.i.l.bf16 %v4196_v53  ;;  %v1715_v8 = vsel %vm1704_vm5, %v1682_v48, %v3048_v57  ;;  %v2979_v23 = vunpack.i.h.bf16 %v3939_v32 }
 0x115   : > { %3446 = vrot.lane.b32.xlu1 %v4138_v11, %s3526_s21  ;;  %2807 = vmatprep.mubr.msk.bf16.mxu0 %vm1938_vm11, %v1904_v29  ;;  %v3164_v35 = vunpack.i.h.bf16 %v4198_v12  ;;  %v3163_v7 = vunpack.i.l.bf16 %v4198_v12  ;;  %v2978_v43 = vunpack.i.l.bf16 %v3939_v32  ;;  %v3504_v32 = vld [vmem:[#allocation2 + $0xa8] sm:$0xff] }
 0x116   : > { %3451 = vrot.lane.b32.xlu0 %v4130_v16, %s3527_s24  ;;  %2808 = vmatmul.mubr.msk.bf16.gmra.mrb[4].mxu0 %vm1938_vm11, %v1905_v2  ;;  %v2969_v16 = vunpack.i.h.bf16 %v3932_v22  ;;  %v1647_v22 = vsel %vm215_vm0, %v3779_v33, %v2883_v61  ;;  %v1681_v33 = vsel %vm1671_vm4, %v1648_v44, %v2964_v26 }
 0x117   : > { %v3167_v14 = vpop.permute.xlu1 %3166  ;;  %v1680_v47 = vsel %vm1671_vm4, %v1647_v22, %v2963_v4  ;;  %v1714_v36 = vsel %vm1704_vm5, %v1681_v33, %v3044_v6  ;;  %v1748_v3 = vsel %vm1737_vm6, %v1715_v8, %v3163_v7 }
 0x118   : > { %v3172_v5 = vpop.permute.xlu0 %3171  ;;  %v1683_v54 = vsel %vm1671_vm4, %v1650_v0, %v2969_v16  ;;  %v1713_v27 = vsel %vm1704_vm5, %v1680_v47, %v3043_v21  ;;  %v3169_v63 = vunpack.i.h.bf16 %v3167_v14  ;;  %v3168_v55 = vunpack.i.l.bf16 %v3167_v14 }
 0x119   : > { %3456 = vrot.lane.b32.xlu1 %v4204_v49, %s3527_s24  ;;  %v1716_v28 = vsel %vm1704_vm5, %v1683_v54, %v3049_v60  ;;  %v3174_v52 = vunpack.i.h.bf16 %v3172_v5  ;;  %v3173_v18 = vunpack.i.l.bf16 %v3172_v5  ;;  %v1746_v25 = vsel %vm1737_vm6, %v1713_v27, %v3158_v51 }
 0x11a   : > { %3461 = vrot.lane.b32.xlu0 %v4136_v20, %s3528_s27  ;;  %v3159_v20 = vunpack.i.h.bf16 %v4196_v53  ;;  %v1749_v37 = vsel %vm1737_vm6, %v1716_v28, %v3164_v35  ;;  %v2899_v51 = vunpack.i.h.bf16 %v3875_v1  ;;  %v2898_v27 = vunpack.i.l.bf16 %v3875_v1 }
 0x11b   : > { %v3177_v56 = vpop.permute.xlu1 %3176  ;;  %v1781_v40 = vsel %vm1770_vm7, %v1748_v3, %v3173_v18  ;;  %v1782_v10 = vsel %vm1770_vm7, %v1749_v37, %v3174_v52  ;;  %v2973_v35 = vunpack.i.l.bf16 %v3934_v31 }
 0x11c   : > { %v3182_v15 = vpop.permute.xlu0 %3181  ;;  %v3179_v38 = vunpack.i.h.bf16 %v3177_v56  ;;  %v3178_v30 = vunpack.i.l.bf16 %v3177_v56  ;;  %v1747_v19 = vsel %vm1737_vm6, %v1714_v36, %v3159_v20  ;;  %v2893_v20 = vunpack.i.l.bf16 %v3871_v62 }
 0x11d   : > { %3466 = vrot.lane.b32.xlu1 %v4226_v24, %s3528_s27  ;;  %v3184_v53 = vunpack.i.h.bf16 %v3182_v15  ;;  %v3183_v2 = vunpack.i.l.bf16 %v3182_v15  ;;  %v1780_v13 = vsel %vm1770_vm7, %v1747_v19, %v3169_v63  ;;  %v2974_v36 = vunpack.i.h.bf16 %v3934_v31  ;;  %v4578_v63 = vld [vmem:[#allocation3_spill] sm:$0xff] }
 0x11e   : > { %3471 = vrot.lane.b32.xlu0 %v4138_v11, %s3529_s30  ;;  %v1779_v11 = vsel %vm1770_vm7, %v1746_v25, %v3168_v55  ;;  %v1813_v26 = vsel %vm1803_vm8, %v1780_v13, %v3179_v38  ;;  %v1654_v1 = vsel %vm215_vm0, %v4578_v63, %v2899_v51  ;;  %v3054_v55 = vunpack.i.h.bf16 %v4015_v50 }
 0x11f   : > { %v3187_v29 = vpop.permute.xlu1 %3186  ;;  %v1812_v9 = vsel %vm1803_vm8, %v1779_v11, %v3178_v30  ;;  %v1814_v14 = vsel %vm1803_vm8, %v1781_v40, %v3183_v2  ;;  %v1815_v16 = vsel %vm1803_vm8, %v1782_v10, %v3184_v53  ;;  %v1687_v19 = vsel %vm1671_vm4, %v1654_v1, %v2979_v23 }
 0x120   : > { %v3192_v12 = vpop.permute.xlu0 %3191  ;;  %v3189_v41 = vunpack.i.h.bf16 %v3187_v29  ;;  %v3188_v39 = vunpack.i.l.bf16 %v3187_v29  ;;  %v1653_v29 = vsel %vm215_vm0, %v3504_v32, %v2898_v27 }
 0x121   : > { %3476 = vrot.lane.b32.xlu1 %v3475_v59, %s3529_s30  ;;  %v3194_v61 = vunpack.i.h.bf16 %v3192_v12  ;;  %v3193_v17 = vunpack.i.l.bf16 %v3192_v12  ;;  %v1686_v53 = vsel %vm1671_vm4, %v1653_v29, %v2978_v43 }
 0x122   : > { %3481 = vrot.lane.b32.xlu0 %v4204_v49, %s3530_s4  ;;  %v1845_v44 = vsel %vm1836_vm9, %v1812_v9, %v3188_v39  ;;  %v1846_v49 = vsel %vm1836_vm9, %v1813_v26, %v3189_v41 }
 0x123   : > { %v3197_v4 = vpop.permute.xlu1 %3196  ;;  %v1847_v22 = vsel %vm1836_vm9, %v1814_v14, %v3193_v17  ;;  %v1848_v60 = vsel %vm1836_vm9, %v1815_v16, %v3194_v61 }
 0x124   : > { %v3199_v46 = vunpack.i.h.bf16 %v3197_v4  ;;  %v3198_v5 = vunpack.i.l.bf16 %v3197_v4  ;;  %v3202_v59 = vpop.permute.xlu0 %3201 }
 0x125   : > { %v3204_v6 = vunpack.i.h.bf16 %v3202_v59  ;;  %v3203_v21 = vunpack.i.l.bf16 %v3202_v59  ;;  %3486 = vrot.lane.b32.xlu1 %v3485_v58, %s3530_s4 }
 0x126   : > { %v1878_v57 = vsel %vm1869_vm10, %v1845_v44, %v3198_v5  ;;  %v1879_v0 = vsel %vm1869_vm10, %v1846_v49, %v3199_v46  ;;  %3491 = vrot.lane.b32.xlu0 %v4226_v24, %s3531_s5  ;;  %v2894_v24 = vunpack.i.h.bf16 %v3871_v62  ;;  %v3503_v62 = vld [vmem:[#allocation2 + $0x90] sm:$0xff] }
 0x127   : > { %v1906_v45 = vpack.c.bf16 %v1879_v0, %v1878_v57  ;;  %v1880_v47 = vsel %vm1869_vm10, %v1847_v22, %v3203_v21  ;;  %v1881_v33 = vsel %vm1869_vm10, %v1848_v60, %v3204_v6  ;;  %v3207_v56 = vpop.permute.xlu1 %3206  ;;  %v1651_v28 = vsel %vm215_vm0, %v3503_v62, %v2893_v20 }
 0x128   : > { %v1907_v54 = vpack.c.bf16 %v1881_v33, %v1880_v47  ;;  %v3212_v48 = vpop.permute.xlu0 %3211  ;;  %v1652_v8 = vsel %vm215_vm0, %v3793_v42, %v2894_v24  ;;  %v3209_v31 = vunpack.i.h.bf16 %v3207_v56  ;;  %v3208_v18 = vunpack.i.l.bf16 %v3207_v56 }
 0x129   : > { %3496 = vrot.lane.b32.xlu1 %v3495_v34, %s3531_s5  ;;  %2811 = vmatprep.mubr.msk.bf16.mxu0 %vm1938_vm11, %v1906_v45  ;;  %v3053_v34 = vunpack.i.l.bf16 %v4015_v50  ;;  %v3214_v38 = vunpack.i.h.bf16 %v3212_v48  ;;  %v3213_v30 = vunpack.i.l.bf16 %v3212_v48  ;;  %v1684_v25 = vsel %vm1671_vm4, %v1651_v28, %v2973_v35 }
 0x12a   : > { %2812 = vmatmul.mubr.msk.bf16.gmra.mrb[8].mxu0 %vm1938_vm11, %v1907_v54  ;;  %v1685_v42 = vsel %vm1671_vm4, %v1652_v8, %v2974_v36  ;;  %v1719_v61 = vsel %vm1704_vm5, %v1686_v53, %v3208_v18  ;;  %v1720_v17 = vsel %vm1704_vm5, %v1687_v19, %v3209_v31  ;;  %v4582_v53 = vld [vmem:[#allocation13_spill] sm:$0xff] }
 0x12b   : > { %v3217_v58 = vpop.permute.xlu1 %3216  ;;  %v1717_v2 = vsel %vm1704_vm5, %v1684_v25, %v3053_v34  ;;  %v1718_v3 = vsel %vm1704_vm5, %v1685_v42, %v3054_v55  ;;  %v4581_v25 = vld [vmem:[#allocation12_spill] sm:$0xff] }
 0x12c   : > { %v3222_v15 = vpop.permute.xlu0 %3221  ;;  %v3218_v41 = vunpack.i.l.bf16 %v3217_v58  ;;  %v1750_v40 = vsel %vm1737_vm6, %v1717_v2, %v3213_v30  ;;  %v1751_v10 = vsel %vm1737_vm6, %v1718_v3, %v3214_v38  ;;  %v3219_v9 = vunpack.i.h.bf16 %v3217_v58  ;;  %v4580_v38 = vld [vmem:[#allocation5_spill] sm:$0xff]  ;;  %v3505_v3 = vld [vmem:[#allocation2 + $0xc8] sm:$0xff] }
 0x12d   : > { %v3224_v12 = vunpack.i.h.bf16 %v3222_v15  ;;  %v3223_v50 = vunpack.i.l.bf16 %v3222_v15  ;;  %v2909_v30 = vunpack.i.h.bf16 %v4580_v38  ;;  %v2908_v29 = vunpack.i.l.bf16 %v4580_v38 }
 0x12e   : > { %v1752_v49 = vsel %vm1737_vm6, %v1719_v61, %v3218_v41  ;;  %v1753_v33 = vsel %vm1737_vm6, %v1720_v17, %v3219_v9  ;;  %v2984_v42 = vunpack.i.h.bf16 %v4581_v25  ;;  %v2983_v19 = vunpack.i.l.bf16 %v4581_v25 }
 0x12f   : > { %v3227_v7 = vpop.permute.xlu1 %3226  ;;  %v1783_v16 = vsel %vm1770_vm7, %v1750_v40, %v3223_v50  ;;  %v1784_v46 = vsel %vm1770_vm7, %v1751_v10, %v3224_v12  ;;  %v2989_v2 = vunpack.i.h.bf16 %v4582_v53  ;;  %v2988_v12 = vunpack.i.l.bf16 %v4582_v53 }
 0x130   : > { %v3232_v52 = vpop.permute.xlu0 %3231  ;;  %v3228_v26 = vunpack.i.l.bf16 %v3227_v7  ;;  %v3229_v5 = vunpack.i.h.bf16 %v3227_v7 }
 0x131   : > { %v3234_v39 = vunpack.i.h.bf16 %v3232_v52  ;;  %v3233_v11 = vunpack.i.l.bf16 %v3232_v52  ;;  %v4579_v52 = vld [vmem:[#allocation4_spill] sm:$0xff] }
 0x132   : > { %v1785_v56 = vsel %vm1770_vm7, %v1752_v49, %v3228_v26  ;;  %v1786_v58 = vsel %vm1770_vm7, %v1753_v33, %v3229_v5  ;;  %v2904_v31 = vunpack.i.h.bf16 %v4579_v52  ;;  %v2903_v18 = vunpack.i.l.bf16 %v4579_v52 }
 0x133   : > { %v3237_v37 = vpop.permute.xlu1 %3236  ;;  %v1816_v6 = vsel %vm1803_vm8, %v1783_v16, %v3233_v11  ;;  %v1817_v21 = vsel %vm1803_vm8, %v1784_v46, %v3234_v39  ;;  %v3506_v39 = vld [vmem:[#allocation2 + $0xc0] sm:$0xff] }
 0x134   : > { %v3242_v13 = vpop.permute.xlu0 %3241  ;;  %v3238_v59 = vunpack.i.l.bf16 %v3237_v37  ;;  %v3239_v22 = vunpack.i.h.bf16 %v3237_v37  ;;  %v1656_v41 = vsel %vm215_vm0, %v3505_v3, %v2904_v31  ;;  %v1655_v11 = vsel %vm215_vm0, %v3506_v39, %v2903_v18 }
 0x135   : > { %v3244_v4 = vunpack.i.h.bf16 %v3242_v13  ;;  %v3243_v14 = vunpack.i.l.bf16 %v3242_v13  ;;  %v4583_v13 = vld [vmem:[#allocation11_spill] sm:$0xff]  ;;  %v1688_v46 = vsel %vm1671_vm4, %v1655_v11, %v2983_v19  ;;  %v1689_v5 = vsel %vm1671_vm4, %v1656_v41, %v2984_v42 }
 0x136   : > { %v1818_v24 = vsel %vm1803_vm8, %v1785_v56, %v3238_v59  ;;  %v1819_v27 = vsel %vm1803_vm8, %v1786_v58, %v3239_v22  ;;  %v1658_v61 = vsel %vm215_vm0, %v4583_v13, %v2909_v30 }
 0x137   : > { %v3247_v44 = vpop.permute.xlu1 %3246  ;;  %v1849_v54 = vsel %vm1836_vm9, %v1816_v6, %v3243_v14  ;;  %v1850_v48 = vsel %vm1836_vm9, %v1817_v21, %v3244_v4  ;;  %v4584_v14 = vld [vmem:[#allocation10_spill] sm:$0xff]  ;;  %v1691_v59 = vsel %vm1671_vm4, %v1658_v61, %v2989_v2 }
 0x138   : > { %v3252_v60 = vpop.permute.xlu0 %3251  ;;  %v3249_v57 = vunpack.i.h.bf16 %v3247_v44  ;;  %v3248_v0 = vunpack.i.l.bf16 %v3247_v44  ;;  %v1657_v16 = vsel %vm215_vm0, %v4584_v14, %v2908_v29 }
 0x139   : > { %v3254_v45 = vunpack.i.h.bf16 %v3252_v60  ;;  %v3253_v47 = vunpack.i.l.bf16 %v3252_v60  ;;  %v1690_v44 = vsel %vm1671_vm4, %v1657_v16, %v2988_v12 }
 0x13a   : > { %v1851_v34 = vsel %vm1836_vm9, %v1818_v24, %v3248_v0  ;;  %v1852_v7 = vsel %vm1836_vm9, %v1819_v27, %v3249_v57 }
 0x13b   : > { %v1882_v20 = vsel %vm1869_vm10, %v1849_v54, %v3253_v47  ;;  %v1883_v51 = vsel %vm1869_vm10, %v1850_v48, %v3254_v45  ;;  %v3257_v15 = vpop.permute.xlu1 %3256 }
 0x13c   : > { %v1908_v36 = vpack.c.bf16 %v1883_v51, %v1882_v20  ;;  %v3259_v35 = vunpack.i.h.bf16 %v3257_v15  ;;  %v3258_v23 = vunpack.i.l.bf16 %v3257_v15  ;;  %v3262_v43 = vpop.permute.xlu0 %3261 }
 0x13d   : > { %v3263_v50 = vunpack.i.l.bf16 %v3262_v43  ;;  %v3264_v17 = vunpack.i.h.bf16 %v3262_v43 }
 0x13e   : > { %v1884_v8 = vsel %vm1869_vm10, %v1851_v34, %v3258_v23  ;;  %v1885_v62 = vsel %vm1869_vm10, %v1852_v7, %v3259_v35  ;;  %2815 = vmatprep.mubr.msk.bf16.mxu0 %vm1938_vm11, %v1908_v36 }
 0x13f   : > { %v1909_v28 = vpack.c.bf16 %v1885_v62, %v1884_v8  ;;  %v3267_v63 = vpop.permute.xlu1 %3266  ;;  %v1721_v49 = vsel %vm1704_vm5, %v1688_v46, %v3263_v50  ;;  %v1722_v60 = vsel %vm1704_vm5, %v1689_v5, %v3264_v17  ;;  %v4587_v46 = vld [vmem:[#allocation14_spill] sm:$0xff] }
 0x140   : > { %v3272_v1 = vpop.permute.xlu0 %3271  ;;  %v3269_v10 = vunpack.i.h.bf16 %v3267_v63  ;;  %v3268_v9 = vunpack.i.l.bf16 %v3267_v63  ;;  %v2994_v5 = vunpack.i.h.bf16 %v4587_v46 }
 0x141   : > { %2816 = vmatmul.mubr.msk.bf16.gmra.mrb[12].mxu0 %vm1938_vm11, %v1909_v28  ;;  %v3274_v26 = vunpack.i.h.bf16 %v3272_v1  ;;  %v3273_v4 = vunpack.i.l.bf16 %v3272_v1 }
 0x142   : > { %v1723_v33 = vsel %vm1704_vm5, %v1690_v44, %v3268_v9  ;;  %v1724_v56 = vsel %vm1704_vm5, %v1691_v59, %v3269_v10  ;;  %v2993_v59 = vunpack.i.l.bf16 %v4587_v46  ;;  %v4588_v44 = vld [vmem:[#allocation15_spill] sm:$0xff] }
 0x143   : > { %v3277_v55 = vpop.permute.xlu1 %3276  ;;  %v1754_v54 = vsel %vm1737_vm6, %v1721_v49, %v3273_v4  ;;  %v1755_v48 = vsel %vm1737_vm6, %v1722_v60, %v3274_v26  ;;  %v4586_v26 = vld [vmem:[#allocation7_spill] sm:$0xff]  ;;  %v2999_v49 = vunpack.i.h.bf16 %v4588_v44  ;;  %v3507_v60 = vld [vmem:[#allocation2 + $0xf8] sm:$0xff] }
 0x144   : > { %v3282_v32 = vpop.permute.xlu0 %3281  ;;  %v3278_v57 = vunpack.i.l.bf16 %v3277_v55  ;;  %v3279_v58 = vunpack.i.h.bf16 %v3277_v55  ;;  %v2919_v4 = vunpack.i.h.bf16 %v4586_v26  ;;  %v2918_v16 = vunpack.i.l.bf16 %v4586_v26 }
 0x145   : > { %v3284_v6 = vunpack.i.h.bf16 %v3282_v32  ;;  %v3283_v21 = vunpack.i.l.bf16 %v3282_v32 }
 0x146   : > { %v1756_v43 = vsel %vm1737_vm6, %v1723_v33, %v3278_v57  ;;  %v1757_v52 = vsel %vm1737_vm6, %v1724_v56, %v3279_v58 }
 0x147   : > { %v3287_v37 = vpop.permute.xlu1 %3286  ;;  %v1787_v15 = vsel %vm1770_vm7, %v1754_v54, %v3283_v21  ;;  %v1788_v27 = vsel %vm1770_vm7, %v1755_v48, %v3284_v6  ;;  %v2998_v6 = vunpack.i.l.bf16 %v4588_v44 }
 0x148   : > { %v3292_v40 = vpop.permute.xlu0 %3291  ;;  %v3288_v24 = vunpack.i.l.bf16 %v3287_v37  ;;  %v3289_v36 = vunpack.i.h.bf16 %v3287_v37 }
 0x149   : > { %v3294_v0 = vunpack.i.h.bf16 %v3292_v40  ;;  %v3293_v45 = vunpack.i.l.bf16 %v3292_v40  ;;  %v4585_v40 = vld [vmem:[#allocation6_spill] sm:$0xff] }
 0x14a   : > { %v1789_v31 = vsel %vm1770_vm7, %v1756_v43, %v3288_v24  ;;  %v1790_v30 = vsel %vm1770_vm7, %v1757_v52, %v3289_v36  ;;  %v2914_v10 = vunpack.i.h.bf16 %v4585_v40  ;;  %v2913_v9 = vunpack.i.l.bf16 %v4585_v40 }
 0x14b   : > { %v3297_v22 = vpop.permute.xlu1 %3296  ;;  %v1820_v34 = vsel %vm1803_vm8, %v1787_v15, %v3293_v45  ;;  %v1821_v7 = vsel %vm1803_vm8, %v1788_v27, %v3294_v0  ;;  %v3508_v0 = vld [vmem:[#allocation2 + $0xf0] sm:$0xff] }
 0x14c   : > { %v3302_v47 = vpop.permute.xlu0 %3301  ;;  %v3298_v35 = vunpack.i.l.bf16 %v3297_v22  ;;  %v3299_v8 = vunpack.i.h.bf16 %v3297_v22  ;;  %v1660_v57 = vsel %vm215_vm0, %v3507_v60, %v2914_v10  ;;  %v1659_v45 = vsel %vm215_vm0, %v3508_v0, %v2913_v9 }
 0x14d   : > { %v3304_v20 = vunpack.i.h.bf16 %v3302_v47  ;;  %v3303_v51 = vunpack.i.l.bf16 %v3302_v47  ;;  %v3509_v47 = vld [vmem:[#allocation2 + $0x110] sm:$0xff]  ;;  %v1692_v27 = vsel %vm1671_vm4, %v1659_v45, %v2993_v59  ;;  %v1693_v36 = vsel %vm1671_vm4, %v1660_v57, %v2994_v5 }
 0x14e   : > { %v1822_v32 = vsel %vm1803_vm8, %v1789_v31, %v3298_v35  ;;  %v1823_v19 = vsel %vm1803_vm8, %v1790_v30, %v3299_v8  ;;  %v1662_v33 = vsel %vm215_vm0, %v3509_v47, %v2919_v4 }
 0x14f   : > { %v3307_v23 = vpop.permute.xlu1 %3306  ;;  %v1853_v18 = vsel %vm1836_vm9, %v1820_v34, %v3303_v51  ;;  %v1854_v38 = vsel %vm1836_vm9, %v1821_v7, %v3304_v20  ;;  %v3510_v51 = vld [vmem:[#allocation2 + $0x108] sm:$0xff]  ;;  %v1695_v35 = vsel %vm1671_vm4, %v1662_v33, %v2999_v49 }
 0x150   : > { %v3312_v62 = vpop.permute.xlu0 %3311  ;;  %v3309_v28 = vunpack.i.h.bf16 %v3307_v23  ;;  %v3308_v63 = vunpack.i.l.bf16 %v3307_v23  ;;  %v1661_v15 = vsel %vm215_vm0, %v3510_v51, %v2918_v16 }
 0x151   : > { %v3314_v1 = vunpack.i.h.bf16 %v3312_v62  ;;  %v3313_v55 = vunpack.i.l.bf16 %v3312_v62  ;;  %v1694_v23 = vsel %vm1671_vm4, %v1661_v15, %v2998_v6 }
 0x152   : > { %v1855_v37 = vsel %vm1836_vm9, %v1822_v32, %v3308_v63  ;;  %v1856_v3 = vsel %vm1836_vm9, %v1823_v19, %v3309_v28 }
 0x153   : > { %v3317_v29 = vpop.permute.xlu1 %3316  ;;  %v1886_v25 = vsel %vm1869_vm10, %v1853_v18, %v3313_v55  ;;  %v1887_v42 = vsel %vm1869_vm10, %v1854_v38, %v3314_v1 }
 0x154   : > { %v3319_v53 = vunpack.i.h.bf16 %v3317_v29  ;;  %v3318_v2 = vunpack.i.l.bf16 %v3317_v29  ;;  %v3322_v12 = vpop.permute.xlu0 %3321  ;;  %v1910_v50 = vpack.c.bf16 %v1887_v42, %v1886_v25 }
 0x155   : > { %v3323_v21 = vunpack.i.l.bf16 %v3322_v12  ;;  %v3324_v56 = vunpack.i.h.bf16 %v3322_v12 }
 0x156   : > { %v1888_v41 = vsel %vm1869_vm10, %v1855_v37, %v3318_v2  ;;  %v1889_v39 = vsel %vm1869_vm10, %v1856_v3, %v3319_v53  ;;  %2819 = vmatprep.mubr.msk.bf16.mxu1 %vm1938_vm11, %v1910_v50 }
 0x157   : > { %v1911_v11 = vpack.c.bf16 %v1889_v39, %v1888_v41  ;;  %v3327_v13 = vpop.permute.xlu1 %3326  ;;  %v1725_v43 = vsel %vm1704_vm5, %v1692_v27, %v3323_v21  ;;  %v1726_v62 = vsel %vm1704_vm5, %v1693_v36, %v3324_v56  ;;  %v4591_v27 = vld [vmem:[#allocation16_spill] sm:$0xff] }
 0x158   : > { %v3332_v61 = vpop.permute.xlu0 %3331  ;;  %v3329_v48 = vunpack.i.h.bf16 %v3327_v13  ;;  %v3328_v58 = vunpack.i.l.bf16 %v3327_v13  ;;  %v3004_v36 = vunpack.i.h.bf16 %v4591_v27 }
 0x159   : > { %2820 = vmatmul.mubr.msk.bf16.vlgmr.msra.gmra.mrb[0].mxu1 %vm1938_vm11, %v1911_v11  ;;  %v3334_v24 = vunpack.i.h.bf16 %v3332_v61  ;;  %v3333_v20 = vunpack.i.l.bf16 %v3332_v61 }
 0x15a   : > { %v1727_v52 = vsel %vm1704_vm5, %v1694_v23, %v3328_v58  ;;  %v1728_v31 = vsel %vm1704_vm5, %v1695_v35, %v3329_v48  ;;  %v3003_v35 = vunpack.i.l.bf16 %v4591_v27  ;;  %v4592_v23 = vld [vmem:[#allocation17_spill] sm:$0xff] }
 0x15b   : > { %v4387_v17 = vpop.permute.xlu1 %3336  ;;  %v1758_v18 = vsel %vm1737_vm6, %v1725_v43, %v3333_v20  ;;  %v1759_v38 = vsel %vm1737_vm6, %v1726_v62, %v3334_v24  ;;  %v4590_v24 = vld [vmem:[#allocation9_spill] sm:$0xff]  ;;  %v3009_v43 = vunpack.i.h.bf16 %v4592_v23  ;;  %v3511_v62 = vld [vmem:[#allocation2 + $0x128] sm:$0xff] }
 0x15c   : > { %v3342_v14 = vpop.permute.xlu0 %3341  ;;  %v3338_v28 = vunpack.i.l.bf16 %v4387_v17  ;;  %v3339_v30 = vunpack.i.h.bf16 %v4387_v17  ;;  %v2929_v20 = vunpack.i.h.bf16 %v4590_v24  ;;  %v2928_v15 = vunpack.i.l.bf16 %v4590_v24 }
 0x15d   : > { %v3344_v34 = vunpack.i.h.bf16 %v3342_v14  ;;  %v3343_v7 = vunpack.i.l.bf16 %v3342_v14 }
 0x15e   : > { %v1760_v50 = vsel %vm1737_vm6, %v1727_v52, %v3338_v28  ;;  %v1761_v40 = vsel %vm1737_vm6, %v1728_v31, %v3339_v30 }
 0x15f   : > { %v3347_v22 = vpop.permute.xlu1 %3346  ;;  %v1791_v42 = vsel %vm1770_vm7, %v1758_v18, %v3343_v7  ;;  %v1792_v19 = vsel %vm1770_vm7, %v1759_v38, %v3344_v34  ;;  %v3008_v34 = vunpack.i.l.bf16 %v4592_v23 }
 0x160   : > { %v3352_v54 = vpop.permute.xlu0 %3351  ;;  %v3348_v32 = vunpack.i.l.bf16 %v3347_v22  ;;  %v3349_v53 = vunpack.i.h.bf16 %v3347_v22 }
 0x161   : > { %v3354_v63 = vunpack.i.h.bf16 %v3352_v54  ;;  %v3353_v1 = vunpack.i.l.bf16 %v3352_v54  ;;  %v4589_v54 = vld [vmem:[#allocation8_spill] sm:$0xff] }
 0x162   : > { %v1793_v10 = vsel %vm1770_vm7, %v1760_v50, %v3348_v32  ;;  %v1794_v4 = vsel %vm1770_vm7, %v1761_v40, %v3349_v53  ;;  %v2924_v48 = vunpack.i.h.bf16 %v4589_v54  ;;  %v2923_v58 = vunpack.i.l.bf16 %v4589_v54 }
 0x163   : > { %v3357_v8 = vpop.permute.xlu1 %3356  ;;  %v1824_v37 = vsel %vm1803_vm8, %v1791_v42, %v3353_v1  ;;  %v1825_v3 = vsel %vm1803_vm8, %v1792_v19, %v3354_v63  ;;  %v3512_v63 = vld [vmem:[#allocation2 + $0x120] sm:$0xff] }
 0x164   : > { %v3362_v55 = vpop.permute.xlu0 %3361  ;;  %v3358_v2 = vunpack.i.l.bf16 %v3357_v8  ;;  %v3359_v41 = vunpack.i.h.bf16 %v3357_v8  ;;  %v1664_v28 = vsel %vm215_vm0, %v3511_v62, %v2924_v48  ;;  %v1663_v1 = vsel %vm215_vm0, %v3512_v63, %v2923_v58 }
 0x165   : > { %v3364_v29 = vunpack.i.h.bf16 %v3362_v55  ;;  %v3363_v25 = vunpack.i.l.bf16 %v3362_v55  ;;  %v3513_v55 = vld [vmem:[#allocation2 + $0x140] sm:$0xff]  ;;  %v1696_v19 = vsel %vm1671_vm4, %v1663_v1, %v3003_v35  ;;  %v1697_v53 = vsel %vm1671_vm4, %v1664_v28, %v3004_v36 }
 0x166   : > { %v1826_v14 = vsel %vm1803_vm8, %v1793_v10, %v3358_v2  ;;  %v1827_v59 = vsel %vm1803_vm8, %v1794_v4, %v3359_v41  ;;  %v1666_v52 = vsel %vm215_vm0, %v3513_v55, %v2929_v20 }
 0x167   : > { %v3367_v12 = vpop.permute.xlu1 %3366  ;;  %v1857_v9 = vsel %vm1836_vm9, %v1824_v37, %v3363_v25  ;;  %v1858_v26 = vsel %vm1836_vm9, %v1825_v3, %v3364_v29  ;;  %v3514_v25 = vld [vmem:[#allocation2 + $0x138] sm:$0xff]  ;;  %v1699_v2 = vsel %vm1671_vm4, %v1666_v52, %v3009_v43 }
 0x168   : > { %v3372_v39 = vpop.permute.xlu0 %3371  ;;  %v3369_v11 = vunpack.i.h.bf16 %v3367_v12  ;;  %v3368_v13 = vunpack.i.l.bf16 %v3367_v12  ;;  %v1665_v42 = vsel %vm215_vm0, %v3514_v25, %v2928_v15 }
 0x169   : > { %v3374_v61 = vunpack.i.h.bf16 %v3372_v39  ;;  %v3373_v17 = vunpack.i.l.bf16 %v3372_v39  ;;  %v1698_v12 = vsel %vm1671_vm4, %v1665_v42, %v3008_v34 }
 0x16a   : > { %v1859_v22 = vsel %vm1836_vm9, %v1826_v14, %v3368_v13  ;;  %v1860_v60 = vsel %vm1836_vm9, %v1827_v59, %v3369_v11 }
 0x16b   : > { %v1890_v16 = vsel %vm1869_vm10, %v1857_v9, %v3373_v17  ;;  %v1891_v46 = vsel %vm1869_vm10, %v1858_v26, %v3374_v61  ;;  %v3377_v5 = vpop.permute.xlu1 %3376 }
 0x16c   : > { %v1912_v44 = vpack.c.bf16 %v1891_v46, %v1890_v16  ;;  %v3379_v49 = vunpack.i.h.bf16 %v3377_v5  ;;  %v3378_v6 = vunpack.i.l.bf16 %v3377_v5  ;;  %v3382_v21 = vpop.permute.xlu0 %3381 }
 0x16d   : > { %v3383_v7 = vunpack.i.l.bf16 %v3382_v21  ;;  %v3384_v31 = vunpack.i.h.bf16 %v3382_v21 }
 0x16e   : > { %v1892_v57 = vsel %vm1869_vm10, %v1859_v22, %v3378_v6  ;;  %v1893_v0 = vsel %vm1869_vm10, %v1860_v60, %v3379_v49  ;;  %2823 = vmatprep.mubr.msk.bf16.mxu1 %vm1938_vm11, %v1912_v44 }
 0x16f   : > { %v1913_v45 = vpack.c.bf16 %v1893_v0, %v1892_v57  ;;  %v3387_v47 = vpop.permute.xlu1 %3386  ;;  %v1729_v50 = vsel %vm1704_vm5, %v1696_v19, %v3383_v7  ;;  %v1730_v39 = vsel %vm1704_vm5, %v1697_v53, %v3384_v31 }
 0x170   : > { %v3392_v33 = vpop.permute.xlu0 %3391  ;;  %v3389_v38 = vunpack.i.h.bf16 %v3387_v47  ;;  %v3388_v30 = vunpack.i.l.bf16 %v3387_v47 }
 0x171   : > { %2824 = vmatmul.mubr.msk.bf16.gmra.mrb[4].mxu1 %vm1938_vm11, %v1913_v45  ;;  %v3394_v32 = vunpack.i.h.bf16 %v3392_v33  ;;  %v3393_v29 = vunpack.i.l.bf16 %v3392_v33 }
 0x172   : > { %v1731_v40 = vsel %vm1704_vm5, %v1698_v12, %v3388_v30  ;;  %v1732_v10 = vsel %vm1704_vm5, %v1699_v2, %v3389_v38  ;;  %v4593_v2 = vld [vmem:[#allocation18_spill] sm:$0xff] }
 0x173   : > { %v4433_v56 = vpop.permute.xlu1 %3396  ;;  %v1762_v9 = vsel %vm1737_vm6, %v1729_v50, %v3393_v29  ;;  %v1763_v26 = vsel %vm1737_vm6, %v1730_v39, %v3394_v32 }
 0x174   : > { %v3402_v51 = vpop.permute.xlu0 %3401  ;;  %v3398_v11 = vunpack.i.l.bf16 %v4433_v56  ;;  %v3399_v4 = vunpack.i.h.bf16 %v4433_v56 }
 0x175   : > { %v3404_v37 = vunpack.i.h.bf16 %v3402_v51  ;;  %v3403_v3 = vunpack.i.l.bf16 %v3402_v51 }
 0x176   : > { %v1764_v21 = vsel %vm1737_vm6, %v1731_v40, %v3398_v11  ;;  %v1765_v54 = vsel %vm1737_vm6, %v1732_v10, %v3399_v4  ;;  %v4595_v40 = vld [vmem:[#allocation21_spill] sm:$0xff] }
 0x177   : > { %v3407_v8 = vpop.permute.xlu1 %3406  ;;  %v1795_v5 = vsel %vm1770_vm7, %v1762_v9, %v3403_v3  ;;  %v1796_v59 = vsel %vm1770_vm7, %v1763_v26, %v3404_v37  ;;  %v4596_v9 = vld [vmem:[#allocation20_spill] sm:$0xff] }
 0x178   : > { %v3412_v18 = vpop.permute.xlu0 %3411  ;;  %v3408_v14 = vunpack.i.l.bf16 %v3407_v8  ;;  %v3409_v44 = vunpack.i.h.bf16 %v3407_v8 }
 0x179   : > { %v3414_v13 = vunpack.i.h.bf16 %v3412_v18  ;;  %v3413_v61 = vunpack.i.l.bf16 %v3412_v18 }
 0x17a   : > { %v1797_v48 = vsel %vm1770_vm7, %v1764_v21, %v3408_v14  ;;  %v1798_v20 = vsel %vm1770_vm7, %v1765_v54, %v3409_v44 }
 0x17b   : > { %v3417_v41 = vpop.permute.xlu1 %3416  ;;  %v1828_v22 = vsel %vm1803_vm8, %v1795_v5, %v3413_v61  ;;  %v1829_v60 = vsel %vm1803_vm8, %v1796_v59, %v3414_v13 }
 0x17c   : > { %v3422_v17 = vpop.permute.xlu0 %3421  ;;  %v3418_v49 = vunpack.i.l.bf16 %v3417_v41  ;;  %v3419_v57 = vunpack.i.h.bf16 %v3417_v41  ;;  %v4594_v41 = vld [vmem:[#allocation19_spill] sm:$0xff] }
 0x17d   : > { %v3424_v16 = vunpack.i.h.bf16 %v3422_v17  ;;  %v3423_v46 = vunpack.i.l.bf16 %v3422_v17 }
 0x17e   : > { %v1830_v51 = vsel %vm1803_vm8, %v1797_v48, %v3418_v49  ;;  %v1831_v35 = vsel %vm1803_vm8, %v1798_v20, %v3419_v57 }
 0x17f   : > { %v3427_v6 = vpop.permute.xlu1 %3426  ;;  %v1861_v58 = vsel %vm1836_vm9, %v1828_v22, %v3423_v46  ;;  %v1862_v24 = vsel %vm1836_vm9, %v1829_v60, %v3424_v16 }
 0x180   : > { %v3432_v0 = vpop.permute.xlu0 %3431  ;;  %v3429_v45 = vunpack.i.h.bf16 %v3427_v6  ;;  %v3428_v47 = vunpack.i.l.bf16 %v3427_v6 }
 0x181   : > { %v3434_v33 = vunpack.i.h.bf16 %v3432_v0  ;;  %v3433_v56 = vunpack.i.l.bf16 %v3432_v0 }
 0x182   : > { %v1863_v8 = vsel %vm1836_vm9, %v1830_v51, %v3428_v47  ;;  %v1864_v62 = vsel %vm1836_vm9, %v1831_v35, %v3429_v45 }
 0x183   : > { %v1894_v15 = vsel %vm1869_vm10, %v1861_v58, %v3433_v56  ;;  %v1895_v27 = vsel %vm1869_vm10, %v1862_v24, %v3434_v33  ;;  %v3437_v36 = vpop.permute.xlu1 %3436 }
 0x184   : > { %v1914_v23 = vpack.c.bf16 %v1895_v27, %v1894_v15  ;;  %v3439_v43 = vunpack.i.h.bf16 %v3437_v36  ;;  %v3438_v34 = vunpack.i.l.bf16 %v3437_v36  ;;  %v3442_v7 = vpop.permute.xlu0 %3441 }
 0x185   : > { %v3443_v38 = vunpack.i.l.bf16 %v3442_v7  ;;  %v3444_v32 = vunpack.i.h.bf16 %v3442_v7 }
 0x186   : > { %v1896_v28 = vsel %vm1869_vm10, %v1863_v8, %v3438_v34  ;;  %v1897_v63 = vsel %vm1869_vm10, %v1864_v62, %v3439_v43  ;;  %2827 = vmatprep.mubr.msk.bf16.mxu1 %vm1938_vm11, %v1914_v23 }
 0x187   : > { %v1915_v1 = vpack.c.bf16 %v1897_v63, %v1896_v28  ;;  %v3447_v55 = vpop.permute.xlu1 %3446  ;;  %v1733_v12 = vsel %vm1704_vm5, %v4593_v2, %v3443_v38  ;;  %v1734_v39 = vsel %vm1704_vm5, %v4594_v41, %v3444_v32 }
 0x188   : > { %v3452_v52 = vpop.permute.xlu0 %3451  ;;  %v3449_v25 = vunpack.i.h.bf16 %v3447_v55  ;;  %v3448_v42 = vunpack.i.l.bf16 %v3447_v55 }
 0x189   : > { %2828 = vmatmul.mubr.msk.bf16.gmra.mrb[8].mxu1 %vm1938_vm11, %v1915_v1  ;;  %v3454_v19 = vunpack.i.h.bf16 %v3452_v52  ;;  %v3453_v53 = vunpack.i.l.bf16 %v3452_v52 }
 0x18a   : > { %v1735_v10 = vsel %vm1704_vm5, %v4595_v40, %v3448_v42  ;;  %v1736_v26 = vsel %vm1704_vm5, %v4596_v9, %v3449_v25 }
 0x18b   : > { %v3457_v31 = vpop.permute.xlu1 %3456  ;;  %v1766_v4 = vsel %vm1737_vm6, %v1733_v12, %v3453_v53  ;;  %v1767_v14 = vsel %vm1737_vm6, %v1734_v39, %v3454_v19 }
 0x18c   : > { %v3462_v18 = vpop.permute.xlu0 %3461  ;;  %v3458_v11 = vunpack.i.l.bf16 %v3457_v31  ;;  %v3459_v16 = vunpack.i.h.bf16 %v3457_v31 }
 0x18d   : > { %v3464_v50 = vunpack.i.h.bf16 %v3462_v18  ;;  %v3463_v37 = vunpack.i.l.bf16 %v3462_v18 }
 0x18e   : > { %v1768_v60 = vsel %vm1737_vm6, %v1735_v10, %v3458_v11  ;;  %v1769_v58 = vsel %vm1737_vm6, %v1736_v26, %v3459_v16 }
 0x18f   : > { %v3467_v30 = vpop.permute.xlu1 %3466  ;;  %v1799_v44 = vsel %vm1770_vm7, %v1766_v4, %v3463_v37  ;;  %v1800_v49 = vsel %vm1770_vm7, %v1767_v14, %v3464_v50 }
 0x190   : > { %v3472_v29 = vpop.permute.xlu0 %3471  ;;  %v3468_v46 = vunpack.i.l.bf16 %v3467_v30  ;;  %v3469_v6 = vunpack.i.h.bf16 %v3467_v30 }
 0x191   : > { %v3474_v13 = vunpack.i.h.bf16 %v3472_v29  ;;  %v3473_v61 = vunpack.i.l.bf16 %v3472_v29 }
 0x192   : > { %v1801_v24 = vsel %vm1770_vm7, %v1768_v60, %v3468_v46  ;;  %v1802_v15 = vsel %vm1770_vm7, %v1769_v58, %v3469_v6 }
 0x193   : > { %v3477_v3 = vpop.permute.xlu1 %3476  ;;  %v1832_v57 = vsel %vm1803_vm8, %v1799_v44, %v3473_v61  ;;  %v1833_v0 = vsel %vm1803_vm8, %v1800_v49, %v3474_v13 }
 0x194   : > { %v3482_v17 = vpop.permute.xlu0 %3481  ;;  %v3478_v21 = vunpack.i.l.bf16 %v3477_v3  ;;  %v3479_v45 = vunpack.i.h.bf16 %v3477_v3 }
 0x195   : > { %v3484_v5 = vunpack.i.h.bf16 %v3482_v17  ;;  %v3483_v59 = vunpack.i.l.bf16 %v3482_v17 }
 0x196   : > { %v1834_v27 = vsel %vm1803_vm8, %v1801_v24, %v3478_v21  ;;  %v1835_v43 = vsel %vm1803_vm8, %v1802_v15, %v3479_v45 }
 0x197   : > { %v3487_v22 = vpop.permute.xlu1 %3486  ;;  %v1865_v20 = vsel %vm1836_vm9, %v1832_v57, %v3483_v59  ;;  %v1866_v51 = vsel %vm1836_vm9, %v1833_v0, %v3484_v5 }
 0x198   : > { %v3492_v47 = vpop.permute.xlu0 %3491  ;;  %v3489_v33 = vunpack.i.h.bf16 %v3487_v22  ;;  %v3488_v56 = vunpack.i.l.bf16 %v3487_v22 }
 0x199   : > { %v3494_v54 = vunpack.i.h.bf16 %v3492_v47  ;;  %v3493_v48 = vunpack.i.l.bf16 %v3492_v47 }
 0x19a   : > { %v1867_v62 = vsel %vm1836_vm9, %v1834_v27, %v3488_v56  ;;  %v1868_v28 = vsel %vm1836_vm9, %v1835_v43, %v3489_v33 }
 0x19b   : > { %v1898_v36 = vsel %vm1869_vm10, %v1865_v20, %v3493_v48  ;;  %v1899_v35 = vsel %vm1869_vm10, %v1866_v51, %v3494_v54  ;;  %v3497_v23 = vpop.permute.xlu1 %3496 }
 0x19c   : > { %v1916_v34 = vpack.c.bf16 %v1899_v35, %v1898_v36  ;;  %v3499_v7 = vunpack.i.h.bf16 %v3497_v23  ;;  %v3498_v8 = vunpack.i.l.bf16 %v3497_v23 }
 0x19e   : > { %v1900_v63 = vsel %vm1869_vm10, %v1867_v62, %v3498_v8  ;;  %v1901_v1 = vsel %vm1869_vm10, %v1868_v28, %v3499_v7  ;;  %2831 = vmatprep.mubr.msk.bf16.mxu1 %vm1938_vm11, %v1916_v34 }
 0x19f   : > { %v1917_v55 = vpack.c.bf16 %v1901_v1, %v1900_v63 }
 0x1a1   : > { %2832 = vmatmul.mubr.msk.bf16.gmra.mrb[12].mxu1 %vm1938_vm11, %v1917_v55 }
 0x1d5   : > { %v2805_v52 = vpop.f32.mrb[0].mxu0 }
 0x1d6   : > { %v2025_v31 = vpop.f32.mrb[1].mxu0  ;;  %v2351_v19 = vmul.f32 %v2805_v52, %v2805_v52 }
 0x1d7   : > { %v2806_v18 = vpop.f32.mrb[2].mxu0  ;;  %v2349_v32 = vmul.f32 %v2025_v31, %v2025_v31 }
 0x1d8   : > { %v2676_v38 = vpack.c.bf16 %v2806_v18, %v2805_v52  ;;  %v2028_v30 = vpop.f32.mrb[3].mxu0  ;;  %v2352_v12 = vmul.f32 %v2806_v18, %v2806_v18 }
 0x1d9   : > { %v2671_v29 = vpack.c.bf16 %v2028_v30, %v2025_v31  ;;  %v2312_v25 = vadd.f32 %v2028_v30, %v2025_v31  ;;  %v2350_v42 = vmul.f32 %v2028_v30, %v2028_v30 }
 0x1da   : > { %2763 = vst [vmem:[%s4514_s8 + $0x8] sm:$0xff] %v2676_v38  }
 0x1db   : > { %2672 = vst [vmem:[%s4514_s8] sm:$0xff] %v2671_v29   ;;  %v2313_v53 = vadd.f32 %v2805_v52, %v2312_v25  ;;  %v2381_v2 = vadd.f32 %v2350_v42, %v2349_v32 }
 0x1dd   : > { %v2382_v50 = vadd.f32 %v2381_v2, %v2351_v19  ;;  %v2314_v37 = vadd.f32 %v2806_v18, %v2313_v53 }
 0x1df   : > { %v2383_v3 = vadd.f32 %v2382_v50, %v2352_v12 }
 0x1e9   : > { %v2809_v41 = vpop.f32.mrb[4].mxu0 }
 0x1ea   : > { %v2041_v39 = vpop.f32.mrb[5].mxu0  ;;  %v2355_v14 = vmul.f32 %v2809_v41, %v2809_v41 }
 0x1eb   : > { %v2315_v11 = vadd.f32 %v2314_v37, %v2041_v39  ;;  %v2353_v13 = vmul.f32 %v2041_v39, %v2041_v39  ;;  %v2810_v61 = vpop.f32.mrb[6].mxu0 }
 0x1ec   : > { %v2686_v17 = vpack.c.bf16 %v2810_v61, %v2809_v41  ;;  %v2044_v40 = vpop.f32.mrb[7].mxu0  ;;  %v2356_v5 = vmul.f32 %v2810_v61, %v2810_v61 }
 0x1ed   : > { %v2384_v10 = vadd.f32 %v2383_v3, %v2353_v13  ;;  %v2681_v9 = vpack.c.bf16 %v2044_v40, %v2041_v39  ;;  %v2316_v26 = vadd.f32 %v2315_v11, %v2044_v40  ;;  %v2354_v4 = vmul.f32 %v2044_v40, %v2044_v40 }
 0x1ee   : > { %2765 = vst [vmem:[%s4514_s8 + $0x18] sm:$0xff] %v2686_v17  }
 0x1ef   : > { %2764 = vst [vmem:[%s4514_s8 + $0x10] sm:$0xff] %v2681_v9   ;;  %v2317_v16 = vadd.f32 %v2809_v41, %v2316_v26  ;;  %v2385_v46 = vadd.f32 %v2384_v10, %v2354_v4 }
 0x1f1   : > { %v2386_v59 = vadd.f32 %v2385_v46, %v2355_v14  ;;  %v2318_v44 = vadd.f32 %v2810_v61, %v2317_v16 }
 0x1f3   : > { %v2387_v49 = vadd.f32 %v2386_v59, %v2356_v5 }
 0x1fd   : > { %v2813_v6 = vpop.f32.mrb[8].mxu0 }
 0x1fe   : > { %v2057_v21 = vpop.f32.mrb[9].mxu0  ;;  %v2359_v48 = vmul.f32 %v2813_v6, %v2813_v6 }
 0x1ff   : > { %v2319_v22 = vadd.f32 %v2318_v44, %v2057_v21  ;;  %v2357_v60 = vmul.f32 %v2057_v21, %v2057_v21  ;;  %v2814_v57 = vpop.f32.mrb[10].mxu0 }
 0x200   : > { %v2696_v0 = vpack.c.bf16 %v2814_v57, %v2813_v6  ;;  %v2060_v45 = vpop.f32.mrb[11].mxu0  ;;  %v2360_v20 = vmul.f32 %v2814_v57, %v2814_v57 }
 0x201   : > { %v2388_v47 = vadd.f32 %v2387_v49, %v2357_v60  ;;  %v2691_v33 = vpack.c.bf16 %v2060_v45, %v2057_v21  ;;  %v2320_v56 = vadd.f32 %v2319_v22, %v2060_v45  ;;  %v2358_v54 = vmul.f32 %v2060_v45, %v2060_v45 }
 0x202   : > { %2767 = vst [vmem:[%s4514_s8 + $0x28] sm:$0xff] %v2696_v0  }
 0x203   : > { %2766 = vst [vmem:[%s4514_s8 + $0x20] sm:$0xff] %v2691_v33   ;;  %v2321_v58 = vadd.f32 %v2813_v6, %v2320_v56  ;;  %v2389_v24 = vadd.f32 %v2388_v47, %v2358_v54 }
 0x205   : > { %v2390_v51 = vadd.f32 %v2389_v24, %v2359_v48  ;;  %v2322_v15 = vadd.f32 %v2814_v57, %v2321_v58 }
 0x207   : > { %v2391_v27 = vadd.f32 %v2390_v51, %v2360_v20 }
 0x214   : > { %v2817_v36 = vpop.f32.mrb[12].mxu0 }
 0x215   : > { %v2073_v35 = vpop.f32.mrb[13].mxu0  ;;  %v2363_v55 = vmul.f32 %v2817_v36, %v2817_v36 }
 0x216   : > { %v2323_v23 = vadd.f32 %v2322_v15, %v2073_v35  ;;  %v2361_v43 = vmul.f32 %v2073_v35, %v2073_v35  ;;  %v2818_v34 = vpop.f32.mrb[14].mxu0 }
 0x217   : > { %v2706_v7 = vpack.c.bf16 %v2818_v34, %v2817_v36  ;;  %v2076_v8 = vpop.f32.mrb[15].mxu0  ;;  %v2364_v18 = vmul.f32 %v2818_v34, %v2818_v34 }
 0x218   : > { %v2392_v62 = vadd.f32 %v2391_v27, %v2361_v43  ;;  %v2701_v28 = vpack.c.bf16 %v2076_v8, %v2073_v35  ;;  %v2324_v63 = vadd.f32 %v2323_v23, %v2076_v8  ;;  %v2362_v1 = vmul.f32 %v2076_v8, %v2076_v8 }
 0x219   : > { %2769 = vst [vmem:[%s4514_s8 + $0x38] sm:$0xff] %v2706_v7  }
 0x21a   : > { %2768 = vst [vmem:[%s4514_s8 + $0x30] sm:$0xff] %v2701_v28   ;;  %v2325_v52 = vadd.f32 %v2817_v36, %v2324_v63  ;;  %v2393_v31 = vadd.f32 %v2392_v62, %v2362_v1 }
 0x21c   : > { %v2394_v38 = vadd.f32 %v2393_v31, %v2363_v55  ;;  %v2326_v30 = vadd.f32 %v2818_v34, %v2325_v52 }
 0x21e   : > { %v2395_v32 = vadd.f32 %v2394_v38, %v2364_v18 }
 0x22c   : > { %v2821_v29 = vpop.f32.mrb[0].mxu1 }
 0x22d   : > { %v2089_v25 = vpop.f32.mrb[1].mxu1  ;;  %v2367_v39 = vmul.f32 %v2821_v29, %v2821_v29 }
 0x22e   : > { %v2327_v42 = vadd.f32 %v2326_v30, %v2089_v25  ;;  %v2365_v19 = vmul.f32 %v2089_v25, %v2089_v25  ;;  %v2822_v53 = vpop.f32.mrb[2].mxu1 }
 0x22f   : > { %v2716_v2 = vpack.c.bf16 %v2822_v53, %v2821_v29  ;;  %v2092_v12 = vpop.f32.mrb[3].mxu1  ;;  %v2368_v61 = vmul.f32 %v2822_v53, %v2822_v53 }
 0x230   : > { %v2396_v50 = vadd.f32 %v2395_v32, %v2365_v19  ;;  %v2711_v37 = vpack.c.bf16 %v2092_v12, %v2089_v25  ;;  %v2328_v3 = vadd.f32 %v2327_v42, %v2092_v12  ;;  %v2366_v41 = vmul.f32 %v2092_v12, %v2092_v12 }
 0x231   : > { %2771 = vst [vmem:[%s4514_s8 + $0x48] sm:$0xff] %v2716_v2  }
 0x232   : > { %2770 = vst [vmem:[%s4514_s8 + $0x40] sm:$0xff] %v2711_v37   ;;  %v2329_v11 = vadd.f32 %v2821_v29, %v2328_v3  ;;  %v2397_v13 = vadd.f32 %v2396_v50, %v2366_v41 }
 0x234   : > { %v2398_v17 = vadd.f32 %v2397_v13, %v2367_v39  ;;  %v2330_v40 = vadd.f32 %v2822_v53, %v2329_v11 }
 0x236   : > { %v2399_v10 = vadd.f32 %v2398_v17, %v2368_v61 }
 0x244   : > { %v2825_v9 = vpop.f32.mrb[4].mxu1 }
 0x245   : > { %v2105_v26 = vpop.f32.mrb[5].mxu1  ;;  %v2371_v21 = vmul.f32 %v2825_v9, %v2825_v9 }
 0x246   : > { %v2331_v4 = vadd.f32 %v2330_v40, %v2105_v26  ;;  %v2369_v14 = vmul.f32 %v2105_v26, %v2105_v26  ;;  %v2826_v16 = vpop.f32.mrb[6].mxu1 }
 0x247   : > { %v2726_v46 = vpack.c.bf16 %v2826_v16, %v2825_v9  ;;  %v2108_v5 = vpop.f32.mrb[7].mxu1  ;;  %v2372_v57 = vmul.f32 %v2826_v16, %v2826_v16 }
 0x248   : > { %v2400_v59 = vadd.f32 %v2399_v10, %v2369_v14  ;;  %v2721_v44 = vpack.c.bf16 %v2108_v5, %v2105_v26  ;;  %v2332_v49 = vadd.f32 %v2331_v4, %v2108_v5  ;;  %v2370_v6 = vmul.f32 %v2108_v5, %v2108_v5 }
 0x249   : > { %2773 = vst [vmem:[%s4514_s8 + $0x58] sm:$0xff] %v2726_v46  }
 0x24a   : > { %2772 = vst [vmem:[%s4514_s8 + $0x50] sm:$0xff] %v2721_v44   ;;  %v2333_v22 = vadd.f32 %v2825_v9, %v2332_v49  ;;  %v2401_v60 = vadd.f32 %v2400_v59, %v2370_v6 }
 0x24c   : > { %v2402_v0 = vadd.f32 %v2401_v60, %v2371_v21  ;;  %v2334_v45 = vadd.f32 %v2826_v16, %v2333_v22 }
 0x24e   : > { %v2403_v47 = vadd.f32 %v2402_v0, %v2372_v57 }
 0x25c   : > { %v2829_v33 = vpop.f32.mrb[8].mxu1 }
 0x25d   : > { %v2121_v56 = vpop.f32.mrb[9].mxu1  ;;  %v2375_v35 = vmul.f32 %v2829_v33, %v2829_v33 }
 0x25e   : > { %v2335_v54 = vadd.f32 %v2334_v45, %v2121_v56  ;;  %v2373_v48 = vmul.f32 %v2121_v56, %v2121_v56  ;;  %v2830_v58 = vpop.f32.mrb[10].mxu1 }
 0x25f   : > { %v2736_v24 = vpack.c.bf16 %v2830_v58, %v2829_v33  ;;  %v2124_v20 = vpop.f32.mrb[11].mxu1  ;;  %v2376_v34 = vmul.f32 %v2830_v58, %v2830_v58 }
 0x260   : > { %v2404_v51 = vadd.f32 %v2403_v47, %v2373_v48  ;;  %v2731_v15 = vpack.c.bf16 %v2124_v20, %v2121_v56  ;;  %v2336_v27 = vadd.f32 %v2335_v54, %v2124_v20  ;;  %v2374_v36 = vmul.f32 %v2124_v20, %v2124_v20 }
 0x261   : > { %2775 = vst [vmem:[%s4514_s8 + $0x68] sm:$0xff] %v2736_v24  }
 0x262   : > { %2774 = vst [vmem:[%s4514_s8 + $0x60] sm:$0xff] %v2731_v15   ;;  %v2337_v23 = vadd.f32 %v2829_v33, %v2336_v27  ;;  %v2405_v43 = vadd.f32 %v2404_v51, %v2374_v36 }
 0x264   : > { %v2406_v7 = vadd.f32 %v2405_v43, %v2375_v35  ;;  %v2338_v8 = vadd.f32 %v2830_v58, %v2337_v23 }
 0x266   : > { %v2407_v62 = vadd.f32 %v2406_v7, %v2376_v34 }
 0x274   : > { %v2833_v28 = vpop.f32.mrb[12].mxu1 }
 0x275   : > { %v2137_v63 = vpop.f32.mrb[13].mxu1  ;;  %v2379_v25 = vmul.f32 %v2833_v28, %v2833_v28 }
 0x276   : > { %v2339_v1 = vadd.f32 %v2338_v8, %v2137_v63  ;;  %v2377_v55 = vmul.f32 %v2137_v63, %v2137_v63  ;;  %v2834_v52 = vpop.f32.mrb[14].mxu1 }
 0x277   : > { %v2746_v31 = vpack.c.bf16 %v2834_v52, %v2833_v28  ;;  %v2140_v18 = vpop.f32.mrb[15].mxu1  ;;  %v2380_v53 = vmul.f32 %v2834_v52, %v2834_v52 }
 0x278   : > { %v2408_v38 = vadd.f32 %v2407_v62, %v2377_v55  ;;  %v2741_v30 = vpack.c.bf16 %v2140_v18, %v2137_v63  ;;  %v2340_v32 = vadd.f32 %v2339_v1, %v2140_v18  ;;  %v2378_v29 = vmul.f32 %v2140_v18, %v2140_v18 }
 0x279   : > { %2777 = vst [vmem:[%s4514_s8 + $0x78] sm:$0xff] %v2746_v31  }
 0x27a   : > { %2776 = vst [vmem:[%s4514_s8 + $0x70] sm:$0xff] %v2741_v30   ;;  %v2341_v42 = vadd.f32 %v2833_v28, %v2340_v32  ;;  %v2409_v19 = vadd.f32 %v2408_v38, %v2378_v29 }
 0x27c   : > { %v2342_v2 = vadd.f32 %v2834_v52, %v2341_v42  ;;  %v2410_v12 = vadd.f32 %v2409_v19, %v2379_v25 }
 0x27e   : > { %v2343_v50 = vrot.slane %v2342_v2, 4  ;;  %v2411_v37 = vadd.f32 %v2410_v12, %v2380_v53 }
 0x280   : > { %v2344_v3 = vadd.f32 %v2343_v50, %v2342_v2  ;;  %v2412_v41 = vrot.slane %v2411_v37, 4 }
 0x282   : > { %v2345_v39 = vrot.slane %v2344_v3, 2  ;;  %v2413_v11 = vadd.f32 %v2412_v41, %v2411_v37 }
 0x284   : > { %v2346_v13 = vadd.f32 %v2345_v39, %v2344_v3  ;;  %v2414_v61 = vrot.slane %v2413_v11, 2 }
 0x286   : > { %v2347_v17 = vrot.slane %v2346_v13, 1  ;;  %v2415_v40 = vadd.f32 %v2414_v61, %v2413_v11 }
 0x288   : > { %v2416_v10 = vrot.slane %v2415_v40, 1  ;;  %v2348_v9 = vadd.f32 %v2347_v17, %v2346_v13 }
 0x28a   : > { %v2417_v26 = vadd.f32 %v2416_v10, %v2415_v40 }
 0x28c   : > { %v2419_v4 = vsel %vm2418_vm12, %v2348_v9, %v2417_v26 }
 0x28d   : > { %2420 = vst [vmem:[%s181_s14] sm:$0x3] %v2419_v4 }
 0x28e PF: > { %s14_s12 = sadd.s32 1, %s3521_s12  }
 0x28f   : > { %p11_p4 = scmp.ge.s32.totalorder %s14_s12, 4  }
 0x291   :  { %13 = sbr.rel (!%p11_p4) target bundleno = 1 (0x1), region = 73 }

// kernel: double_conv.4
= control target key start
LH: loop header
LB: loop body
LE: loop exit
PB: predicated region body
PF: predicated region fallthrough
CT: control target
= control target key end

     0   :  { %s3761_s18 = smov 0   ;;  %s4832_s0 = inlined_call_operand.vmem [shape: bf16[2,16,16,128], index: 0, kind: input, shape index: {}]   ;;  %s4833_s1 = inlined_call_operand.vmem [shape: f32[1,128], index: 1, kind: input, shape index: {}]   ;;  %s4834_s2 = inlined_call_operand.vmem [shape: f32[1,128], index: 2, kind: input, shape index: {}]   ;;  %s4835_s3 = inlined_call_operand.vmem [shape: bf16[72,128], index: 3, kind: input, shape index: {}]   ;;  %s4836_s4 = inlined_call_operand.vmem [shape: bf16[2,16,16,128], index: 4, kind: output, shape index: {0}]   ;;  %s4837_s5 = inlined_call_operand.vmem [shape: f32[2,2,128], index: 5, kind: output, shape index: {1}]  }
   0x1 LB: > { %s2687_s19 = sadd.s32 4294967295, %s3720_s18   ;;  %p2691_p0 = scmp.ge.s32.totalorder %s3720_s18, 1  ;;  %s3720_s18 = sphi %s3761_s18, %s16_s18  }
   0x2   : > { %p190_p1 = scmp.lt.s32.totalorder %s3720_s18, 3 }
   0x4   : > { %p191_p2 = pnand %p2691_p0, %p190_p1 }
   0x6   : > { %194 = sbr.rel (%p191_p2) target bundleno = 654 (0x28e), region = 36 }
   0xd   : > { %vm411_vm0 = vcmask 64512   ;;  %vm414_vm1 = vcmask 58368   ;;  %vm420_vm2 = vcmask 57344   ;;  %p3771_p3 = scmp.lt.s32.totalorder %s2687_s19, 1  ;;  %v3722_v0 = vmov 0.0   ;;  %s3723_s29 = smov 8  }
   0xe   : > { %412 = vst.msk [vmem:[#allocation2] sm:$0xff] %vm411_vm0, %v3722_v0  ;;  %413 = vst.msk [vmem:[#allocation2 + $0x8] sm:$0xff] %vm411_vm0, %v3722_v0  ;;  %v3832_v1 = vld [vmem:[%s4833_s1] ss:$0 sm:$0xff]  ;;  %s3724_s30 = smov 16   ;;  %s3725_s6 = smov 24  }
   0xf   : > { %415 = vst.msk [vmem:[#allocation2 + $0x10] sm:$0x3] %vm414_vm1, %v3722_v0  ;;  %419 = vst.msk [vmem:[#allocation2 + $0x1a8] sm:$0x3] %vm414_vm1, %v3722_v0  ;;  %s4884_s19 = smov (!%p3771_p3, %s2687_s19), 1  ;;  %s3726_s13 = smov 32  }
  0x10   : > { %417 = vst.msk [vmem:[#allocation2 + $0x198] sm:$0xff] %vm411_vm0, %v3722_v0  ;;  %418 = vst.msk [vmem:[#allocation2 + $0x1a0] sm:$0xff] %vm411_vm0, %v3722_v0  ;;  %s2754_s21 = sshll.u32 %s4884_s19, 7  ;;  %v3841_v12 = vld [vmem:[%s4834_s2] ss:$0 sm:$0xff]  ;;  %s3727_s16 = smov 40  }
  0x11   : > { %422 = vst.msk [vmem:[#allocation2 + $0x18] sm:$0x1] %vm420_vm2, %v3722_v0  ;;  %423 = vst.msk [vmem:[#allocation2 + $0x30] sm:$0x1] %vm420_vm2, %v3722_v0  ;;  %s3827_s24 = scalar_lea.vmem %s4832_s0, %s2754_s21  ;;  %vm2167_vm3 = vcmask 1043456   ;;  %s3728_s22 = smov 48  }
  0x12   : > { %424 = vst.msk [vmem:[#allocation2 + $0x48] sm:$0x1] %vm420_vm2, %v3722_v0  ;;  %425 = vst.msk [vmem:[#allocation2 + $0x60] sm:$0x1] %vm420_vm2, %v3722_v0  ;;  %v2932_v2 = vld [vmem:[%s3827_s24 + $0x8] sm:$0xff]   ;;  %v2789_v3 = vld [vmem:[%s3827_s24] sm:$0xff]   ;;  %s4807_s27 = scalar_lea.vmem %s4836_s4, %s2754_s21 }
  0x13   : > { %426 = vst.msk [vmem:[#allocation2 + $0x78] sm:$0x1] %vm420_vm2, %v3722_v0  ;;  %427 = vst.msk [vmem:[#allocation2 + $0x90] sm:$0x1] %vm420_vm2, %v3722_v0  ;;  %v2933_v4 = vld [vmem:[%s3827_s24 + $0x10] sm:$0xff]   ;;  %v2794_v5 = vunpack.c.l.bf16 %v2932_v2  ;;  %v2795_v6 = vunpack.c.h.bf16 %v2932_v2  ;;  %v2790_v7 = vunpack.c.l.bf16 %v2789_v3  ;;  %v2791_v8 = vunpack.c.h.bf16 %v2789_v3  ;;  %v2934_v9 = vld [vmem:[%s3827_s24 + $0x18] sm:$0xff]  }
  0x14   : > { %428 = vst.msk [vmem:[#allocation2 + $0xa8] sm:$0x1] %vm420_vm2, %v3722_v0  ;;  %429 = vst.msk [vmem:[#allocation2 + $0xc0] sm:$0x1] %vm420_vm2, %v3722_v0  ;;  %v2798_v13 = vunpack.c.l.bf16 %v2933_v4  ;;  %v2799_v14 = vunpack.c.h.bf16 %v2933_v4  ;;  %v2802_v15 = vunpack.c.l.bf16 %v2934_v9  ;;  %v2803_v16 = vunpack.c.h.bf16 %v2934_v9  ;;  %v2935_v33 = vld [vmem:[%s3827_s24 + $0x20] sm:$0xff]   ;;  %v2936_v34 = vld [vmem:[%s3827_s24 + $0x28] sm:$0xff]  }
  0x15   : > { %430 = vst.msk [vmem:[#allocation2 + $0xd8] sm:$0x1] %vm420_vm2, %v3722_v0  ;;  %431 = vst.msk [vmem:[#allocation2 + $0xf0] sm:$0x1] %vm420_vm2, %v3722_v0  ;;  %v522_v10 = vld [vmem:[#allocation2 + $0x1] sm:$0xff]  ;;  %v310_v18 = vmul.f32 %v2794_v5, %v3832_v1  ;;  %v311_v19 = vmul.f32 %v2795_v6, %v3832_v1  ;;  %v308_v20 = vmul.f32 %v2790_v7, %v3832_v1  ;;  %v2937_v35 = vld [vmem:[%s3827_s24 + $0x30] sm:$0xff]   ;;  %v2806_v46 = vunpack.c.l.bf16 %v2935_v33 }
  0x16   : > { %432 = vst.msk [vmem:[#allocation2 + $0x108] sm:$0x1] %vm420_vm2, %v3722_v0  ;;  %433 = vst.msk [vmem:[#allocation2 + $0x120] sm:$0x1] %vm420_vm2, %v3722_v0  ;;  %v523_v11 = vld [vmem:[#allocation2 + $0x9] sm:$0xff]  ;;  %v309_v21 = vmul.f32 %v2791_v8, %v3832_v1  ;;  %v312_v22 = vmul.f32 %v2798_v13, %v3832_v1  ;;  %v313_v23 = vmul.f32 %v2799_v14, %v3832_v1  ;;  %v2938_v40 = vld [vmem:[%s3827_s24 + $0x38] sm:$0xff]   ;;  %v2807_v47 = vunpack.c.h.bf16 %v2935_v33 }
  0x17   : > { %434 = vst.msk [vmem:[#allocation2 + $0x138] sm:$0x1] %vm420_vm2, %v3722_v0  ;;  %435 = vst.msk [vmem:[#allocation2 + $0x150] sm:$0x1] %vm420_vm2, %v3722_v0  ;;  %v3054_v17 = vpack.i.bf16 %v523_v11, %v522_v10  ;;  %v314_v24 = vmul.f32 %v2802_v15, %v3832_v1  ;;  %v349_v25 = vadd.f32 %v3841_v12, %v310_v18  ;;  %v2810_v48 = vunpack.c.l.bf16 %v2936_v34  ;;  %v2939_v2 = vld [vmem:[%s3827_s24 + $0x40] sm:$0xff]   ;;  %v2940_v11 = vld [vmem:[%s3827_s24 + $0x48] sm:$0xff]  }
  0x18   : > { %436 = vst.msk [vmem:[#allocation2 + $0x168] sm:$0x1] %vm420_vm2, %v3722_v0  ;;  %437 = vst.msk [vmem:[#allocation2 + $0x180] sm:$0x1] %vm420_vm2, %v3722_v0  ;;  %v350_v26 = vadd.f32 %v3841_v12, %v311_v19  ;;  %v347_v27 = vadd.f32 %v3841_v12, %v308_v20  ;;  %v315_v28 = vmul.f32 %v2803_v16, %v3832_v1  ;;  %v2811_v49 = vunpack.c.h.bf16 %v2936_v34  ;;  %v2941_v13 = vld [vmem:[%s3827_s24 + $0x50] sm:$0xff]   ;;  %v2942_v14 = vld [vmem:[%s3827_s24 + $0x58] sm:$0xff]  }
  0x19   : > { %440 = vst.msk [vmem:[#allocation2 + $0x29] sm:$0x1] %vm420_vm2, %v3722_v0  ;;  %441 = vst.msk [vmem:[#allocation2 + $0x41] sm:$0x1] %vm420_vm2, %v3722_v0  ;;  %3055 = vrot.lane.b32.xlu0 %v3054_v17, %s3723_s29  ;;  %v348_v29 = vadd.f32 %v3841_v12, %v309_v21  ;;  %v351_v30 = vadd.f32 %v3841_v12, %v312_v22  ;;  %v352_v31 = vadd.f32 %v3841_v12, %v313_v23  ;;  %s3729_s23 = smov 56   ;;  %s3730_s25 = smov 64  }
  0x1a   : > { %442 = vst.msk [vmem:[#allocation2 + $0x59] sm:$0x1] %vm420_vm2, %v3722_v0  ;;  %443 = vst.msk [vmem:[#allocation2 + $0x71] sm:$0x1] %vm420_vm2, %v3722_v0  ;;  %v353_v32 = vadd.f32 %v3841_v12, %v314_v24  ;;  %v381_v36 = vmax.f32 %v349_v25, 0.0  ;;  %v382_v37 = vmax.f32 %v350_v26, 0.0  ;;  %v354_v39 = vadd.f32 %v3841_v12, %v315_v28 }
  0x1b   : > { %444 = vst.msk [vmem:[#allocation2 + $0x89] sm:$0x1] %vm420_vm2, %v3722_v0  ;;  %445 = vst.msk [vmem:[#allocation2 + $0xa1] sm:$0x1] %vm420_vm2, %v3722_v0  ;;  %v379_v38 = vmax.f32 %v347_v27, 0.0  ;;  %v380_v41 = vmax.f32 %v348_v29, 0.0  ;;  %v2814_v50 = vunpack.c.l.bf16 %v2937_v35  ;;  %v2815_v51 = vunpack.c.h.bf16 %v2937_v35 }
  0x1c   : > { %446 = vst.msk [vmem:[#allocation2 + $0xb9] sm:$0x1] %vm420_vm2, %v3722_v0  ;;  %447 = vst.msk [vmem:[#allocation2 + $0xd1] sm:$0x1] %vm420_vm2, %v3722_v0  ;;  %v383_v42 = vmax.f32 %v351_v30, 0.0  ;;  %v384_v43 = vmax.f32 %v352_v31, 0.0  ;;  %v2818_v52 = vunpack.c.l.bf16 %v2938_v40  ;;  %v316_v53 = vmul.f32 %v2806_v46, %v3832_v1 }
  0x1d   : > { %448 = vst.msk [vmem:[#allocation2 + $0xe9] sm:$0x1] %vm420_vm2, %v3722_v0  ;;  %449 = vst.msk [vmem:[#allocation2 + $0x101] sm:$0x1] %vm420_vm2, %v3722_v0  ;;  %v385_v44 = vmax.f32 %v353_v32, 0.0  ;;  %v386_v45 = vmax.f32 %v354_v39, 0.0  ;;  %v317_v54 = vmul.f32 %v2807_v47, %v3832_v1  ;;  %v318_v55 = vmul.f32 %v2810_v48, %v3832_v1 }
  0x1e   : > { %450 = vst.msk [vmem:[#allocation2 + $0x119] sm:$0x1] %vm420_vm2, %v3722_v0  ;;  %451 = vst.msk [vmem:[#allocation2 + $0x131] sm:$0x1] %vm420_vm2, %v3722_v0  ;;  %v2819_v56 = vunpack.c.h.bf16 %v2938_v40  ;;  %v319_v57 = vmul.f32 %v2811_v49, %v3832_v1  ;;  %v320_v58 = vmul.f32 %v2814_v50, %v3832_v1  ;;  %v321_v59 = vmul.f32 %v2815_v51, %v3832_v1  ;;  %v2943_v47 = vld [vmem:[%s3827_s24 + $0x60] sm:$0xff]   ;;  %s2696_s21 = sshll.u32 %s4884_s19, 1 }
  0x1f   : > { %452 = vst.msk [vmem:[#allocation2 + $0x149] sm:$0x1] %vm420_vm2, %v3722_v0  ;;  %453 = vst.msk [vmem:[#allocation2 + $0x161] sm:$0x1] %vm420_vm2, %v3722_v0  ;;  %v322_v60 = vmul.f32 %v2818_v52, %v3832_v1  ;;  %v355_v61 = vadd.f32 %v3841_v12, %v316_v53  ;;  %v356_v62 = vadd.f32 %v3841_v12, %v317_v54  ;;  %v2822_v21 = vunpack.c.l.bf16 %v2939_v2 }
  0x20   : > { %454 = vst.msk [vmem:[#allocation2 + $0x179] sm:$0x1] %vm420_vm2, %v3722_v0  ;;  %455 = vst.msk [vmem:[#allocation2 + $0x191] sm:$0x1] %vm420_vm2, %v3722_v0  ;;  %v357_v63 = vadd.f32 %v3841_v12, %v318_v55  ;;  %v358_v3 = vadd.f32 %v3841_v12, %v319_v57  ;;  %v359_v4 = vadd.f32 %v3841_v12, %v320_v58  ;;  %v2823_v28 = vunpack.c.h.bf16 %v2939_v2  ;;  %v2945_v57 = vld [vmem:[%s3827_s24 + $0x70] sm:$0xff]  }
  0x21   : > { %439 = vst.msk [vmem:[#allocation2 + $0x11] sm:$0x1] %vm420_vm2, %v3722_v0  ;;  %456 = vst.msk [vmem:[#allocation2 + $0x1a9] sm:$0x1] %vm420_vm2, %v3722_v0  ;;  %v360_v5 = vadd.f32 %v3841_v12, %v321_v59  ;;  %v361_v6 = vadd.f32 %v3841_v12, %v322_v60  ;;  %v387_v7 = vmax.f32 %v355_v61, 0.0  ;;  %v388_v8 = vmax.f32 %v356_v62, 0.0 }
  0x22   : > { %421 = vst.msk [vmem:[#allocation2] sm:$0x1] %vm420_vm2, %v3722_v0  ;;  %438 = vst.msk [vmem:[#allocation2 + $0x198] sm:$0x1] %vm420_vm2, %v3722_v0  ;;  %v323_v0 = vmul.f32 %v2819_v56, %v3832_v1  ;;  %v389_v9 = vmax.f32 %v357_v63, 0.0  ;;  %v390_v18 = vmax.f32 %v358_v3, 0.0  ;;  %v324_v33 = vmul.f32 %v2822_v21, %v3832_v1 }
  0x23   : > { %460 = vst.msk [vmem:[#allocation2 + $0x31] sm:$0xff] %vm411_vm0, %v381_v36  ;;  %461 = vst.msk [vmem:[#allocation2 + $0x39] sm:$0xff] %vm411_vm0, %v382_v37  ;;  %v391_v19 = vmax.f32 %v359_v4, 0.0  ;;  %v392_v20 = vmax.f32 %v360_v5, 0.0  ;;  %v393_v26 = vmax.f32 %v361_v6, 0.0  ;;  %v2826_v34 = vunpack.c.l.bf16 %v2940_v11  ;;  %v2944_v56 = vld [vmem:[%s3827_s24 + $0x68] sm:$0xff]  }
  0x24   : > { %458 = vst.msk [vmem:[#allocation2 + $0x19] sm:$0xff] %vm411_vm0, %v379_v38  ;;  %459 = vst.msk [vmem:[#allocation2 + $0x21] sm:$0xff] %vm411_vm0, %v380_v41  ;;  %v362_v10 = vadd.f32 %v3841_v12, %v323_v0  ;;  %v325_v36 = vmul.f32 %v2823_v28, %v3832_v1  ;;  %v2827_v37 = vunpack.c.h.bf16 %v2940_v11  ;;  %v2830_v38 = vunpack.c.l.bf16 %v2941_v13 }
  0x25   : > { %462 = vst.msk [vmem:[#allocation2 + $0x49] sm:$0xff] %vm411_vm0, %v383_v42  ;;  %463 = vst.msk [vmem:[#allocation2 + $0x51] sm:$0xff] %vm411_vm0, %v384_v43  ;;  %v363_v39 = vadd.f32 %v3841_v12, %v324_v33  ;;  %v326_v40 = vmul.f32 %v2826_v34, %v3832_v1  ;;  %v2831_v41 = vunpack.c.h.bf16 %v2941_v13  ;;  %v2834_v42 = vunpack.c.l.bf16 %v2942_v14 }
  0x26   : > { %464 = vst.msk [vmem:[#allocation2 + $0x61] sm:$0xff] %vm411_vm0, %v385_v44  ;;  %465 = vst.msk [vmem:[#allocation2 + $0x69] sm:$0xff] %vm411_vm0, %v386_v45  ;;  %v394_v27 = vmax.f32 %v362_v10, 0.0  ;;  %v364_v43 = vadd.f32 %v3841_v12, %v325_v36  ;;  %v327_v44 = vmul.f32 %v2827_v37, %v3832_v1  ;;  %v328_v45 = vmul.f32 %v2830_v38, %v3832_v1 }
  0x27   : > { %466 = vst.msk [vmem:[#allocation2 + $0x79] sm:$0xff] %vm411_vm0, %v387_v7  ;;  %467 = vst.msk [vmem:[#allocation2 + $0x81] sm:$0xff] %vm411_vm0, %v388_v8  ;;  %v2835_v46 = vunpack.c.h.bf16 %v2942_v14  ;;  %v395_v48 = vmax.f32 %v363_v39, 0.0  ;;  %v365_v49 = vadd.f32 %v3841_v12, %v326_v40  ;;  %v329_v50 = vmul.f32 %v2831_v41, %v3832_v1 }
  0x28   : > { %468 = vst.msk [vmem:[#allocation2 + $0x91] sm:$0xff] %vm411_vm0, %v389_v9  ;;  %469 = vst.msk [vmem:[#allocation2 + $0x99] sm:$0xff] %vm411_vm0, %v390_v18  ;;  %v330_v51 = vmul.f32 %v2834_v42, %v3832_v1  ;;  %v396_v52 = vmax.f32 %v364_v43, 0.0  ;;  %v366_v53 = vadd.f32 %v3841_v12, %v327_v44  ;;  %v367_v54 = vadd.f32 %v3841_v12, %v328_v45 }
  0x29   : > { %470 = vst.msk [vmem:[#allocation2 + $0xa9] sm:$0xff] %vm411_vm0, %v391_v19  ;;  %471 = vst.msk [vmem:[#allocation2 + $0xb1] sm:$0xff] %vm411_vm0, %v392_v20  ;;  %v331_v55 = vmul.f32 %v2835_v46, %v3832_v1  ;;  %v397_v61 = vmax.f32 %v365_v49, 0.0  ;;  %v368_v62 = vadd.f32 %v3841_v12, %v329_v50  ;;  %v2838_v0 = vunpack.c.l.bf16 %v2943_v47 }
  0x2a   : > { %v526_v15 = vld [vmem:[#allocation2 + $0x31] sm:$0xff]  ;;  %v527_v16 = vld [vmem:[#allocation2 + $0x39] sm:$0xff]  ;;  %472 = vst.msk [vmem:[#allocation2 + $0xc1] sm:$0xff] %vm411_vm0, %v393_v26  ;;  %473 = vst.msk [vmem:[#allocation2 + $0xc9] sm:$0xff] %vm411_vm0, %v394_v27  ;;  %v369_v63 = vadd.f32 %v3841_v12, %v330_v51  ;;  %v398_v6 = vmax.f32 %v366_v53, 0.0  ;;  %v399_v7 = vmax.f32 %v367_v54, 0.0  ;;  %v2839_v18 = vunpack.c.h.bf16 %v2943_v47 }
  0x2b   : > { %v524_v17 = vld [vmem:[#allocation2 + $0x19] sm:$0xff]  ;;  %v3892_v22 = vpack.i.bf16 %v527_v16, %v526_v15  ;;  %v525_v23 = vld [vmem:[#allocation2 + $0x21] sm:$0xff]  ;;  %474 = vst.msk [vmem:[#allocation2 + $0xd9] sm:$0xff] %vm411_vm0, %v395_v48  ;;  %475 = vst.msk [vmem:[#allocation2 + $0xe1] sm:$0xff] %vm411_vm0, %v396_v52  ;;  %v370_v8 = vadd.f32 %v3841_v12, %v331_v55  ;;  %v400_v14 = vmax.f32 %v368_v62, 0.0  ;;  %v332_v19 = vmul.f32 %v2838_v0, %v3832_v1 }
  0x2c   : > { %v528_v24 = vld [vmem:[#allocation2 + $0x49] sm:$0xff]  ;;  %v529_v25 = vld [vmem:[#allocation2 + $0x51] sm:$0xff]  ;;  %v3897_v29 = vpack.i.bf16 %v525_v23, %v524_v17  ;;  %476 = vst.msk [vmem:[#allocation2 + $0xf1] sm:$0xff] %vm411_vm0, %v397_v61  ;;  %v401_v15 = vmax.f32 %v369_v63, 0.0  ;;  %477 = vst.msk [vmem:[#allocation2 + $0xf9] sm:$0xff] %vm411_vm0, %v398_v6  ;;  %v2842_v20 = vunpack.c.l.bf16 %v2944_v56  ;;  %v2843_v21 = vunpack.c.h.bf16 %v2944_v56 }
  0x2d   : > { %v3899_v30 = vpack.i.bf16 %v529_v25, %v528_v24  ;;  %v530_v31 = vld [vmem:[#allocation2 + $0x61] sm:$0xff]  ;;  %v531_v32 = vld [vmem:[#allocation2 + $0x69] sm:$0xff]  ;;  %3065 = vrot.lane.b32.xlu1 %v3892_v22, %s3723_s29  ;;  %478 = vst.msk [vmem:[#allocation2 + $0x109] sm:$0xff] %vm411_vm0, %v399_v7  ;;  %v402_v17 = vmax.f32 %v370_v8, 0.0  ;;  %479 = vst.msk [vmem:[#allocation2 + $0x111] sm:$0xff] %vm411_vm0, %v400_v14  ;;  %v2846_v23 = vunpack.c.l.bf16 %v2945_v57  ;;  %v2847_v24 = vunpack.c.h.bf16 %v2945_v57 }
  0x2e   : > { %v3907_v35 = vpack.i.bf16 %v531_v32, %v530_v31  ;;  %3060 = vrot.lane.b32.xlu0 %v3897_v29, %s3723_s29  ;;  %v532_v58 = vld [vmem:[#allocation2 + $0x79] sm:$0xff]  ;;  %v533_v59 = vld [vmem:[#allocation2 + $0x81] sm:$0xff]  ;;  %480 = vst.msk [vmem:[#allocation2 + $0x121] sm:$0xff] %vm411_vm0, %v401_v15  ;;  %v333_v25 = vmul.f32 %v2839_v18, %v3832_v1  ;;  %v371_v26 = vadd.f32 %v3841_v12, %v332_v19  ;;  %vm1835_vm4 = vcmask 130048  }
  0x2f   : > { %v534_v60 = vld [vmem:[#allocation2 + $0x91] sm:$0xff]  ;;  %v3935_v2 = vpack.i.bf16 %v533_v59, %v532_v58  ;;  %v535_v3 = vld [vmem:[#allocation2 + $0x99] sm:$0xff]  ;;  %481 = vst.msk [vmem:[#allocation2 + $0x129] sm:$0xff] %vm411_vm0, %v402_v17  ;;  %v334_v27 = vmul.f32 %v2842_v20, %v3832_v1  ;;  %v335_v28 = vmul.f32 %v2843_v21, %v3832_v1  ;;  %v336_v31 = vmul.f32 %v2846_v23, %v3832_v1  ;;  %v554_v59 = vld [vmem:[#allocation2 + $0x2] sm:$0xff] }
  0x30   : > { %v536_v4 = vld [vmem:[#allocation2 + $0xa9] sm:$0xff]  ;;  %v537_v5 = vld [vmem:[#allocation2 + $0xb1] sm:$0xff]  ;;  %v3939_v9 = vpack.i.bf16 %v535_v3, %v534_v60  ;;  %v337_v32 = vmul.f32 %v2847_v24, %v3832_v1  ;;  %v372_v34 = vadd.f32 %v3841_v12, %v333_v25  ;;  %v403_v36 = vmax.f32 %v371_v26, 0.0  ;;  %v556_v7 = vld [vmem:[#allocation2 + $0x1a] sm:$0xff] }
  0x31   : > { %3070 = vrot.lane.b32.xlu1 %v3899_v30, %s3723_s29  ;;  %v3941_v10 = vpack.i.bf16 %v537_v5, %v536_v4  ;;  %v538_v11 = vld [vmem:[#allocation2 + $0xc1] sm:$0xff]  ;;  %v539_v13 = vld [vmem:[#allocation2 + $0xc9] sm:$0xff]  ;;  %v373_v38 = vadd.f32 %v3841_v12, %v334_v27  ;;  %v374_v39 = vadd.f32 %v3841_v12, %v335_v28  ;;  %v375_v40 = vadd.f32 %v3841_v12, %v336_v31  ;;  %v561_v18 = vld [vmem:[#allocation2 + $0x52] sm:$0xff] }
  0x32   : > { %3075 = vrot.lane.b32.xlu0 %v3907_v35, %s3723_s29  ;;  %v3946_v16 = vpack.i.bf16 %v539_v13, %v538_v11  ;;  %v540_v33 = vld [vmem:[#allocation2 + $0xd9] sm:$0xff]  ;;  %v541_v37 = vld [vmem:[#allocation2 + $0xe1] sm:$0xff]  ;;  %v376_v41 = vadd.f32 %v3841_v12, %v337_v32  ;;  %v404_v44 = vmax.f32 %v372_v34, 0.0  ;;  %482 = vst.msk [vmem:[#allocation2 + $0x139] sm:$0xff] %vm411_vm0, %v403_v36  ;;  %v555_v60 = vld [vmem:[#allocation2 + $0xa] sm:$0xff]  ;;  %vm1868_vm5 = vcmask 195584  }
  0x33   : > { %v3971_v42 = vpack.i.bf16 %v541_v37, %v540_v33  ;;  %v542_v43 = vld [vmem:[#allocation2 + $0xf1] sm:$0xff]  ;;  %v543_v45 = vld [vmem:[#allocation2 + $0xf9] sm:$0xff]  ;;  %v405_v47 = vmax.f32 %v373_v38, 0.0  ;;  %v406_v48 = vmax.f32 %v374_v39, 0.0  ;;  %v407_v49 = vmax.f32 %v375_v40, 0.0  ;;  %v557_v8 = vld [vmem:[#allocation2 + $0x22] sm:$0xff] }
  0x34   : > { %v544_v46 = vld [vmem:[#allocation2 + $0x109] sm:$0xff]  ;;  %v408_v50 = vmax.f32 %v376_v41, 0.0  ;;  %v3104_v51 = vpack.i.bf16 %v543_v45, %v542_v43  ;;  %v545_v52 = vld [vmem:[#allocation2 + $0x111] sm:$0xff]  ;;  %483 = vst.msk [vmem:[#allocation2 + $0x141] sm:$0xff] %vm411_vm0, %v404_v44  ;;  %v3134_v6 = vpack.i.bf16 %v555_v60, %v554_v59  ;;  %v559_v13 = vld [vmem:[#allocation2 + $0x3a] sm:$0xff]  ;;  %v3987_v14 = vpack.i.bf16 %v557_v8, %v556_v7 }
  0x35   : > { %3080 = vrot.lane.b32.xlu1 %v3935_v2, %s3723_s29  ;;  %v546_v53 = vld [vmem:[#allocation2 + $0x121] sm:$0xff]  ;;  %v3109_v54 = vpack.i.bf16 %v545_v52, %v544_v46  ;;  %484 = vst.msk [vmem:[#allocation2 + $0x151] sm:$0xff] %vm411_vm0, %v405_v47  ;;  %485 = vst.msk [vmem:[#allocation2 + $0x159] sm:$0xff] %vm411_vm0, %v406_v48  ;;  %v558_v11 = vld [vmem:[#allocation2 + $0x32] sm:$0xff]  ;;  %vm1901_vm6 = vcmask 261120   ;;  %vm1934_vm7 = vcmask 326656  }
  0x36   : > { %3085 = vrot.lane.b32.xlu0 %v3939_v9, %s3723_s29  ;;  %v547_v55 = vld [vmem:[#allocation2 + $0x129] sm:$0xff]  ;;  %486 = vst.msk [vmem:[#allocation2 + $0x169] sm:$0xff] %vm411_vm0, %v407_v49  ;;  %487 = vst.msk [vmem:[#allocation2 + $0x171] sm:$0xff] %vm411_vm0, %v408_v50  ;;  %v3990_v15 = vpack.i.bf16 %v559_v13, %v558_v11  ;;  %v564_v24 = vld [vmem:[#allocation2 + $0x7a] sm:$0xff]  ;;  %vm1967_vm8 = vcmask 392192   ;;  %vm2000_vm9 = vcmask 457728  }
  0x37   : > { %v3114_v56 = vpack.i.bf16 %v547_v55, %v546_v53  ;;  %v560_v17 = vld [vmem:[#allocation2 + $0x4a] sm:$0xff]  ;;  %v562_v19 = vld [vmem:[#allocation2 + $0x62] sm:$0xff]  ;;  %v566_v26 = vld [vmem:[#allocation2 + $0x92] sm:$0xff]  ;;  %vm2033_vm10 = vcmask 523264   ;;  %vm2118_vm11 = vcmask 588800   ;;  %vm2598_vm12 = vcmask 1040384  }
  0x38   : > { %v563_v20 = vld [vmem:[#allocation2 + $0x6a] sm:$0xff]  ;;  %v3994_v21 = vpack.i.bf16 %v561_v18, %v560_v17  ;;  %v565_v25 = vld [vmem:[#allocation2 + $0x82] sm:$0xff]  ;;  %v567_v27 = vld [vmem:[#allocation2 + $0x9a] sm:$0xff] }
  0x39   : > { %3090 = vrot.lane.b32.xlu1 %v3941_v10, %s3723_s29  ;;  %v548_v57 = vld [vmem:[#allocation2 + $0x139] sm:$0xff]  ;;  %v3998_v23 = vpack.i.bf16 %v563_v20, %v562_v19  ;;  %v4002_v28 = vpack.i.bf16 %v565_v25, %v564_v24  ;;  %v4006_v31 = vpack.i.bf16 %v567_v27, %v566_v26  ;;  %v568_v32 = vld [vmem:[#allocation2 + $0xaa] sm:$0xff]  ;;  %v570_v34 = vld [vmem:[#allocation2 + $0xc2] sm:$0xff] }
  0x3a   : > { %3095 = vrot.lane.b32.xlu0 %v3946_v16, %s3723_s29  ;;  %v569_v33 = vld [vmem:[#allocation2 + $0xb2] sm:$0xff]  ;;  %v571_v36 = vld [vmem:[#allocation2 + $0xca] sm:$0xff]  ;;  %v572_v39 = vld [vmem:[#allocation2 + $0xda] sm:$0xff] }
  0x3b   : > { %v549_v58 = vld [vmem:[#allocation2 + $0x141] sm:$0xff]  ;;  %v4010_v37 = vpack.i.bf16 %v569_v33, %v568_v32  ;;  %v4014_v38 = vpack.i.bf16 %v571_v36, %v570_v34  ;;  %v574_v41 = vld [vmem:[#allocation2 + $0xf2] sm:$0xff]  ;;  %v576_v46 = vld [vmem:[#allocation2 + $0x10a] sm:$0xff] }
  0x3c   : > { %v3119_v61 = vpack.i.bf16 %v549_v58, %v548_v57  ;;  %v550_v62 = vld [vmem:[#allocation2 + $0x151] sm:$0xff]  ;;  %v551_v63 = vld [vmem:[#allocation2 + $0x159] sm:$0xff]  ;;  %v573_v40 = vld [vmem:[#allocation2 + $0xe2] sm:$0xff] }
  0x3d   : > { %3100 = vrot.lane.b32.xlu1 %v3971_v42, %s3723_s29  ;;  %v552_v0 = vld [vmem:[#allocation2 + $0x169] sm:$0xff]  ;;  %v3124_v3 = vpack.i.bf16 %v551_v63, %v550_v62  ;;  %v553_v4 = vld [vmem:[#allocation2 + $0x171] sm:$0xff]  ;;  %v575_v43 = vld [vmem:[#allocation2 + $0xfa] sm:$0xff]  ;;  %v4018_v44 = vpack.i.bf16 %v573_v40, %v572_v39 }
  0x3e   : > { %3105 = vrot.lane.b32.xlu0 %v3104_v51, %s3723_s29  ;;  %v3129_v5 = vpack.i.bf16 %v553_v4, %v552_v0  ;;  %v4022_v45 = vpack.i.bf16 %v575_v43, %v574_v41  ;;  %v577_v47 = vld [vmem:[#allocation2 + $0x112] sm:$0xff]  ;;  %v578_v48 = vld [vmem:[#allocation2 + $0x122] sm:$0xff]  ;;  %v579_v49 = vld [vmem:[#allocation2 + $0x12a] sm:$0xff] }
  0x3f   : > { %v4026_v50 = vpack.i.bf16 %v577_v47, %v576_v46  ;;  %v3194_v51 = vpack.i.bf16 %v579_v49, %v578_v48  ;;  %v580_v52 = vld [vmem:[#allocation2 + $0x13a] sm:$0xff]  ;;  %v581_v53 = vld [vmem:[#allocation2 + $0x142] sm:$0xff]  ;;  %v584_v58 = vld [vmem:[#allocation2 + $0x16a] sm:$0xff] }
  0x40   : > { %v583_v55 = vld [vmem:[#allocation2 + $0x15a] sm:$0xff]  ;;  %v585_v59 = vld [vmem:[#allocation2 + $0x172] sm:$0xff]  ;;  %v4045_v4 = vld [vmem:[#allocation2 + $0x48] sm:$0xff] }
  0x41   : > { %3110 = vrot.lane.b32.xlu1 %v3109_v54, %s3723_s29  ;;  %v582_v54 = vld [vmem:[#allocation2 + $0x152] sm:$0xff]  ;;  %v3209_v62 = vpack.i.bf16 %v585_v59, %v584_v58  ;;  %v4055_v8 = vld [vmem:[#allocation2 + $0x60] sm:$0xff]  ;;  %v4057_v11 = vld [vmem:[#allocation2 + $0x68] sm:$0xff] }
  0x42   : > { %3115 = vrot.lane.b32.xlu0 %v3114_v56, %s3723_s29  ;;  %v3199_v56 = vpack.i.bf16 %v581_v53, %v580_v52  ;;  %v3204_v57 = vpack.i.bf16 %v583_v55, %v582_v54  ;;  %v4033_v60 = vld [vmem:[#allocation2 + $0x18] sm:$0xff]  ;;  %v4041_v0 = vld [vmem:[#allocation2 + $0x30] sm:$0xff]  ;;  %v4061_v17 = vld [vmem:[#allocation2 + $0x80] sm:$0xff]  ;;  %v4066_v18 = vpack.i.bf16 %v4057_v11, %v4055_v8 }
  0x43   : > { %v4059_v13 = vld [vmem:[#allocation2 + $0x78] sm:$0xff]  ;;  %v3694_v19 = vld [vmem:[%s4835_s3] sm:$0xff]   ;;  %v596_v24 = vld [vmem:[#allocation2 + $0x90] sm:$0xff] }
  0x44   : > { %v4074_v20 = vpack.i.bf16 %v4061_v17, %v4059_v13  ;;  %v597_v25 = vld [vmem:[#allocation2 + $0x98] sm:$0xff]  ;;  %v598_v26 = vld [vmem:[#allocation2 + $0xa8] sm:$0xff]  ;;  %v599_v27 = vld [vmem:[#allocation2 + $0xb0] sm:$0xff]  ;;  %2983 = vmatprep.subr.bf16.mxu0 %v3694_v19  ;;  %3025 = vmatprep.subr.bf16.mxu1 %v3694_v19 }
  0x45   : > { %3120 = vrot.lane.b32.xlu1 %v3119_v61, %s3723_s29  ;;  %v4035_v61 = vld [vmem:[#allocation2 + $0x20] sm:$0xff]  ;;  %2984 = vmatpush3.bf16.msra.mxu0 %v3694_v19  ;;  %v4078_v32 = vpack.i.bf16 %v597_v25, %v596_v24  ;;  %v3695_v33 = vld [vmem:[%s4835_s3 + $0x8] sm:$0xff]   ;;  %v4085_v34 = vpack.i.bf16 %v599_v27, %v598_v26  ;;  %v3696_v36 = vld [vmem:[%s4835_s3 + $0x10] sm:$0xff]  }
  0x46   : > { %3125 = vrot.lane.b32.xlu0 %v3124_v3, %s3723_s29  ;;  %v3214_v63 = vpack.i.bf16 %v4035_v61, %v4033_v60  ;;  %v4043_v3 = vld [vmem:[#allocation2 + $0x38] sm:$0xff]  ;;  %3030 = vmatpush3.bf16.msra.mxu1 %v3694_v19  ;;  %v506_v54 = vld [vmem:[#allocation2 + $0xc0] sm:$0xff]  ;;  %v507_v55 = vld [vmem:[#allocation2 + $0xc8] sm:$0xff] }
  0x47   : > { %2985 = vmatprep.subr.bf16.mxu0 %v3695_v33  ;;  %3026 = vmatprep.subr.bf16.mxu1 %v3695_v33  ;;  %v3697_v39 = vld [vmem:[%s4835_s3 + $0x18] sm:$0xff]   ;;  %v635_v25 = vld [vmem:[#allocation2 + $0xe1] sm:$0xff]  ;;  %v510_v26 = vld [vmem:[#allocation2 + $0xf0] sm:$0xff] }
  0x48   : > { %v2946_v41 = vld [vmem:[%s3827_s24 + $0x78] sm:$0xff]  }
  0x49   : > { %3130 = vrot.lane.b32.xlu1 %v3129_v5, %s3723_s29  ;;  %v4047_v5 = vld [vmem:[#allocation2 + $0x50] sm:$0xff]  ;;  %2986 = vmatpush3.bf16.msra.mxu0 %v3695_v33  ;;  %v2851_v43 = vunpack.c.h.bf16 %v2946_v41  ;;  %v634_v24 = vld [vmem:[#allocation2 + $0xd9] sm:$0xff] }
  0x4a   : > { %3135 = vrot.lane.b32.xlu0 %v3134_v6, %s3724_s30  ;;  %v3219_v6 = vpack.i.bf16 %v4043_v3, %v4041_v0  ;;  %v3224_v7 = vpack.i.bf16 %v4047_v5, %v4045_v4  ;;  %3031 = vmatpush3.bf16.msra.mxu1 %v3695_v33  ;;  %v511_v27 = vld [vmem:[#allocation2 + $0xf8] sm:$0xff]  ;;  %v3464_v33 = vpack.i.bf16 %v635_v25, %v634_v24 }
  0x4b   : > { %2987 = vmatprep.subr.bf16.mxu0 %v3696_v36  ;;  %3027 = vmatprep.subr.bf16.mxu1 %v3696_v36  ;;  %v339_v47 = vmul.f32 %v2851_v43, %v3832_v1  ;;  %v513_v43 = vld [vmem:[#allocation2 + $0x110] sm:$0xff] }
  0x4d   : > { %3140 = vrot.lane.b32.xlu1 %v3987_v14, %s3724_s30  ;;  %2988 = vmatpush3.bf16.msra.mxu0 %v3696_v36  ;;  %v378_v49 = vadd.f32 %v3841_v12, %v339_v47 }
  0x4e   : > { %3145 = vrot.lane.b32.xlu0 %v3990_v15, %s3724_s30  ;;  %3032 = vmatpush3.bf16.msra.mxu1 %v3696_v36 }
  0x4f   : > { %2989 = vmatprep.subr.bf16.mxu0 %v3697_v39  ;;  %3028 = vmatprep.subr.bf16.mxu1 %v3697_v39 }
  0x51   : > { %3150 = vrot.lane.b32.xlu1 %v3994_v21, %s3724_s30  ;;  %2990 = vmatpush3.bf16.msra.mxu0 %v3697_v39 }
  0x52   : > { %3155 = vrot.lane.b32.xlu0 %v3998_v23, %s3724_s30  ;;  %3033 = vmatpush3.bf16.msra.mxu1 %v3697_v39 }
  0x55   : > { %3160 = vrot.lane.b32.xlu1 %v4002_v28, %s3724_s30 }
  0x56   : > { %3165 = vrot.lane.b32.xlu0 %v4006_v31, %s3724_s30 }
  0x59   : > { %3170 = vrot.lane.b32.xlu1 %v4010_v37, %s3724_s30 }
  0x5a   : > { %3175 = vrot.lane.b32.xlu0 %v4014_v38, %s3724_s30 }
  0x5d   : > { %3180 = vrot.lane.b32.xlu1 %v4018_v44, %s3724_s30 }
  0x5e   : > { %3185 = vrot.lane.b32.xlu0 %v4022_v45, %s3724_s30 }
  0x61   : > { %3190 = vrot.lane.b32.xlu1 %v4026_v50, %s3724_s30 }
  0x62   : > { %3195 = vrot.lane.b32.xlu0 %v3194_v51, %s3724_s30 }
  0x65   : > { %3200 = vrot.lane.b32.xlu1 %v3199_v56, %s3724_s30 }
  0x66   : > { %3205 = vrot.lane.b32.xlu0 %v3204_v57, %s3724_s30  ;;  %v3399_v57 = vpack.i.bf16 %v507_v55, %v506_v54  ;;  %v4256_v54 = vld [vmem:[#allocation2 + $0x150] sm:$0xff] }
  0x69   : > { %3210 = vrot.lane.b32.xlu1 %v3209_v62, %s3724_s30  ;;  %v508_v62 = vld [vmem:[#allocation2 + $0xd8] sm:$0xff]  ;;  %s235_s30 = scalar_lea.vmem %s4837_s5, %s2696_s21 }
  0x6a   : > { %3215 = vrot.lane.b32.xlu0 %v3214_v63, %s3725_s6  ;;  %v4204_v63 = vld [vmem:[#allocation2 + $0xe0] sm:$0xff] }
  0x6b   : > { %4856 = vst [vmem:[#allocation8_spill] sm:$0xff] %v4204_v63 }
  0x6d   : > { %3220 = vrot.lane.b32.xlu1 %v3219_v6, %s3725_s6 }
  0x6e   : > { %3225 = vrot.lane.b32.xlu0 %v3224_v7, %s3725_s6 }
  0x71   : > { %3230 = vrot.lane.b32.xlu1 %v4066_v18, %s3725_s6 }
  0x72   : > { %3235 = vrot.lane.b32.xlu0 %v4074_v20, %s3725_s6 }
  0x75   : > { %3240 = vrot.lane.b32.xlu1 %v4078_v32, %s3725_s6 }
  0x76   : > { %3245 = vrot.lane.b32.xlu0 %v4085_v34, %s3725_s6 }
  0x79   : > { %3250 = vrot.lane.b32.xlu1 %v3897_v29, %s3726_s13  ;;  %v3698_v29 = vld [vmem:[%s4835_s3 + $0x20] ss:$0 sps:$4 sm:$0xff]  }
  0x7a   : > { %3255 = vrot.lane.b32.xlu0 %v3892_v22, %s3726_s13  ;;  %3035 = vmatprep.subr.msk.bf16.mxu0 %vm2167_vm3, %v3698_v29  ;;  %v2169_v40 = vsel %vm2167_vm3, %v3698_v29, 0 }
  0x7b   : > { %3036 = vmatprep.subr.msk.bf16.mxu1 %vm2167_vm3, %v3698_v29  ;;  %2992 = vmatpush3.bf16.msra.mxu0 %v2169_v40 }
  0x7c   : > { %3034 = vmatpush3.bf16.msra.mxu1 %v2169_v40 }
  0x7d   : > { %3260 = vrot.lane.b32.xlu1 %v3987_v14, %s3727_s16  ;;  %v2850_v14 = vunpack.c.l.bf16 %v2946_v41 }
  0x7e   : > { %3265 = vrot.lane.b32.xlu0 %v3990_v15, %s3727_s16 }
  0x7f   : > { %v338_v46 = vmul.f32 %v2850_v14, %v3832_v1  ;;  %v512_v14 = vld [vmem:[#allocation2 + $0x108] sm:$0xff] }
  0x80   : > { %v3489_v47 = vpack.i.bf16 %v513_v43, %v512_v14 }
  0x81   : > { %3270 = vrot.lane.b32.xlu1 %v3219_v6, %s3728_s22  ;;  %v377_v48 = vadd.f32 %v3841_v12, %v338_v46 }
  0x82   : > { %3275 = vrot.lane.b32.xlu0 %v3224_v7, %s3728_s22 }
  0x83   : > { %v409_v51 = vmax.f32 %v377_v48, 0.0  ;;  %v733_v48 = vld [vmem:[#allocation2 + $0x109] sm:$0xff] }
  0x85   : > { %3280 = vrot.lane.b32.xlu1 %v3892_v22, %s3729_s23  ;;  %v410_v22 = vmax.f32 %v378_v49, 0.0  ;;  %488 = vst.msk [vmem:[#allocation2 + $0x181] sm:$0xff] %vm411_vm0, %v409_v51  ;;  %v734_v49 = vld [vmem:[#allocation2 + $0x111] sm:$0xff] }
  0x86   : > { %3285 = vrot.lane.b32.xlu0 %v3899_v30, %s3729_s23 }
  0x87   : > { %489 = vst.msk [vmem:[#allocation2 + $0x189] sm:$0xff] %vm411_vm0, %v410_v22 }
  0x89   : > { %3290 = vrot.lane.b32.xlu1 %v3990_v15, %s3730_s25 }
  0x8a   : > { %3295 = vrot.lane.b32.xlu0 %v3994_v21, %s3730_s25 }
  0x8b   : > { %v4137_v1 = vpop.permute.xlu0 %3055 }
  0x8d   : > { %3300 = vrot.lane.b32.xlu1 %v3899_v30, %s3726_s13 }
  0x8e   : > { %3305 = vrot.lane.b32.xlu0 %v3907_v35, %s3726_s13 }
  0x91   : > { %3310 = vrot.lane.b32.xlu1 %v3994_v21, %s3727_s16 }
  0x92   : > { %3315 = vrot.lane.b32.xlu0 %v3998_v23, %s3727_s16 }
  0x95   : > { %3320 = vrot.lane.b32.xlu1 %v4066_v18, %s3728_s22 }
  0x96   : > { %3325 = vrot.lane.b32.xlu0 %v4074_v20, %s3728_s22 }
  0x99   : > { %3330 = vrot.lane.b32.xlu1 %v3907_v35, %s3729_s23 }
  0x9a   : > { %3335 = vrot.lane.b32.xlu0 %v3935_v2, %s3729_s23 }
  0x9d   : > { %3340 = vrot.lane.b32.xlu1 %v3998_v23, %s3730_s25 }
  0x9e   : > { %3345 = vrot.lane.b32.xlu0 %v4002_v28, %s3730_s25 }
  0x9f   : > { %v4145_v12 = vpop.permute.xlu1 %3065 }
  0xa0   : > { %v4149_v30 = vpop.permute.xlu0 %3060 }
  0xa1   : > { %3350 = vrot.lane.b32.xlu1 %v3935_v2, %s3726_s13 }
  0xa2   : > { %3355 = vrot.lane.b32.xlu0 %v3939_v9, %s3726_s13 }
  0xa3   : > { %v4153_v15 = vpop.permute.xlu1 %3070 }
  0xa4   : > { %v4157_v35 = vpop.permute.xlu0 %3075 }
  0xa5   : > { %3360 = vrot.lane.b32.xlu1 %v4002_v28, %s3727_s16 }
  0xa6   : > { %3365 = vrot.lane.b32.xlu0 %v4006_v31, %s3727_s16 }
  0xa7   : > { %v4161_v21 = vpop.permute.xlu1 %3080 }
  0xa8   : > { %v4165_v23 = vpop.permute.xlu0 %3085 }
  0xa9   : > { %3370 = vrot.lane.b32.xlu1 %v4078_v32, %s3728_s22 }
  0xaa   : > { %3375 = vrot.lane.b32.xlu0 %v4085_v34, %s3728_s22  ;;  %v636_v34 = vld [vmem:[#allocation2 + $0xf1] sm:$0xff] }
  0xab   : > { %v4169_v2 = vpop.permute.xlu1 %3090 }
  0xac   : > { %v4173_v52 = vpop.permute.xlu0 %3095 }
  0xad   : > { %3380 = vrot.lane.b32.xlu1 %v3939_v9, %s3729_s23 }
  0xae   : > { %3385 = vrot.lane.b32.xlu0 %v3941_v10, %s3729_s23 }
  0xaf   : > { %v4177_v28 = vpop.permute.xlu1 %3100 }
  0xb0   : > { %4851 = vst [vmem:[#allocation3_spill] sm:$0xff] %v4177_v28  ;;  %v4181_v53 = vpop.permute.xlu0 %3105 }
  0xb1   : > { %4852 = vst [vmem:[#allocation4_spill] sm:$0xff] %v4181_v53  ;;  %3390 = vrot.lane.b32.xlu1 %v4006_v31, %s3730_s25 }
  0xb2   : > { %3395 = vrot.lane.b32.xlu0 %v4010_v37, %s3730_s25 }
  0xb3   : > { %v4185_v56 = vpop.permute.xlu1 %3110 }
  0xb4   : > { %4853 = vst [vmem:[#allocation5_spill] sm:$0xff] %v4185_v56  ;;  %v4189_v58 = vpop.permute.xlu0 %3115 }
  0xb5   : > { %4854 = vst [vmem:[#allocation6_spill] sm:$0xff] %v4189_v58  ;;  %3400 = vrot.lane.b32.xlu1 %v3399_v57, %s3725_s6  ;;  %v490_v58 = vld [vmem:[#allocation2] sm:$0xff] }
  0xb6   : > { %3405 = vrot.lane.b32.xlu0 %v3941_v10, %s3726_s13  ;;  %v3429_v10 = vpack.i.bf16 %v4204_v63, %v508_v62  ;;  %v3499_v62 = vpack.i.bf16 %v734_v49, %v733_v48 }
  0xb7   : > { %v4194_v9 = vpop.permute.xlu1 %3120 }
  0xb8   : > { %4855 = vst [vmem:[#allocation7_spill] sm:$0xff] %v4194_v9  ;;  %v4196_v59 = vpop.permute.xlu0 %3125  ;;  %v491_v9 = vld [vmem:[#allocation2 + $0x8] sm:$0xff] }
  0xb9   : > { %3410 = vrot.lane.b32.xlu1 %v3946_v16, %s3726_s13  ;;  %v3128_v51 = vunpack.i.h.bf16 %v4196_v59  ;;  %v3127_v22 = vunpack.i.l.bf16 %v4196_v59 }
  0xba   : > { %3415 = vrot.lane.b32.xlu0 %v4010_v37, %s3727_s16 }
  0xbb   : > { %v4202_v31 = vpop.permute.xlu1 %3130 }
  0xbc   : > { %v4206_v6 = vpop.permute.xlu0 %3135  ;;  %v3132_v24 = vunpack.i.l.bf16 %v4202_v31 }
  0xbd   : > { %3420 = vrot.lane.b32.xlu1 %v4014_v38, %s3727_s16 }
  0xbe   : > { %3425 = vrot.lane.b32.xlu0 %v3399_v57, %s3728_s22 }
  0xbf   : > { %v4212_v7 = vpop.permute.xlu1 %3140 }
  0xc0   : > { %v4214_v18 = vpop.permute.xlu0 %3145  ;;  %v3142_v53 = vunpack.i.l.bf16 %v4212_v7 }
  0xc1   : > { %3430 = vrot.lane.b32.xlu1 %v3429_v10, %s3728_s22 }
  0xc2   : > { %3435 = vrot.lane.b32.xlu0 %v3946_v16, %s3729_s23  ;;  %v3459_v16 = vpack.i.bf16 %v511_v27, %v510_v26  ;;  %v1831_v27 = vsel %vm411_vm0, %v4256_v54, %v3127_v22 }
  0xc3   : > { %v4219_v37 = vpop.permute.xlu1 %3150 }
  0xc4   : > { %v4221_v19 = vpop.permute.xlu0 %3155 }
  0xc5   : > { %3440 = vrot.lane.b32.xlu1 %v3971_v42, %s3729_s23  ;;  %v637_v42 = vld [vmem:[#allocation2 + $0xf9] sm:$0xff] }
  0xc6   : > { %3445 = vrot.lane.b32.xlu0 %v4014_v38, %s3730_s25  ;;  %v3469_v39 = vpack.i.bf16 %v637_v42, %v636_v34 }
  0xc7   : > { %v4227_v20 = vpop.permute.xlu1 %3160 }
  0xc8   : > { %v4229_v32 = vpop.permute.xlu0 %3165 }
  0xc9   : > { %3450 = vrot.lane.b32.xlu1 %v4018_v44, %s3730_s25 }
  0xca   : > { %3455 = vrot.lane.b32.xlu0 %v3429_v10, %s3725_s6  ;;  %v3133_v10 = vunpack.i.h.bf16 %v4202_v31 }
  0xcb   : > { %v4234_v36 = vpop.permute.xlu1 %3170 }
  0xcc   : > { %v4236_v38 = vpop.permute.xlu0 %3175 }
  0xcd   : > { %4857 = vst [vmem:[#allocation9_spill] sm:$0xff] %v4236_v38  ;;  %3460 = vrot.lane.b32.xlu1 %v3459_v16, %s3725_s6 }
  0xce   : > { %3465 = vrot.lane.b32.xlu0 %v3464_v33, %s3726_s13  ;;  %v4271_v33 = vld [vmem:[#allocation2 + $0x170] sm:$0xff] }
  0xcf   : > { %v4240_v29 = vpop.permute.xlu1 %3180  ;;  %v1834_v49 = vsel %vm411_vm0, %v4271_v33, %v3133_v10 }
  0xd0   : > { %4858 = vst [vmem:[#allocation10_spill] sm:$0xff] %v4240_v29  ;;  %v4242_v40 = vpop.permute.xlu0 %3185 }
  0xd1   : > { %4859 = vst [vmem:[#allocation11_spill] sm:$0xff] %v4242_v40  ;;  %3470 = vrot.lane.b32.xlu1 %v3469_v39, %s3726_s13  ;;  %v3137_v40 = vunpack.i.l.bf16 %v4206_v6 }
  0xd2   : > { %3475 = vrot.lane.b32.xlu0 %v4018_v44, %s3727_s16  ;;  %v4258_v44 = vld [vmem:[#allocation2 + $0x158] sm:$0xff] }
  0xd3   : > { %v4247_v41 = vpop.permute.xlu1 %3190  ;;  %v1832_v59 = vsel %vm411_vm0, %v4258_v44, %v3128_v51 }
  0xd4   : > { %4860 = vst [vmem:[#allocation12_spill] sm:$0xff] %v4247_v41  ;;  %v4249_v46 = vpop.permute.xlu0 %3195  ;;  %v3063_v41 = vunpack.i.h.bf16 %v4149_v30 }
  0xd5   : > { %4861 = vst [vmem:[#allocation13_spill] sm:$0xff] %v4249_v46  ;;  %3480 = vrot.lane.b32.xlu1 %v4022_v45, %s3727_s16  ;;  %v645_v46 = vld [vmem:[#allocation2 + $0x159] sm:$0xff] }
  0xd6   : > { %3485 = vrot.lane.b32.xlu0 %v3459_v16, %s3728_s22  ;;  %v4269_v16 = vld [vmem:[#allocation2 + $0x168] sm:$0xff] }
  0xd7   : > { %v4260_v55 = vpop.permute.xlu1 %3200  ;;  %v1833_v51 = vsel %vm411_vm0, %v4269_v16, %v3132_v24  ;;  %v640_v24 = vld [vmem:[#allocation2 + $0x121] sm:$0xff] }
  0xd8   : > { %4862 = vst [vmem:[#allocation14_spill] sm:$0xff] %v4260_v55  ;;  %v3206_v57 = vpop.permute.xlu0 %3205  ;;  %v770_v55 = vld [vmem:[#allocation2 + $0x142] sm:$0xff] }
  0xd9   : > { %v3208_v25 = vunpack.i.h.bf16 %v3206_v57  ;;  %v3207_v26 = vunpack.i.l.bf16 %v3206_v57  ;;  %3490 = vrot.lane.b32.xlu1 %v3489_v47, %s3728_s22 }
  0xda   : > { %3495 = vrot.lane.b32.xlu0 %v3469_v39, %s3729_s23 }
  0xdb   : > { %v4275_v34 = vsel %vm1835_vm4, %v1831_v27, %v3207_v26  ;;  %v4278_v31 = vsel %vm1835_vm4, %v1832_v59, %v3208_v25  ;;  %v3211_v42 = vpop.permute.xlu1 %3210  ;;  %v514_v25 = vld [vmem:[#allocation2 + $0x120] sm:$0xff]  ;;  %v515_v26 = vld [vmem:[#allocation2 + $0x128] sm:$0xff] }
  0xdc   : > { %4863 = vst [vmem:[#allocation15_spill] sm:$0xff] %v4275_v34  ;;  %4864 = vst [vmem:[#allocation16_spill] sm:$0xff] %v4278_v31  ;;  %v3213_v14 = vunpack.i.h.bf16 %v3211_v42  ;;  %v3212_v43 = vunpack.i.l.bf16 %v3211_v42  ;;  %v4280_v48 = vpop.permute.xlu0 %3215  ;;  %v3519_v10 = vpack.i.bf16 %v515_v26, %v514_v25  ;;  %v641_v27 = vld [vmem:[#allocation2 + $0x129] sm:$0xff]  ;;  %v516_v26 = vld [vmem:[#allocation2 + $0x138] sm:$0xff] }
  0xdd   : > { %3500 = vrot.lane.b32.xlu1 %v3499_v62, %s3729_s23  ;;  %v738_v31 = vld [vmem:[#allocation2 + $0x141] sm:$0xff]  ;;  %v3218_v38 = vunpack.i.h.bf16 %v4280_v48 }
  0xde   : > { %v4288_v39 = vsel %vm1835_vm4, %v1834_v49, %v3213_v14  ;;  %v4291_v22 = vsel %vm1835_vm4, %v1833_v51, %v3212_v43  ;;  %3505 = vrot.lane.b32.xlu0 %v4022_v45, %s3730_s25  ;;  %v3529_v45 = vpack.i.bf16 %v641_v27, %v640_v24  ;;  %v672_v43 = vld [vmem:[#allocation2 + $0x122] sm:$0xff]  ;;  %v673_v49 = vld [vmem:[#allocation2 + $0x12a] sm:$0xff]  ;;  %v769_v34 = vld [vmem:[#allocation2 + $0x13a] sm:$0xff] }
  0xdf   : > { %4865 = vst [vmem:[#allocation17_spill] sm:$0xff] %v4288_v39  ;;  %4866 = vst [vmem:[#allocation18_spill] sm:$0xff] %v4291_v22  ;;  %v4295_v57 = vpop.permute.xlu1 %3220  ;;  %v517_v22 = vld [vmem:[#allocation2 + $0x140] sm:$0xff]  ;;  %v4336_v29 = vpack.i.bf16 %v770_v55, %v769_v34 }
  0xe0   : > { %v4297_v59 = vpop.permute.xlu0 %3225  ;;  %v4323_v27 = vpack.i.bf16 %v517_v22, %v516_v26  ;;  %v3062_v22 = vunpack.i.l.bf16 %v4149_v30  ;;  %v3138_v26 = vunpack.i.h.bf16 %v4206_v6  ;;  %v3217_v30 = vunpack.i.l.bf16 %v4280_v48 }
  0xe1   : > { %3510 = vrot.lane.b32.xlu1 %v4026_v50, %s3730_s25  ;;  %v4344_v6 = vpack.i.bf16 %v4258_v44, %v4256_v54  ;;  %v3223_v55 = vunpack.i.h.bf16 %v4295_v57  ;;  %v3222_v34 = vunpack.i.l.bf16 %v4295_v57  ;;  %v1806_v54 = vsel %vm411_vm0, %v4035_v61, %v3063_v41 }
  0xe2   : > { %3515 = vrot.lane.b32.xlu0 %v3489_v47, %s3725_s6  ;;  %v4313_v47 = vpack.i.bf16 %v673_v49, %v672_v43  ;;  %v3058_v43 = vunpack.i.h.bf16 %v4137_v1  ;;  %v3057_v49 = vunpack.i.l.bf16 %v4137_v1  ;;  %v3143_v1 = vunpack.i.h.bf16 %v4212_v7 }
  0xe3   : > { %v4302_v42 = vpop.permute.xlu1 %3230  ;;  %v1805_v48 = vsel %vm411_vm0, %v4033_v60, %v3062_v22 }
  0xe4   : > { %v4304_v14 = vpop.permute.xlu0 %3235  ;;  %v1804_v7 = vsel %vm411_vm0, %v491_v9, %v3058_v43 }
  0xe5   : > { %3520 = vrot.lane.b32.xlu1 %v3519_v10, %s3725_s6 }
  0xe6   : > { %3525 = vrot.lane.b32.xlu0 %v3499_v62, %s3726_s13  ;;  %v737_v62 = vld [vmem:[#allocation2 + $0x139] sm:$0xff] }
  0xe7   : > { %v4308_v51 = vpop.permute.xlu1 %3240 }
  0xe8   : > { %v4310_v39 = vpop.permute.xlu0 %3245 }
  0xe9   : > { %3530 = vrot.lane.b32.xlu1 %v3529_v45, %s3726_s13 }
  0xea   : > { %3535 = vrot.lane.b32.xlu0 %v4026_v50, %s3727_s16  ;;  %v644_v50 = vld [vmem:[#allocation2 + $0x151] sm:$0xff] }
  0xeb   : > { %v4317_v25 = vpop.permute.xlu1 %3250  ;;  %v4346_v28 = vpack.i.bf16 %v645_v46, %v644_v50  ;;  %v1837_v46 = vsel %vm1835_vm4, %v1804_v7, %v3138_v26 }
  0xec   : > { %v4319_v24 = vpop.permute.xlu0 %3255  ;;  %v3253_v57 = vunpack.i.h.bf16 %v4317_v25 }
  0xed   : > { %3540 = vrot.lane.b32.xlu1 %v4313_v47, %s3727_s16  ;;  %v3258_v61 = vunpack.i.h.bf16 %v4319_v24  ;;  %v3257_v41 = vunpack.i.l.bf16 %v4319_v24 }
  0xee   : > { %3545 = vrot.lane.b32.xlu0 %v3519_v10, %s3728_s22  ;;  %v4334_v10 = vpack.i.bf16 %v738_v31, %v737_v62  ;;  %v1803_v31 = vsel %vm411_vm0, %v490_v58, %v3057_v49  ;;  %v1838_v58 = vsel %vm1835_vm4, %v1805_v48, %v3142_v53  ;;  %v1839_v62 = vsel %vm1835_vm4, %v1806_v54, %v3143_v1 }
  0xef   : > { %v3261_v56 = vpop.permute.xlu1 %3260  ;;  %v1836_v44 = vsel %vm1835_vm4, %v1803_v31, %v3137_v40  ;;  %v1870_v49 = vsel %vm1868_vm5, %v1837_v46, %v3218_v38  ;;  %v1871_v53 = vsel %vm1868_vm5, %v1838_v58, %v3222_v34  ;;  %v1872_v40 = vsel %vm1868_vm5, %v1839_v62, %v3223_v55 }
  0xf0   : > { %v3266_v63 = vpop.permute.xlu0 %3265  ;;  %v1869_v60 = vsel %vm1868_vm5, %v1836_v44, %v3217_v30  ;;  %v3263_v50 = vunpack.i.h.bf16 %v3261_v56  ;;  %v3262_v22 = vunpack.i.l.bf16 %v3261_v56  ;;  %v1903_v7 = vsel %vm1901_vm6, %v1870_v49, %v3253_v57 }
  0xf1   : > { %3550 = vrot.lane.b32.xlu1 %v4323_v27, %s3728_s22  ;;  %v3267_v26 = vunpack.i.l.bf16 %v3266_v63  ;;  %v1904_v55 = vsel %vm1901_vm6, %v1871_v53, %v3257_v41  ;;  %v1905_v56 = vsel %vm1901_vm6, %v1872_v40, %v3258_v61 }
  0xf2   : > { %3555 = vrot.lane.b32.xlu0 %v3529_v45, %s3729_s23  ;;  %v3252_v45 = vunpack.i.l.bf16 %v4317_v25  ;;  %v3268_v25 = vunpack.i.h.bf16 %v3266_v63 }
  0xf3   : > { %v3271_v9 = vpop.permute.xlu1 %3270  ;;  %v1937_v58 = vsel %vm1934_vm7, %v1904_v55, %v3267_v26 }
  0xf4   : > { %v3276_v43 = vpop.permute.xlu0 %3275  ;;  %v3273_v38 = vunpack.i.h.bf16 %v3271_v9  ;;  %v3272_v1 = vunpack.i.l.bf16 %v3271_v9  ;;  %v1902_v24 = vsel %vm1901_vm6, %v1869_v60, %v3252_v45  ;;  %v1938_v62 = vsel %vm1934_vm7, %v1905_v56, %v3268_v25 }
  0xf5   : > { %3560 = vrot.lane.b32.xlu1 %v4334_v10, %s3729_s23  ;;  %v3278_v31 = vunpack.i.h.bf16 %v3276_v43  ;;  %v3277_v48 = vunpack.i.l.bf16 %v3276_v43  ;;  %v1935_v63 = vsel %vm1934_vm7, %v1902_v24, %v3262_v22  ;;  %v677_v24 = vld [vmem:[#allocation2 + $0x15a] sm:$0xff] }
  0xf6   : > { %3565 = vrot.lane.b32.xlu0 %v4313_v47, %s3730_s25  ;;  %v1936_v47 = vsel %vm1934_vm7, %v1903_v7, %v3263_v50  ;;  %v1968_v57 = vsel %vm1967_vm8, %v1935_v63, %v3272_v1  ;;  %v773_v63 = vld [vmem:[#allocation2 + $0x16a] sm:$0xff] }
  0xf7   : > { %v3281_v30 = vpop.permute.xlu1 %3280  ;;  %v1969_v45 = vsel %vm1967_vm8, %v1936_v47, %v3273_v38  ;;  %v1970_v60 = vsel %vm1967_vm8, %v1937_v58, %v3277_v48  ;;  %v1971_v49 = vsel %vm1967_vm8, %v1938_v62, %v3278_v31  ;;  %v3068_v47 = vunpack.i.h.bf16 %v4145_v12  ;;  %v616_v58 = vld [vmem:[#allocation2 + $0x180] sm:$0xff]  ;;  %v617_v62 = vld [vmem:[#allocation2 + $0x188] sm:$0xff] }
  0xf8   : > { %v3286_v34 = vpop.permute.xlu0 %3285  ;;  %v3283_v54 = vunpack.i.h.bf16 %v3281_v30  ;;  %v3282_v46 = vunpack.i.l.bf16 %v3281_v30  ;;  %v676_v30 = vld [vmem:[#allocation2 + $0x152] sm:$0xff] }
  0xf9   : > { %3570 = vrot.lane.b32.xlu1 %v4336_v29, %s3730_s25  ;;  %v3288_v44 = vunpack.i.h.bf16 %v3286_v34  ;;  %v3287_v9 = vunpack.i.l.bf16 %v3286_v34 }
  0xfa   : > { %3575 = vrot.lane.b32.xlu0 %v4323_v27, %s3725_s6  ;;  %v2001_v27 = vsel %vm2000_vm9, %v1968_v57, %v3282_v46  ;;  %v2002_v22 = vsel %vm2000_vm9, %v1969_v45, %v3283_v54  ;;  %v741_v54 = vld [vmem:[#allocation2 + $0x169] sm:$0xff]  ;;  %v742_v46 = vld [vmem:[#allocation2 + $0x171] sm:$0xff]  ;;  %v3073_v57 = vunpack.i.h.bf16 %v4153_v15  ;;  %v3072_v45 = vunpack.i.l.bf16 %v4153_v15 }
  0xfb   : > { %v3291_v43 = vpop.permute.xlu1 %3290  ;;  %v2003_v25 = vsel %vm2000_vm9, %v1970_v60, %v3287_v9  ;;  %v2004_v26 = vsel %vm2000_vm9, %v1971_v49, %v3288_v44  ;;  %v3067_v44 = vunpack.i.l.bf16 %v4145_v12  ;;  %v774_v9 = vld [vmem:[#allocation2 + $0x172] sm:$0xff]  ;;  %v3147_v60 = vunpack.i.l.bf16 %v4214_v18 }
  0xfc   : > { %v3293_v61 = vunpack.i.h.bf16 %v3291_v43  ;;  %v3292_v41 = vunpack.i.l.bf16 %v3291_v43  ;;  %v3296_v53 = vpop.permute.xlu0 %3295  ;;  %v3148_v43 = vunpack.i.h.bf16 %v4214_v18  ;;  %v3152_v12 = vunpack.i.l.bf16 %v4219_v37 }
  0xfd   : > { %v3298_v40 = vunpack.i.h.bf16 %v3296_v53  ;;  %v3297_v50 = vunpack.i.l.bf16 %v3296_v53  ;;  %3580 = vrot.lane.b32.xlu1 %v4344_v6, %s3725_s6  ;;  %v4425_v53 = vpack.i.bf16 %v742_v46, %v741_v54  ;;  %v3227_v15 = vunpack.i.l.bf16 %v4297_v59 }
  0xfe   : > { %3585 = vrot.lane.b32.xlu0 %v4334_v10, %s3726_s13  ;;  %v2034_v38 = vsel %vm2033_vm10, %v2001_v27, %v3292_v41  ;;  %v2035_v1 = vsel %vm2033_vm10, %v2002_v22, %v3293_v61  ;;  %v4408_v10 = vpack.i.bf16 %v677_v24, %v676_v30  ;;  %v3153_v61 = vunpack.i.h.bf16 %v4219_v37 }
  0xff   : > { %v2036_v7 = vsel %vm2033_vm10, %v2003_v25, %v3297_v50  ;;  %v2037_v31 = vsel %vm2033_vm10, %v2004_v26, %v3298_v40  ;;  %v4401_v48 = vpop.permute.xlu1 %3300  ;;  %v2066_v34 = vpack.c.bf16 %v2035_v1, %v2034_v38  ;;  %v3228_v40 = vunpack.i.h.bf16 %v4297_v59 }
 0x100   : > { %v2067_v55 = vpack.c.bf16 %v2037_v31, %v2036_v7  ;;  %v4403_v56 = vpop.permute.xlu0 %3305  ;;  %v4431_v18 = vpack.i.bf16 %v774_v9, %v773_v63  ;;  %v4433_v50 = vpack.i.bf16 %v617_v62, %v616_v58  ;;  %v1807_v37 = vsel %vm411_vm0, %v4041_v0, %v3067_v44 }
 0x101   : > { %3590 = vrot.lane.b32.xlu1 %v4346_v28, %s3726_s13  ;;  %2993 = vmatprep.mubr.msk.bf16.mxu0 %vm2118_vm11, %v2066_v34  ;;  %v3232_v27 = vunpack.i.l.bf16 %v4302_v42  ;;  %v1810_v59 = vsel %vm411_vm0, %v4047_v5, %v3073_v57  ;;  %v1809_v22 = vsel %vm411_vm0, %v4045_v4, %v3072_v45  ;;  %v1840_v0 = vsel %vm1835_vm4, %v1807_v37, %v3147_v60 }
 0x102   : > { %3595 = vrot.lane.b32.xlu0 %v4336_v29, %s3727_s16  ;;  %2994 = vmatmul.mubr.msk.bf16.vlgmr.msra.gmra.mrb[0].mxu0 %vm2118_vm11, %v2067_v55  ;;  %v4423_v29 = vpack.i.bf16 %v4271_v33, %v4269_v16  ;;  %v1808_v16 = vsel %vm411_vm0, %v4043_v3, %v3068_v47  ;;  %v3233_v33 = vunpack.i.h.bf16 %v4302_v42  ;;  %v1843_v3 = vsel %vm1835_vm4, %v1810_v59, %v3153_v61 }
 0x103   : > { %v3311_v49 = vpop.permute.xlu1 %3310  ;;  %v1841_v25 = vsel %vm1835_vm4, %v1808_v16, %v3148_v43  ;;  %v1842_v38 = vsel %vm1835_vm4, %v1809_v22, %v3152_v12  ;;  %v3303_v42 = vunpack.i.h.bf16 %v4401_v48  ;;  %v3302_v1 = vunpack.i.l.bf16 %v4401_v48 }
 0x104   : > { %v3316_v41 = vpop.permute.xlu0 %3315  ;;  %v1873_v30 = vsel %vm1868_vm5, %v1840_v0, %v3227_v15  ;;  %v1874_v5 = vsel %vm1868_vm5, %v1841_v25, %v3228_v40  ;;  %v3308_v4 = vunpack.i.h.bf16 %v4403_v56  ;;  %v3307_v24 = vunpack.i.l.bf16 %v4403_v56 }
 0x105   : > { %3600 = vrot.lane.b32.xlu1 %v4408_v10, %s3727_s16  ;;  %v1875_v7 = vsel %vm1868_vm5, %v1842_v38, %v3232_v27  ;;  %v1876_v31 = vsel %vm1868_vm5, %v1843_v3, %v3233_v33  ;;  %v3313_v34 = vunpack.i.h.bf16 %v3311_v49  ;;  %v3312_v55 = vunpack.i.l.bf16 %v3311_v49 }
 0x106   : > { %3605 = vrot.lane.b32.xlu0 %v4344_v6, %s3728_s22  ;;  %v3318_v48 = vunpack.i.h.bf16 %v3316_v41  ;;  %v3317_v54 = vunpack.i.l.bf16 %v3316_v41  ;;  %v1906_v44 = vsel %vm1901_vm6, %v1873_v30, %v3302_v1  ;;  %v1907_v56 = vsel %vm1901_vm6, %v1874_v5, %v3303_v42  ;;  %v648_v30 = vld [vmem:[#allocation2 + $0x181] sm:$0xff]  ;;  %v649_v5 = vld [vmem:[#allocation2 + $0x189] sm:$0xff] }
 0x107   : > { %v3321_v26 = vpop.permute.xlu1 %3320  ;;  %v1909_v57 = vsel %vm1901_vm6, %v1876_v31, %v3308_v4  ;;  %v1908_v45 = vsel %vm1901_vm6, %v1875_v7, %v3307_v24  ;;  %v1940_v49 = vsel %vm1934_vm7, %v1907_v56, %v3313_v34  ;;  %v3083_v56 = vunpack.i.h.bf16 %v4161_v21 }
 0x108   : > { %v3326_v6 = vpop.permute.xlu0 %3325  ;;  %v3323_v46 = vunpack.i.h.bf16 %v3321_v26  ;;  %v3322_v63 = vunpack.i.l.bf16 %v3321_v26  ;;  %v1941_v41 = vsel %vm1934_vm7, %v1908_v45, %v3317_v54  ;;  %v1942_v40 = vsel %vm1934_vm7, %v1909_v57, %v3318_v48  ;;  %v680_v48 = vld [vmem:[#allocation2 + $0x182] sm:$0xff] }
 0x109   : > { %3610 = vrot.lane.b32.xlu1 %v4423_v29, %s3728_s22  ;;  %v3328_v9 = vunpack.i.h.bf16 %v3326_v6  ;;  %v3327_v58 = vunpack.i.l.bf16 %v3326_v6  ;;  %v3078_v54 = vunpack.i.h.bf16 %v4157_v35  ;;  %v3158_v57 = vunpack.i.h.bf16 %v4221_v19 }
 0x10a   : > { %3615 = vrot.lane.b32.xlu0 %v4346_v28, %s3729_s23  ;;  %v1939_v28 = vsel %vm1934_vm7, %v1906_v44, %v3312_v55  ;;  %v1973_v37 = vsel %vm1967_vm8, %v1940_v49, %v3323_v46  ;;  %v681_v46 = vld [vmem:[#allocation2 + $0x18a] sm:$0xff]  ;;  %v3077_v44 = vunpack.i.l.bf16 %v4157_v35  ;;  %v3157_v45 = vunpack.i.l.bf16 %v4221_v19 }
 0x10b   : > { %v3331_v47 = vpop.permute.xlu1 %3330  ;;  %v1972_v15 = vsel %vm1967_vm8, %v1939_v28, %v3322_v63  ;;  %v1974_v33 = vsel %vm1967_vm8, %v1941_v41, %v3327_v58  ;;  %v1975_v27 = vsel %vm1967_vm8, %v1942_v40, %v3328_v9  ;;  %v4501_v63 = vld [vmem:[#allocation2 + $0x198] sm:$0xff]  ;;  %v4510_v58 = vld [vmem:[#allocation2 + $0x1a1] sm:$0xff]  ;;  %v3163_v35 = vunpack.i.h.bf16 %v4227_v20 }
 0x10c   : > { %v3336_v62 = vpop.permute.xlu0 %3335  ;;  %v3333_v43 = vunpack.i.h.bf16 %v3331_v47  ;;  %v3332_v60 = vunpack.i.l.bf16 %v3331_v47  ;;  %v714_v47 = vld [vmem:[#allocation2 + $0x1a0] sm:$0xff]  ;;  %v4517_v49 = vpack.i.bf16 %v681_v46, %v680_v48  ;;  %v3238_v41 = vunpack.i.h.bf16 %v4304_v14 }
 0x10d   : > { %3620 = vrot.lane.b32.xlu1 %v4425_v53, %s3729_s23  ;;  %v3338_v61 = vunpack.i.h.bf16 %v3336_v62  ;;  %v3337_v12 = vunpack.i.l.bf16 %v3336_v62  ;;  %v4508_v9 = vld [vmem:[#allocation2 + $0x199] sm:$0xff]  ;;  %v3082_v62 = vunpack.i.l.bf16 %v4161_v21  ;;  %v1812_v21 = vsel %vm411_vm0, %v4057_v11, %v3078_v54 }
 0x10e   : > { %3625 = vrot.lane.b32.xlu0 %v4408_v10, %s3730_s25  ;;  %v2005_v0 = vsel %vm2000_vm9, %v1972_v15, %v3332_v60  ;;  %v2006_v10 = vsel %vm2000_vm9, %v1973_v37, %v3333_v43  ;;  %v3162_v60 = vunpack.i.l.bf16 %v4227_v20  ;;  %v3237_v19 = vunpack.i.l.bf16 %v4304_v14 }
 0x10f   : > { %v3341_v16 = vpop.permute.xlu1 %3340  ;;  %v2007_v38 = vsel %vm2000_vm9, %v1974_v33, %v3337_v12  ;;  %v2008_v42 = vsel %vm2000_vm9, %v1975_v27, %v3338_v61  ;;  %v4520_v61 = vld [vmem:[#allocation2 + $0x19a] sm:$0xff]  ;;  %v4522_v12 = vld [vmem:[#allocation2 + $0x1a2] sm:$0xff]  ;;  %v3679_v20 = vpack.i.bf16 %v4510_v58, %v4508_v9  ;;  %v1811_v40 = vsel %vm411_vm0, %v4055_v8, %v3077_v44 }
 0x110   : > { %v3343_v59 = vunpack.i.h.bf16 %v3341_v16  ;;  %v3342_v22 = vunpack.i.l.bf16 %v3341_v16  ;;  %v3346_v25 = vpop.permute.xlu0 %3345  ;;  %v1814_v15 = vsel %vm411_vm0, %v4061_v17, %v3083_v56  ;;  %v3243_v37 = vunpack.i.h.bf16 %v4308_v51 }
 0x111   : > { %v3348_v26 = vunpack.i.h.bf16 %v3346_v25  ;;  %v3347_v3 = vunpack.i.l.bf16 %v3346_v25  ;;  %3630 = vrot.lane.b32.xlu1 %v4431_v18, %s3730_s25  ;;  %v3242_v11 = vunpack.i.l.bf16 %v4308_v51  ;;  %v1813_v14 = vsel %vm411_vm0, %v4059_v13, %v3082_v62 }
 0x112   : > { %v2038_v1 = vsel %vm2033_vm10, %v2005_v0, %v3342_v22  ;;  %v2039_v6 = vsel %vm2033_vm10, %v2006_v10, %v3343_v59  ;;  %3635 = vrot.lane.b32.xlu0 %v4423_v29, %s3725_s6  ;;  %v4499_v29 = vpack.i.bf16 %v649_v5, %v648_v30  ;;  %v1844_v16 = vsel %vm1835_vm4, %v1811_v40, %v3157_v45 }
 0x113   : > { %v2068_v4 = vpack.c.bf16 %v2039_v6, %v2038_v1  ;;  %v2040_v24 = vsel %vm2033_vm10, %v2007_v38, %v3347_v3  ;;  %v2041_v7 = vsel %vm2033_vm10, %v2008_v42, %v3348_v26  ;;  %v4491_v31 = vpop.permute.xlu1 %3350  ;;  %v1845_v33 = vsel %vm1835_vm4, %v1812_v21, %v3158_v57 }
 0x114   : > { %v2069_v34 = vpack.c.bf16 %v2041_v7, %v2040_v24  ;;  %v4493_v55 = vpop.permute.xlu0 %3355  ;;  %v3689_v8 = vpack.i.bf16 %v4522_v12, %v4520_v61  ;;  %v1847_v17 = vsel %vm1835_vm4, %v1814_v15, %v3163_v35  ;;  %v1846_v59 = vsel %vm1835_vm4, %v1813_v14, %v3162_v60 }
 0x115   : > { %3640 = vrot.lane.b32.xlu1 %v4433_v50, %s3725_s6  ;;  %2997 = vmatprep.mubr.msk.bf16.mxu0 %vm2118_vm11, %v2068_v4  ;;  %v3353_v51 = vunpack.i.h.bf16 %v4491_v31  ;;  %v3352_v22 = vunpack.i.l.bf16 %v4491_v31  ;;  %v1877_v25 = vsel %vm1868_vm5, %v1844_v16, %v3237_v19  ;;  %v1878_v13 = vsel %vm1868_vm5, %v1845_v33, %v3238_v41 }
 0x116   : > { %3645 = vrot.lane.b32.xlu0 %v4425_v53, %s3726_s13  ;;  %2998 = vmatmul.mubr.msk.bf16.gmra.mrb[4].mxu0 %vm2118_vm11, %v2069_v34  ;;  %v3669_v53 = vpack.i.bf16 %v714_v47, %v4501_v63  ;;  %v3358_v0 = vunpack.i.h.bf16 %v4493_v55  ;;  %v3357_v10 = vunpack.i.l.bf16 %v4493_v55  ;;  %v1879_v26 = vsel %vm1868_vm5, %v1846_v59, %v3242_v11 }
 0x117   : > { %v3361_v43 = vpop.permute.xlu1 %3360  ;;  %v1880_v3 = vsel %vm1868_vm5, %v1847_v17, %v3243_v37  ;;  %v1910_v24 = vsel %vm1901_vm6, %v1877_v25, %v3352_v22  ;;  %v1911_v7 = vsel %vm1901_vm6, %v1878_v13, %v3353_v51  ;;  %v3088_v17 = vunpack.i.h.bf16 %v4165_v23 }
 0x118   : > { %v3366_v28 = vpop.permute.xlu0 %3365  ;;  %v3363_v38 = vunpack.i.h.bf16 %v3361_v43  ;;  %v3362_v42 = vunpack.i.l.bf16 %v3361_v43  ;;  %v1913_v48 = vsel %vm1901_vm6, %v1880_v3, %v3358_v0  ;;  %v1912_v54 = vsel %vm1901_vm6, %v1879_v26, %v3357_v10  ;;  %v3699_v26 = vld [vmem:[#allocation2 + $0x98] sm:$0xff] }
 0x119   : > { %3650 = vrot.lane.b32.xlu1 %v4499_v29, %s3726_s13  ;;  %v3368_v1 = vunpack.i.h.bf16 %v3366_v28  ;;  %v3367_v6 = vunpack.i.l.bf16 %v3366_v28  ;;  %v3093_v59 = vunpack.i.h.bf16 %v4169_v2  ;;  %v3092_v22 = vunpack.i.l.bf16 %v4169_v2 }
 0x11a   : > { %3655 = vrot.lane.b32.xlu0 %v4431_v18, %s3727_s16  ;;  %v1944_v47 = vsel %vm1934_vm7, %v1911_v7, %v3363_v38  ;;  %v3167_v25 = vunpack.i.l.bf16 %v4229_v32  ;;  %v3172_v13 = vunpack.i.l.bf16 %v4234_v36  ;;  %v3247_v0 = vunpack.i.l.bf16 %v4310_v39 }
 0x11b   : > { %v3371_v27 = vpop.permute.xlu1 %3370  ;;  %v1945_v9 = vsel %vm1934_vm7, %v1912_v54, %v3367_v6  ;;  %v1946_v58 = vsel %vm1934_vm7, %v1913_v48, %v3368_v1  ;;  %v1816_v3 = vsel %vm411_vm0, %v3699_v26, %v3088_v17  ;;  %v3248_v1 = vunpack.i.h.bf16 %v4310_v39 }
 0x11c   : > { %v3376_v18 = vpop.permute.xlu0 %3375  ;;  %v3373_v30 = vunpack.i.h.bf16 %v3371_v27  ;;  %v3372_v5 = vunpack.i.l.bf16 %v3371_v27 }
 0x11d   : > { %3660 = vrot.lane.b32.xlu1 %v4517_v49, %s3727_s16  ;;  %v3378_v31 = vunpack.i.h.bf16 %v3376_v18  ;;  %v3377_v34 = vunpack.i.l.bf16 %v3376_v18  ;;  %v3168_v18 = vunpack.i.h.bf16 %v4229_v32 }
 0x11e   : > { %3665 = vrot.lane.b32.xlu0 %v4433_v50, %s3728_s22  ;;  %v1943_v50 = vsel %vm1934_vm7, %v1910_v24, %v3362_v42  ;;  %v1977_v57 = vsel %vm1967_vm8, %v1944_v47, %v3373_v30  ;;  %v3701_v42 = vld [vmem:[#allocation2 + $0xb0] sm:$0xff] }
 0x11f   : > { %v3381_v4 = vpop.permute.xlu1 %3380  ;;  %v1976_v62 = vsel %vm1967_vm8, %v1943_v50, %v3372_v5  ;;  %v1978_v43 = vsel %vm1967_vm8, %v1945_v9, %v3377_v34  ;;  %v1979_v35 = vsel %vm1967_vm8, %v1946_v58, %v3378_v31  ;;  %v1818_v2 = vsel %vm411_vm0, %v3701_v42, %v3093_v59 }
 0x120   : > { %v3386_v55 = vpop.permute.xlu0 %3385  ;;  %v3383_v46 = vunpack.i.h.bf16 %v3381_v4  ;;  %v3382_v63 = vunpack.i.l.bf16 %v3381_v4  ;;  %v1849_v31 = vsel %vm1835_vm4, %v1816_v3, %v3168_v18 }
 0x121   : > { %3670 = vrot.lane.b32.xlu1 %v3669_v53, %s3728_s22  ;;  %v3388_v44 = vunpack.i.h.bf16 %v3386_v55  ;;  %v3387_v56 = vunpack.i.l.bf16 %v3386_v55 }
 0x122   : > { %3675 = vrot.lane.b32.xlu0 %v4499_v29, %s3729_s23  ;;  %v2009_v61 = vsel %vm2000_vm9, %v1976_v62, %v3382_v63  ;;  %v2010_v29 = vsel %vm2000_vm9, %v1977_v57, %v3383_v46  ;;  %v1882_v63 = vsel %vm1868_vm5, %v1849_v31, %v3248_v1 }
 0x123   : > { %v3391_v45 = vpop.permute.xlu1 %3390  ;;  %v2011_v41 = vsel %vm2000_vm9, %v1978_v43, %v3387_v56  ;;  %v2012_v19 = vsel %vm2000_vm9, %v1979_v35, %v3388_v44 }
 0x124   : > { %v3393_v60 = vunpack.i.h.bf16 %v3391_v45  ;;  %v3392_v28 = vunpack.i.l.bf16 %v3391_v45  ;;  %v3396_v53 = vpop.permute.xlu0 %3395 }
 0x125   : > { %v3398_v12 = vunpack.i.h.bf16 %v3396_v53  ;;  %v3397_v21 = vunpack.i.l.bf16 %v3396_v53  ;;  %3680 = vrot.lane.b32.xlu1 %v3679_v20, %s3729_s23 }
 0x126   : > { %v2042_v40 = vsel %vm2033_vm10, %v2009_v61, %v3392_v28  ;;  %v2043_v15 = vsel %vm2033_vm10, %v2010_v29, %v3393_v60  ;;  %3685 = vrot.lane.b32.xlu0 %v4517_v49, %s3730_s25  ;;  %v3087_v49 = vunpack.i.l.bf16 %v4165_v23  ;;  %v3700_v23 = vld [vmem:[#allocation2 + $0x90] sm:$0xff] }
 0x127   : > { %v2070_v37 = vpack.c.bf16 %v2043_v15, %v2042_v40  ;;  %v2044_v11 = vsel %vm2033_vm10, %v2011_v41, %v3397_v21  ;;  %v2045_v14 = vsel %vm2033_vm10, %v2012_v19, %v3398_v12  ;;  %v3401_v16 = vpop.permute.xlu1 %3400 }
 0x128   : > { %v2071_v33 = vpack.c.bf16 %v2045_v14, %v2044_v11  ;;  %v3406_v27 = vpop.permute.xlu0 %3405  ;;  %v1815_v38 = vsel %vm411_vm0, %v3700_v23, %v3087_v49  ;;  %v3403_v32 = vunpack.i.h.bf16 %v3401_v16  ;;  %v3402_v30 = vunpack.i.l.bf16 %v3401_v16 }
 0x129   : > { %3690 = vrot.lane.b32.xlu1 %v3689_v8, %s3730_s25  ;;  %3001 = vmatprep.mubr.msk.bf16.mxu0 %vm2118_vm11, %v2070_v37  ;;  %v3173_v8 = vunpack.i.h.bf16 %v4234_v36  ;;  %v3408_v5 = vunpack.i.h.bf16 %v3406_v27  ;;  %v3407_v4 = vunpack.i.l.bf16 %v3406_v27  ;;  %v3702_v36 = vld [vmem:[#allocation2 + $0xa8] sm:$0xff]  ;;  %v1848_v7 = vsel %vm1835_vm4, %v1815_v38, %v3167_v25 }
 0x12a   : > { %3002 = vmatmul.mubr.msk.bf16.gmra.mrb[8].mxu0 %vm2118_vm11, %v2071_v33  ;;  %v1817_v24 = vsel %vm411_vm0, %v3702_v36, %v3092_v22  ;;  %v1881_v48 = vsel %vm1868_vm5, %v1848_v7, %v3247_v0  ;;  %v4868_v7 = vld [vmem:[#allocation9_spill] sm:$0xff] }
 0x12b   : > { %v4589_v20 = vpop.permute.xlu1 %3410  ;;  %v1851_v34 = vsel %vm1835_vm4, %v1818_v2, %v3173_v8  ;;  %v1850_v55 = vsel %vm1835_vm4, %v1817_v24, %v3172_v13  ;;  %v1914_v62 = vsel %vm1901_vm6, %v1881_v48, %v3407_v4  ;;  %v1915_v57 = vsel %vm1901_vm6, %v1882_v63, %v3408_v5  ;;  %v4867_v5 = vld [vmem:[#allocation3_spill] sm:$0xff]  ;;  %v3703_v63 = vld [vmem:[#allocation2 + $0xc8] sm:$0xff] }
 0x12c   : > { %v3416_v51 = vpop.permute.xlu0 %3415  ;;  %v3412_v50 = vunpack.i.l.bf16 %v4589_v20  ;;  %v1883_v9 = vsel %vm1868_vm5, %v1850_v55, %v3402_v30  ;;  %v1884_v58 = vsel %vm1868_vm5, %v1851_v34, %v3403_v32  ;;  %v3413_v45 = vunpack.i.h.bf16 %v4589_v20  ;;  %v4869_v55 = vld [vmem:[#allocation10_spill] sm:$0xff] }
 0x12d   : > { %v3418_v54 = vunpack.i.h.bf16 %v3416_v51  ;;  %v3417_v39 = vunpack.i.l.bf16 %v3416_v51  ;;  %v3098_v32 = vunpack.i.h.bf16 %v4173_v52  ;;  %v3097_v30 = vunpack.i.l.bf16 %v4173_v52 }
 0x12e   : > { %v1916_v21 = vsel %vm1901_vm6, %v1883_v9, %v3412_v50  ;;  %v1917_v33 = vsel %vm1901_vm6, %v1884_v58, %v3413_v45  ;;  %v3103_v4 = vunpack.i.h.bf16 %v4867_v5  ;;  %v3102_v24 = vunpack.i.l.bf16 %v4867_v5 }
 0x12f   : > { %v3421_v10 = vpop.permute.xlu1 %3420  ;;  %v1947_v28 = vsel %vm1934_vm7, %v1914_v62, %v3417_v39  ;;  %v1948_v53 = vsel %vm1934_vm7, %v1915_v57, %v3418_v54  ;;  %v3178_v31 = vunpack.i.h.bf16 %v4868_v7  ;;  %v3177_v34 = vunpack.i.l.bf16 %v4868_v7 }
 0x130   : > { %v3426_v6 = vpop.permute.xlu0 %3425  ;;  %v3422_v43 = vunpack.i.l.bf16 %v3421_v10  ;;  %v3423_v61 = vunpack.i.h.bf16 %v3421_v10  ;;  %v3183_v48 = vunpack.i.h.bf16 %v4869_v55  ;;  %v3182_v54 = vunpack.i.l.bf16 %v4869_v55 }
 0x131   : > { %v3428_v47 = vunpack.i.h.bf16 %v3426_v6  ;;  %v3427_v44 = vunpack.i.l.bf16 %v3426_v6  ;;  %v1820_v50 = vsel %vm411_vm0, %v3703_v63, %v3098_v32 }
 0x132   : > { %v1949_v27 = vsel %vm1934_vm7, %v1916_v21, %v3422_v43  ;;  %v1950_v49 = vsel %vm1934_vm7, %v1917_v33, %v3423_v61 }
 0x133   : > { %v3431_v46 = vpop.permute.xlu1 %3430  ;;  %v1980_v41 = vsel %vm1967_vm8, %v1947_v28, %v3427_v44  ;;  %v1981_v19 = vsel %vm1967_vm8, %v1948_v53, %v3428_v47  ;;  %v3704_v47 = vld [vmem:[#allocation2 + $0xc0] sm:$0xff]  ;;  %v4870_v44 = vld [vmem:[#allocation8_spill] sm:$0xff]  ;;  %v1853_v53 = vsel %vm1835_vm4, %v1820_v50, %v3178_v31 }
 0x134   : > { %v3436_v56 = vpop.permute.xlu0 %3435  ;;  %v3432_v29 = vunpack.i.l.bf16 %v3431_v46  ;;  %v3433_v40 = vunpack.i.h.bf16 %v3431_v46  ;;  %v1819_v52 = vsel %vm411_vm0, %v3704_v47, %v3097_v30 }
 0x135   : > { %v3438_v35 = vunpack.i.h.bf16 %v3436_v56  ;;  %v3437_v60 = vunpack.i.l.bf16 %v3436_v56  ;;  %v1822_v56 = vsel %vm411_vm0, %v4870_v44, %v3103_v4  ;;  %v1852_v28 = vsel %vm1835_vm4, %v1819_v52, %v3177_v34 }
 0x136   : > { %v1982_v59 = vsel %vm1967_vm8, %v1949_v27, %v3432_v29  ;;  %v1983_v25 = vsel %vm1967_vm8, %v1950_v49, %v3433_v40  ;;  %v1855_v61 = vsel %vm1835_vm4, %v1822_v56, %v3183_v48 }
 0x137   : > { %v3441_v12 = vpop.permute.xlu1 %3440  ;;  %v2013_v20 = vsel %vm2000_vm9, %v1980_v41, %v3437_v60  ;;  %v2014_v17 = vsel %vm2000_vm9, %v1981_v19, %v3438_v35  ;;  %v3705_v35 = vld [vmem:[#allocation2 + $0xd8] sm:$0xff] }
 0x138   : > { %v3446_v15 = vpop.permute.xlu0 %3445  ;;  %v3443_v37 = vunpack.i.h.bf16 %v3441_v12  ;;  %v3442_v11 = vunpack.i.l.bf16 %v3441_v12  ;;  %v1821_v60 = vsel %vm411_vm0, %v3705_v35, %v3102_v24 }
 0x139   : > { %v3448_v14 = vunpack.i.h.bf16 %v3446_v15  ;;  %v3447_v16 = vunpack.i.l.bf16 %v3446_v15  ;;  %v1854_v29 = vsel %vm1835_vm4, %v1821_v60, %v3182_v54 }
 0x13a   : > { %v2015_v26 = vsel %vm2000_vm9, %v1982_v59, %v3442_v11  ;;  %v2016_v3 = vsel %vm2000_vm9, %v1983_v25, %v3443_v37 }
 0x13b   : > { %v2046_v51 = vsel %vm2033_vm10, %v2013_v20, %v3447_v16  ;;  %v2047_v22 = vsel %vm2033_vm10, %v2014_v17, %v3448_v14  ;;  %v3451_v18 = vpop.permute.xlu1 %3450 }
 0x13c   : > { %v2072_v8 = vpack.c.bf16 %v2047_v22, %v2046_v51  ;;  %v3453_v13 = vunpack.i.h.bf16 %v3451_v18  ;;  %v3452_v0 = vunpack.i.l.bf16 %v3451_v18  ;;  %v3456_v10 = vpop.permute.xlu0 %3455 }
 0x13d   : > { %v3457_v39 = vunpack.i.l.bf16 %v3456_v10  ;;  %v3458_v9 = vunpack.i.h.bf16 %v3456_v10 }
 0x13e   : > { %v2048_v23 = vsel %vm2033_vm10, %v2015_v26, %v3452_v0  ;;  %v2049_v38 = vsel %vm2033_vm10, %v2016_v3, %v3453_v13  ;;  %3005 = vmatprep.mubr.msk.bf16.mxu0 %vm2118_vm11, %v2072_v8 }
 0x13f   : > { %v2073_v42 = vpack.c.bf16 %v2049_v38, %v2048_v23  ;;  %v3461_v2 = vpop.permute.xlu1 %3460  ;;  %v1885_v12 = vsel %vm1868_vm5, %v1852_v28, %v3457_v39  ;;  %v1886_v40 = vsel %vm1868_vm5, %v1853_v53, %v3458_v9  ;;  %v4873_v28 = vld [vmem:[#allocation11_spill] sm:$0xff] }
 0x140   : > { %v3466_v1 = vpop.permute.xlu0 %3465  ;;  %v3463_v62 = vunpack.i.h.bf16 %v3461_v2  ;;  %v3462_v57 = vunpack.i.l.bf16 %v3461_v2  ;;  %v3188_v53 = vunpack.i.h.bf16 %v4873_v28 }
 0x141   : > { %3006 = vmatmul.mubr.msk.bf16.gmra.mrb[12].mxu0 %vm2118_vm11, %v2073_v42  ;;  %v3468_v45 = vunpack.i.h.bf16 %v3466_v1  ;;  %v3467_v43 = vunpack.i.l.bf16 %v3466_v1 }
 0x142   : > { %v1887_v16 = vsel %vm1868_vm5, %v1854_v29, %v3462_v57  ;;  %v1888_v33 = vsel %vm1868_vm5, %v1855_v61, %v3463_v62  ;;  %v3187_v61 = vunpack.i.l.bf16 %v4873_v28  ;;  %v4874_v29 = vld [vmem:[#allocation12_spill] sm:$0xff] }
 0x143   : > { %v3471_v6 = vpop.permute.xlu1 %3470  ;;  %v1918_v27 = vsel %vm1901_vm6, %v1885_v12, %v3467_v43  ;;  %v1919_v20 = vsel %vm1901_vm6, %v1886_v40, %v3468_v45  ;;  %v4872_v45 = vld [vmem:[#allocation5_spill] sm:$0xff]  ;;  %v3193_v12 = vunpack.i.h.bf16 %v4874_v29  ;;  %v3706_v40 = vld [vmem:[#allocation2 + $0xf8] sm:$0xff] }
 0x144   : > { %v3476_v36 = vpop.permute.xlu0 %3475  ;;  %v3472_v15 = vunpack.i.l.bf16 %v3471_v6  ;;  %v3473_v17 = vunpack.i.h.bf16 %v3471_v6  ;;  %v3113_v43 = vunpack.i.h.bf16 %v4872_v45  ;;  %v3112_v60 = vunpack.i.l.bf16 %v4872_v45 }
 0x145   : > { %v3478_v21 = vunpack.i.h.bf16 %v3476_v36  ;;  %v3477_v41 = vunpack.i.l.bf16 %v3476_v36 }
 0x146   : > { %v1920_v0 = vsel %vm1901_vm6, %v1887_v16, %v3472_v15  ;;  %v1921_v6 = vsel %vm1901_vm6, %v1888_v33, %v3473_v17 }
 0x147   : > { %v3481_v46 = vpop.permute.xlu1 %3480  ;;  %v1951_v22 = vsel %vm1934_vm7, %v1918_v27, %v3477_v41  ;;  %v1952_v18 = vsel %vm1934_vm7, %v1919_v20, %v3478_v21  ;;  %v3192_v21 = vunpack.i.l.bf16 %v4874_v29 }
 0x148   : > { %v3486_v58 = vpop.permute.xlu0 %3485  ;;  %v3482_v49 = vunpack.i.l.bf16 %v3481_v46  ;;  %v3483_v25 = vunpack.i.h.bf16 %v3481_v46 }
 0x149   : > { %v3488_v37 = vunpack.i.h.bf16 %v3486_v58  ;;  %v3487_v11 = vunpack.i.l.bf16 %v3486_v58  ;;  %v4871_v58 = vld [vmem:[#allocation4_spill] sm:$0xff] }
 0x14a   : > { %v1953_v32 = vsel %vm1934_vm7, %v1920_v0, %v3482_v49  ;;  %v1954_v4 = vsel %vm1934_vm7, %v1921_v6, %v3483_v25  ;;  %v3108_v62 = vunpack.i.h.bf16 %v4871_v58  ;;  %v3107_v57 = vunpack.i.l.bf16 %v4871_v58 }
 0x14b   : > { %v3491_v19 = vpop.permute.xlu1 %3490  ;;  %v1984_v10 = vsel %vm1967_vm8, %v1951_v22, %v3487_v11  ;;  %v1985_v26 = vsel %vm1967_vm8, %v1952_v18, %v3488_v37  ;;  %v3707_v37 = vld [vmem:[#allocation2 + $0xf0] sm:$0xff] }
 0x14c   : > { %v3496_v14 = vpop.permute.xlu0 %3495  ;;  %v3492_v8 = vunpack.i.l.bf16 %v3491_v19  ;;  %v3493_v3 = vunpack.i.h.bf16 %v3491_v19  ;;  %v1824_v15 = vsel %vm411_vm0, %v3706_v40, %v3108_v62  ;;  %v1823_v11 = vsel %vm411_vm0, %v3707_v37, %v3107_v57 }
 0x14d   : > { %v3498_v59 = vunpack.i.h.bf16 %v3496_v14  ;;  %v3497_v51 = vunpack.i.l.bf16 %v3496_v14  ;;  %v3708_v14 = vld [vmem:[#allocation2 + $0x110] sm:$0xff]  ;;  %v1856_v18 = vsel %vm1835_vm4, %v1823_v11, %v3187_v61  ;;  %v1857_v25 = vsel %vm1835_vm4, %v1824_v15, %v3188_v53 }
 0x14e   : > { %v1986_v36 = vsel %vm1967_vm8, %v1953_v32, %v3492_v8  ;;  %v1987_v34 = vsel %vm1967_vm8, %v1954_v4, %v3493_v3  ;;  %v1826_v16 = vsel %vm411_vm0, %v3708_v14, %v3113_v43 }
 0x14f   : > { %v3501_v13 = vpop.permute.xlu1 %3500  ;;  %v2017_v30 = vsel %vm2000_vm9, %v1984_v10, %v3497_v51  ;;  %v2018_v5 = vsel %vm2000_vm9, %v1985_v26, %v3498_v59  ;;  %v3709_v51 = vld [vmem:[#allocation2 + $0x108] sm:$0xff]  ;;  %v1859_v8 = vsel %vm1835_vm4, %v1826_v16, %v3193_v12 }
 0x150   : > { %v3506_v23 = vpop.permute.xlu0 %3505  ;;  %v3503_v38 = vunpack.i.h.bf16 %v3501_v13  ;;  %v3502_v42 = vunpack.i.l.bf16 %v3501_v13  ;;  %v1825_v22 = vsel %vm411_vm0, %v3709_v51, %v3112_v60 }
 0x151   : > { %v3508_v2 = vunpack.i.h.bf16 %v3506_v23  ;;  %v3507_v1 = vunpack.i.l.bf16 %v3506_v23  ;;  %v1858_v13 = vsel %vm1835_vm4, %v1825_v22, %v3192_v21 }
 0x152   : > { %v2019_v46 = vsel %vm2000_vm9, %v1986_v36, %v3502_v42  ;;  %v2020_v63 = vsel %vm2000_vm9, %v1987_v34, %v3503_v38 }
 0x153   : > { %v3511_v24 = vpop.permute.xlu1 %3510  ;;  %v2050_v7 = vsel %vm2033_vm10, %v2017_v30, %v3507_v1  ;;  %v2051_v31 = vsel %vm2033_vm10, %v2018_v5, %v3508_v2 }
 0x154   : > { %v3513_v55 = vunpack.i.h.bf16 %v3511_v24  ;;  %v3512_v48 = vunpack.i.l.bf16 %v3511_v24  ;;  %v3516_v54 = vpop.permute.xlu0 %3515  ;;  %v2074_v39 = vpack.c.bf16 %v2051_v31, %v2050_v7 }
 0x155   : > { %v3517_v41 = vunpack.i.l.bf16 %v3516_v54  ;;  %v3518_v33 = vunpack.i.h.bf16 %v3516_v54 }
 0x156   : > { %v2052_v50 = vsel %vm2033_vm10, %v2019_v46, %v3512_v48  ;;  %v2053_v47 = vsel %vm2033_vm10, %v2020_v63, %v3513_v55  ;;  %3009 = vmatprep.mubr.msk.bf16.mxu1 %vm2118_vm11, %v2074_v39 }
 0x157   : > { %v2075_v52 = vpack.c.bf16 %v2053_v47, %v2052_v50  ;;  %v3521_v44 = vpop.permute.xlu1 %3520  ;;  %v1889_v0 = vsel %vm1868_vm5, %v1856_v18, %v3517_v41  ;;  %v1890_v23 = vsel %vm1868_vm5, %v1857_v25, %v3518_v33  ;;  %v4877_v18 = vld [vmem:[#allocation13_spill] sm:$0xff] }
 0x158   : > { %v3526_v56 = vpop.permute.xlu0 %3525  ;;  %v3523_v20 = vunpack.i.h.bf16 %v3521_v44  ;;  %v3522_v17 = vunpack.i.l.bf16 %v3521_v44  ;;  %v3198_v25 = vunpack.i.h.bf16 %v4877_v18 }
 0x159   : > { %3010 = vmatmul.mubr.msk.bf16.vlgmr.msra.gmra.mrb[0].mxu1 %vm2118_vm11, %v2075_v52  ;;  %v3528_v49 = vunpack.i.h.bf16 %v3526_v56  ;;  %v3527_v59 = vunpack.i.l.bf16 %v3526_v56 }
 0x15a   : > { %v1891_v6 = vsel %vm1868_vm5, %v1858_v13, %v3522_v17  ;;  %v1892_v32 = vsel %vm1868_vm5, %v1859_v8, %v3523_v20  ;;  %v3197_v8 = vunpack.i.l.bf16 %v4877_v18  ;;  %v4878_v13 = vld [vmem:[#allocation14_spill] sm:$0xff] }
 0x15b   : > { %v4680_v9 = vpop.permute.xlu1 %3530  ;;  %v1922_v30 = vsel %vm1901_vm6, %v1889_v0, %v3527_v59  ;;  %v1923_v5 = vsel %vm1901_vm6, %v1890_v23, %v3528_v49  ;;  %v4876_v49 = vld [vmem:[#allocation7_spill] sm:$0xff]  ;;  %v3203_v0 = vunpack.i.h.bf16 %v4878_v13  ;;  %v3710_v23 = vld [vmem:[#allocation2 + $0x128] sm:$0xff] }
 0x15c   : > { %v3536_v35 = vpop.permute.xlu0 %3535  ;;  %v3532_v38 = vunpack.i.l.bf16 %v4680_v9  ;;  %v3533_v4 = vunpack.i.h.bf16 %v4680_v9  ;;  %v3123_v59 = vunpack.i.h.bf16 %v4876_v49  ;;  %v3122_v22 = vunpack.i.l.bf16 %v4876_v49 }
 0x15d   : > { %v3538_v10 = vunpack.i.h.bf16 %v3536_v35  ;;  %v3537_v26 = vunpack.i.l.bf16 %v3536_v35 }
 0x15e   : > { %v1924_v39 = vsel %vm1901_vm6, %v1891_v6, %v3532_v38  ;;  %v1925_v58 = vsel %vm1901_vm6, %v1892_v32, %v3533_v4 }
 0x15f   : > { %v3541_v19 = vpop.permute.xlu1 %3540  ;;  %v1955_v31 = vsel %vm1934_vm7, %v1922_v30, %v3537_v26  ;;  %v1956_v34 = vsel %vm1934_vm7, %v1923_v5, %v3538_v10  ;;  %v3202_v10 = vunpack.i.l.bf16 %v4878_v13 }
 0x160   : > { %v3546_v27 = vpop.permute.xlu0 %3545  ;;  %v3542_v36 = vunpack.i.l.bf16 %v3541_v19  ;;  %v3543_v55 = vunpack.i.h.bf16 %v3541_v19 }
 0x161   : > { %v3548_v42 = vunpack.i.h.bf16 %v3546_v27  ;;  %v3547_v2 = vunpack.i.l.bf16 %v3546_v27  ;;  %v4875_v27 = vld [vmem:[#allocation6_spill] sm:$0xff] }
 0x162   : > { %v1957_v62 = vsel %vm1934_vm7, %v1924_v39, %v3542_v36  ;;  %v1958_v43 = vsel %vm1934_vm7, %v1925_v58, %v3543_v55  ;;  %v3118_v20 = vunpack.i.h.bf16 %v4875_v27  ;;  %v3117_v17 = vunpack.i.l.bf16 %v4875_v27 }
 0x163   : > { %v3551_v3 = vpop.permute.xlu1 %3550  ;;  %v1988_v46 = vsel %vm1967_vm8, %v1955_v31, %v3547_v2  ;;  %v1989_v63 = vsel %vm1967_vm8, %v1956_v34, %v3548_v42  ;;  %v3711_v42 = vld [vmem:[#allocation2 + $0x120] sm:$0xff] }
 0x164   : > { %v3556_v1 = vpop.permute.xlu0 %3555  ;;  %v3552_v48 = vunpack.i.l.bf16 %v3551_v3  ;;  %v3553_v50 = vunpack.i.h.bf16 %v3551_v3  ;;  %v1828_v38 = vsel %vm411_vm0, %v3710_v23, %v3118_v20  ;;  %v1827_v2 = vsel %vm411_vm0, %v3711_v42, %v3117_v17 }
 0x165   : > { %v3558_v24 = vunpack.i.h.bf16 %v3556_v1  ;;  %v3557_v7 = vunpack.i.l.bf16 %v3556_v1  ;;  %v3712_v1 = vld [vmem:[#allocation2 + $0x140] sm:$0xff]  ;;  %v1860_v34 = vsel %vm1835_vm4, %v1827_v2, %v3197_v8  ;;  %v1861_v55 = vsel %vm1835_vm4, %v1828_v38, %v3198_v25 }
 0x166   : > { %v1990_v35 = vsel %vm1967_vm8, %v1957_v62, %v3552_v48  ;;  %v1991_v61 = vsel %vm1967_vm8, %v1958_v43, %v3553_v50  ;;  %v1830_v6 = vsel %vm411_vm0, %v3712_v1, %v3123_v59 }
 0x167   : > { %v3561_v54 = vpop.permute.xlu1 %3560  ;;  %v2021_v57 = vsel %vm2000_vm9, %v1988_v46, %v3557_v7  ;;  %v2022_v45 = vsel %vm2000_vm9, %v1989_v63, %v3558_v24  ;;  %v3713_v7 = vld [vmem:[#allocation2 + $0x138] sm:$0xff]  ;;  %v1863_v48 = vsel %vm1835_vm4, %v1830_v6, %v3203_v0 }
 0x168   : > { %v3566_v47 = vpop.permute.xlu0 %3565  ;;  %v3563_v52 = vunpack.i.h.bf16 %v3561_v54  ;;  %v3562_v44 = vunpack.i.l.bf16 %v3561_v54  ;;  %v1829_v31 = vsel %vm411_vm0, %v3713_v7, %v3122_v22 }
 0x169   : > { %v3568_v56 = vunpack.i.h.bf16 %v3566_v47  ;;  %v3567_v9 = vunpack.i.l.bf16 %v3566_v47  ;;  %v1862_v54 = vsel %vm1835_vm4, %v1829_v31, %v3202_v10 }
 0x16a   : > { %v2023_v19 = vsel %vm2000_vm9, %v1990_v35, %v3562_v44  ;;  %v2024_v40 = vsel %vm2000_vm9, %v1991_v61, %v3563_v52 }
 0x16b   : > { %v2054_v60 = vsel %vm2033_vm10, %v2021_v57, %v3567_v9  ;;  %v2055_v28 = vsel %vm2033_vm10, %v2022_v45, %v3568_v56  ;;  %v3571_v53 = vpop.permute.xlu1 %3570 }
 0x16c   : > { %v2076_v29 = vpack.c.bf16 %v2055_v28, %v2054_v60  ;;  %v3573_v12 = vunpack.i.h.bf16 %v3571_v53  ;;  %v3572_v21 = vunpack.i.l.bf16 %v3571_v53  ;;  %v3576_v41 = vpop.permute.xlu0 %3575 }
 0x16d   : > { %v3577_v26 = vunpack.i.l.bf16 %v3576_v41  ;;  %v3578_v32 = vunpack.i.h.bf16 %v3576_v41 }
 0x16e   : > { %v2056_v15 = vsel %vm2033_vm10, %v2023_v19, %v3572_v21  ;;  %v2057_v37 = vsel %vm2033_vm10, %v2024_v40, %v3573_v12  ;;  %3013 = vmatprep.mubr.msk.bf16.mxu1 %vm2118_vm11, %v2076_v29 }
 0x16f   : > { %v2077_v11 = vpack.c.bf16 %v2057_v37, %v2056_v15  ;;  %v3581_v14 = vpop.permute.xlu1 %3580  ;;  %v1893_v39 = vsel %vm1868_vm5, %v1860_v34, %v3577_v26  ;;  %v1894_v47 = vsel %vm1868_vm5, %v1861_v55, %v3578_v32 }
 0x170   : > { %v3586_v16 = vpop.permute.xlu0 %3585  ;;  %v3583_v5 = vunpack.i.h.bf16 %v3581_v14  ;;  %v3582_v4 = vunpack.i.l.bf16 %v3581_v14 }
 0x171   : > { %3014 = vmatmul.mubr.msk.bf16.gmra.mrb[4].mxu1 %vm2118_vm11, %v2077_v11  ;;  %v3588_v36 = vunpack.i.h.bf16 %v3586_v16  ;;  %v3587_v24 = vunpack.i.l.bf16 %v3586_v16 }
 0x172   : > { %v1895_v58 = vsel %vm1868_vm5, %v1862_v54, %v3582_v4  ;;  %v1896_v62 = vsel %vm1868_vm5, %v1863_v48, %v3583_v5  ;;  %v4879_v48 = vld [vmem:[#allocation15_spill] sm:$0xff] }
 0x173   : > { %v4726_v33 = vpop.permute.xlu1 %3590  ;;  %v1926_v57 = vsel %vm1901_vm6, %v1893_v39, %v3587_v24  ;;  %v1927_v45 = vsel %vm1901_vm6, %v1894_v47, %v3588_v36 }
 0x174   : > { %v3596_v51 = vpop.permute.xlu0 %3595  ;;  %v3592_v52 = vunpack.i.l.bf16 %v4726_v33  ;;  %v3593_v43 = vunpack.i.h.bf16 %v4726_v33 }
 0x175   : > { %v3598_v46 = vunpack.i.h.bf16 %v3596_v51  ;;  %v3597_v63 = vunpack.i.l.bf16 %v3596_v51 }
 0x176   : > { %v1928_v41 = vsel %vm1901_vm6, %v1895_v58, %v3592_v52  ;;  %v1929_v27 = vsel %vm1901_vm6, %v1896_v62, %v3593_v43  ;;  %v4881_v58 = vld [vmem:[#allocation18_spill] sm:$0xff] }
 0x177   : > { %v3601_v3 = vpop.permute.xlu1 %3600  ;;  %v1959_v53 = vsel %vm1934_vm7, %v1926_v57, %v3597_v63  ;;  %v1960_v61 = vsel %vm1934_vm7, %v1927_v45, %v3598_v46  ;;  %v4882_v57 = vld [vmem:[#allocation17_spill] sm:$0xff] }
 0x178   : > { %v3606_v30 = vpop.permute.xlu0 %3605  ;;  %v3602_v35 = vunpack.i.l.bf16 %v3601_v3  ;;  %v3603_v29 = vunpack.i.h.bf16 %v3601_v3 }
 0x179   : > { %v3608_v44 = vunpack.i.h.bf16 %v3606_v30  ;;  %v3607_v56 = vunpack.i.l.bf16 %v3606_v30 }
 0x17a   : > { %v1961_v20 = vsel %vm1934_vm7, %v1928_v41, %v3602_v35  ;;  %v1962_v59 = vsel %vm1934_vm7, %v1929_v27, %v3603_v29 }
 0x17b   : > { %v3611_v50 = vpop.permute.xlu1 %3610  ;;  %v1992_v19 = vsel %vm1967_vm8, %v1959_v53, %v3607_v56  ;;  %v1993_v40 = vsel %vm1967_vm8, %v1960_v61, %v3608_v44 }
 0x17c   : > { %v3616_v9 = vpop.permute.xlu0 %3615  ;;  %v3612_v12 = vunpack.i.l.bf16 %v3611_v50  ;;  %v3613_v15 = vunpack.i.h.bf16 %v3611_v50  ;;  %v4880_v50 = vld [vmem:[#allocation16_spill] sm:$0xff] }
 0x17d   : > { %v3618_v60 = vunpack.i.h.bf16 %v3616_v9  ;;  %v3617_v28 = vunpack.i.l.bf16 %v3616_v9 }
 0x17e   : > { %v1994_v51 = vsel %vm1967_vm8, %v1961_v20, %v3612_v12  ;;  %v1995_v8 = vsel %vm1967_vm8, %v1962_v59, %v3613_v15 }
 0x17f   : > { %v3621_v21 = vpop.permute.xlu1 %3620  ;;  %v2025_v17 = vsel %vm2000_vm9, %v1992_v19, %v3617_v28  ;;  %v2026_v49 = vsel %vm2000_vm9, %v1993_v40, %v3618_v60 }
 0x180   : > { %v3626_v37 = vpop.permute.xlu0 %3625  ;;  %v3623_v11 = vunpack.i.h.bf16 %v3621_v21  ;;  %v3622_v14 = vunpack.i.l.bf16 %v3621_v21 }
 0x181   : > { %v3628_v16 = vunpack.i.h.bf16 %v3626_v37  ;;  %v3627_v33 = vunpack.i.l.bf16 %v3626_v37 }
 0x182   : > { %v2027_v3 = vsel %vm2000_vm9, %v1994_v51, %v3622_v14  ;;  %v2028_v23 = vsel %vm2000_vm9, %v1995_v8, %v3623_v11 }
 0x183   : > { %v2058_v22 = vsel %vm2033_vm10, %v2025_v17, %v3627_v33  ;;  %v2059_v18 = vsel %vm2033_vm10, %v2026_v49, %v3628_v16  ;;  %v3631_v25 = vpop.permute.xlu1 %3630 }
 0x184   : > { %v2078_v13 = vpack.c.bf16 %v2059_v18, %v2058_v22  ;;  %v3633_v0 = vunpack.i.h.bf16 %v3631_v25  ;;  %v3632_v10 = vunpack.i.l.bf16 %v3631_v25  ;;  %v3636_v26 = vpop.permute.xlu0 %3635 }
 0x185   : > { %v3637_v5 = vunpack.i.l.bf16 %v3636_v26  ;;  %v3638_v36 = vunpack.i.h.bf16 %v3636_v26 }
 0x186   : > { %v2060_v38 = vsel %vm2033_vm10, %v2027_v3, %v3632_v10  ;;  %v2061_v42 = vsel %vm2033_vm10, %v2028_v23, %v3633_v0  ;;  %3017 = vmatprep.mubr.msk.bf16.mxu1 %vm2118_vm11, %v2078_v13 }
 0x187   : > { %v2079_v2 = vpack.c.bf16 %v2061_v42, %v2060_v38  ;;  %v3641_v1 = vpop.permute.xlu1 %3640  ;;  %v1897_v54 = vsel %vm1868_vm5, %v4879_v48, %v3637_v5  ;;  %v1898_v47 = vsel %vm1868_vm5, %v4880_v50, %v3638_v36 }
 0x188   : > { %v3646_v6 = vpop.permute.xlu0 %3645  ;;  %v3643_v7 = vunpack.i.h.bf16 %v3641_v1  ;;  %v3642_v31 = vunpack.i.l.bf16 %v3641_v1 }
 0x189   : > { %3018 = vmatmul.mubr.msk.bf16.gmra.mrb[8].mxu1 %vm2118_vm11, %v2079_v2  ;;  %v3648_v34 = vunpack.i.h.bf16 %v3646_v6  ;;  %v3647_v55 = vunpack.i.l.bf16 %v3646_v6 }
 0x18a   : > { %v1899_v62 = vsel %vm1868_vm5, %v4881_v58, %v3642_v31  ;;  %v1900_v45 = vsel %vm1868_vm5, %v4882_v57, %v3643_v7 }
 0x18b   : > { %v3651_v32 = vpop.permute.xlu1 %3650  ;;  %v1930_v43 = vsel %vm1901_vm6, %v1897_v54, %v3647_v55  ;;  %v1931_v35 = vsel %vm1901_vm6, %v1898_v47, %v3648_v34 }
 0x18c   : > { %v3656_v30 = vpop.permute.xlu0 %3655  ;;  %v3652_v52 = vunpack.i.l.bf16 %v3651_v32  ;;  %v3653_v60 = vunpack.i.h.bf16 %v3651_v32 }
 0x18d   : > { %v3658_v39 = vunpack.i.h.bf16 %v3656_v30  ;;  %v3657_v46 = vunpack.i.l.bf16 %v3656_v30 }
 0x18e   : > { %v1932_v40 = vsel %vm1901_vm6, %v1899_v62, %v3652_v52  ;;  %v1933_v17 = vsel %vm1901_vm6, %v1900_v45, %v3653_v60 }
 0x18f   : > { %v3661_v4 = vpop.permute.xlu1 %3660  ;;  %v1963_v29 = vsel %vm1934_vm7, %v1930_v43, %v3657_v46  ;;  %v1964_v12 = vsel %vm1934_vm7, %v1931_v35, %v3658_v39 }
 0x190   : > { %v3666_v24 = vpop.permute.xlu0 %3665  ;;  %v3662_v28 = vunpack.i.l.bf16 %v3661_v4  ;;  %v3663_v21 = vunpack.i.h.bf16 %v3661_v4 }
 0x191   : > { %v3668_v44 = vunpack.i.h.bf16 %v3666_v24  ;;  %v3667_v56 = vunpack.i.l.bf16 %v3666_v24 }
 0x192   : > { %v1965_v49 = vsel %vm1934_vm7, %v1932_v40, %v3662_v28  ;;  %v1966_v22 = vsel %vm1934_vm7, %v1933_v17, %v3663_v21 }
 0x193   : > { %v3671_v63 = vpop.permute.xlu1 %3670  ;;  %v1996_v15 = vsel %vm1967_vm8, %v1963_v29, %v3667_v56  ;;  %v1997_v37 = vsel %vm1967_vm8, %v1964_v12, %v3668_v44 }
 0x194   : > { %v3676_v9 = vpop.permute.xlu0 %3675  ;;  %v3672_v41 = vunpack.i.l.bf16 %v3671_v63  ;;  %v3673_v11 = vunpack.i.h.bf16 %v3671_v63 }
 0x195   : > { %v3678_v53 = vunpack.i.h.bf16 %v3676_v9  ;;  %v3677_v61 = vunpack.i.l.bf16 %v3676_v9 }
 0x196   : > { %v1998_v18 = vsel %vm1967_vm8, %v1965_v49, %v3672_v41  ;;  %v1999_v0 = vsel %vm1967_vm8, %v1966_v22, %v3673_v11 }
 0x197   : > { %v3681_v19 = vpop.permute.xlu1 %3680  ;;  %v2029_v59 = vsel %vm2000_vm9, %v1996_v15, %v3677_v61  ;;  %v2030_v51 = vsel %vm2000_vm9, %v1997_v37, %v3678_v53 }
 0x198   : > { %v3686_v14 = vpop.permute.xlu0 %3685  ;;  %v3683_v16 = vunpack.i.h.bf16 %v3681_v19  ;;  %v3682_v33 = vunpack.i.l.bf16 %v3681_v19 }
 0x199   : > { %v3688_v27 = vunpack.i.h.bf16 %v3686_v14  ;;  %v3687_v20 = vunpack.i.l.bf16 %v3686_v14 }
 0x19a   : > { %v2031_v23 = vsel %vm2000_vm9, %v1998_v18, %v3682_v33  ;;  %v2032_v38 = vsel %vm2000_vm9, %v1999_v0, %v3683_v16 }
 0x19b   : > { %v2062_v25 = vsel %vm2033_vm10, %v2029_v59, %v3687_v20  ;;  %v2063_v8 = vsel %vm2033_vm10, %v2030_v51, %v3688_v27  ;;  %v3691_v13 = vpop.permute.xlu1 %3690 }
 0x19c   : > { %v2080_v10 = vpack.c.bf16 %v2063_v8, %v2062_v25  ;;  %v3693_v26 = vunpack.i.h.bf16 %v3691_v13  ;;  %v3692_v3 = vunpack.i.l.bf16 %v3691_v13 }
 0x19e   : > { %v2064_v42 = vsel %vm2033_vm10, %v2031_v23, %v3692_v3  ;;  %v2065_v2 = vsel %vm2033_vm10, %v2032_v38, %v3693_v26  ;;  %3021 = vmatprep.mubr.msk.bf16.mxu1 %vm2118_vm11, %v2080_v10 }
 0x19f   : > { %v2081_v1 = vpack.c.bf16 %v2065_v2, %v2064_v42 }
 0x1a1   : > { %3022 = vmatmul.mubr.msk.bf16.gmra.mrb[12].mxu1 %vm2118_vm11, %v2081_v1 }
 0x1d5   : > { %v2995_v6 = vpop.f32.mrb[0].mxu0 }
 0x1d6   : > { %v2205_v32 = vpop.f32.mrb[1].mxu0  ;;  %v2531_v34 = vmul.f32 %v2995_v6, %v2995_v6 }
 0x1d7   : > { %v2996_v30 = vpop.f32.mrb[2].mxu0  ;;  %v2529_v36 = vmul.f32 %v2205_v32, %v2205_v32 }
 0x1d8   : > { %v2860_v5 = vpack.c.bf16 %v2996_v30, %v2995_v6  ;;  %v2208_v4 = vpop.f32.mrb[3].mxu0  ;;  %v2532_v54 = vmul.f32 %v2996_v30, %v2996_v30 }
 0x1d9   : > { %v2855_v24 = vpack.c.bf16 %v2208_v4, %v2205_v32  ;;  %v2492_v7 = vadd.f32 %v2208_v4, %v2205_v32  ;;  %v2530_v31 = vmul.f32 %v2208_v4, %v2208_v4 }
 0x1da   : > { %2947 = vst [vmem:[%s4807_s27 + $0x8] sm:$0xff] %v2860_v5  }
 0x1db   : > { %2856 = vst [vmem:[%s4807_s27] sm:$0xff] %v2855_v24   ;;  %v2493_v55 = vadd.f32 %v2995_v6, %v2492_v7  ;;  %v2561_v48 = vadd.f32 %v2530_v31, %v2529_v36 }
 0x1dd   : > { %v2562_v39 = vadd.f32 %v2561_v48, %v2531_v34  ;;  %v2494_v46 = vadd.f32 %v2996_v30, %v2493_v55 }
 0x1df   : > { %v2563_v63 = vadd.f32 %v2562_v39, %v2532_v54 }
 0x1e9   : > { %v2999_v50 = vpop.f32.mrb[4].mxu0 }
 0x1ea   : > { %v2221_v47 = vpop.f32.mrb[5].mxu0  ;;  %v2535_v35 = vmul.f32 %v2999_v50, %v2999_v50 }
 0x1eb   : > { %v2495_v52 = vadd.f32 %v2494_v46, %v2221_v47  ;;  %v2533_v44 = vmul.f32 %v2221_v47, %v2221_v47  ;;  %v3000_v56 = vpop.f32.mrb[6].mxu0 }
 0x1ec   : > { %v2870_v9 = vpack.c.bf16 %v3000_v56, %v2999_v50  ;;  %v2224_v58 = vpop.f32.mrb[7].mxu0  ;;  %v2536_v53 = vmul.f32 %v3000_v56, %v3000_v56 }
 0x1ed   : > { %v2564_v62 = vadd.f32 %v2563_v63, %v2533_v44  ;;  %v2865_v57 = vpack.c.bf16 %v2224_v58, %v2221_v47  ;;  %v2496_v45 = vadd.f32 %v2495_v52, %v2224_v58  ;;  %v2534_v43 = vmul.f32 %v2224_v58, %v2224_v58 }
 0x1ee   : > { %2949 = vst [vmem:[%s4807_s27 + $0x18] sm:$0xff] %v2870_v9  }
 0x1ef   : > { %2948 = vst [vmem:[%s4807_s27 + $0x10] sm:$0xff] %v2865_v57   ;;  %v2497_v60 = vadd.f32 %v2999_v50, %v2496_v45  ;;  %v2565_v28 = vadd.f32 %v2564_v62, %v2534_v43 }
 0x1f1   : > { %v2566_v61 = vadd.f32 %v2565_v28, %v2535_v35  ;;  %v2498_v29 = vadd.f32 %v3000_v56, %v2497_v60 }
 0x1f3   : > { %v2567_v12 = vadd.f32 %v2566_v61, %v2536_v53 }
 0x1fd   : > { %v3003_v21 = vpop.f32.mrb[8].mxu0 }
 0x1fe   : > { %v2237_v41 = vpop.f32.mrb[9].mxu0  ;;  %v2539_v20 = vmul.f32 %v3003_v21, %v3003_v21 }
 0x1ff   : > { %v2499_v19 = vadd.f32 %v2498_v29, %v2237_v41  ;;  %v2537_v40 = vmul.f32 %v2237_v41, %v2237_v41  ;;  %v3004_v15 = vpop.f32.mrb[10].mxu0 }
 0x200   : > { %v2880_v37 = vpack.c.bf16 %v3004_v15, %v3003_v21  ;;  %v2240_v11 = vpop.f32.mrb[11].mxu0  ;;  %v2540_v59 = vmul.f32 %v3004_v15, %v3004_v15 }
 0x201   : > { %v2568_v14 = vadd.f32 %v2567_v12, %v2537_v40  ;;  %v2875_v16 = vpack.c.bf16 %v2240_v11, %v2237_v41  ;;  %v2500_v33 = vadd.f32 %v2499_v19, %v2240_v11  ;;  %v2538_v27 = vmul.f32 %v2240_v11, %v2240_v11 }
 0x202   : > { %2951 = vst [vmem:[%s4807_s27 + $0x28] sm:$0xff] %v2880_v37  }
 0x203   : > { %2950 = vst [vmem:[%s4807_s27 + $0x20] sm:$0xff] %v2875_v16   ;;  %v2501_v17 = vadd.f32 %v3003_v21, %v2500_v33  ;;  %v2569_v49 = vadd.f32 %v2568_v14, %v2538_v27 }
 0x205   : > { %v2570_v51 = vadd.f32 %v2569_v49, %v2539_v20  ;;  %v2502_v22 = vadd.f32 %v3004_v15, %v2501_v17 }
 0x207   : > { %v2571_v18 = vadd.f32 %v2570_v51, %v2540_v59 }
 0x214   : > { %v3007_v25 = vpop.f32.mrb[12].mxu0 }
 0x215   : > { %v2253_v8 = vpop.f32.mrb[13].mxu0  ;;  %v2543_v1 = vmul.f32 %v3007_v25, %v3007_v25 }
 0x216   : > { %v2503_v13 = vadd.f32 %v2502_v22, %v2253_v8  ;;  %v2541_v0 = vmul.f32 %v2253_v8, %v2253_v8  ;;  %v3008_v10 = vpop.f32.mrb[14].mxu0 }
 0x217   : > { %v2890_v26 = vpack.c.bf16 %v3008_v10, %v3007_v25  ;;  %v2256_v3 = vpop.f32.mrb[15].mxu0  ;;  %v2544_v30 = vmul.f32 %v3008_v10, %v3008_v10 }
 0x218   : > { %v2572_v23 = vadd.f32 %v2571_v18, %v2541_v0  ;;  %v2885_v38 = vpack.c.bf16 %v2256_v3, %v2253_v8  ;;  %v2504_v42 = vadd.f32 %v2503_v13, %v2256_v3  ;;  %v2542_v2 = vmul.f32 %v2256_v3, %v2256_v3 }
 0x219   : > { %2953 = vst [vmem:[%s4807_s27 + $0x38] sm:$0xff] %v2890_v26  }
 0x21a   : > { %2952 = vst [vmem:[%s4807_s27 + $0x30] sm:$0xff] %v2885_v38   ;;  %v2505_v6 = vadd.f32 %v3007_v25, %v2504_v42  ;;  %v2573_v32 = vadd.f32 %v2572_v23, %v2542_v2 }
 0x21c   : > { %v2574_v5 = vadd.f32 %v2573_v32, %v2543_v1  ;;  %v2506_v4 = vadd.f32 %v3008_v10, %v2505_v6 }
 0x21e   : > { %v2575_v36 = vadd.f32 %v2574_v5, %v2544_v30 }
 0x22c   : > { %v3011_v24 = vpop.f32.mrb[0].mxu1 }
 0x22d   : > { %v2269_v7 = vpop.f32.mrb[1].mxu1  ;;  %v2547_v47 = vmul.f32 %v3011_v24, %v3011_v24 }
 0x22e   : > { %v2507_v31 = vadd.f32 %v2506_v4, %v2269_v7  ;;  %v2545_v34 = vmul.f32 %v2269_v7, %v2269_v7  ;;  %v3012_v55 = vpop.f32.mrb[2].mxu1 }
 0x22f   : > { %v2900_v48 = vpack.c.bf16 %v3012_v55, %v3011_v24  ;;  %v2272_v54 = vpop.f32.mrb[3].mxu1  ;;  %v2548_v56 = vmul.f32 %v3012_v55, %v3012_v55 }
 0x230   : > { %v2576_v39 = vadd.f32 %v2575_v36, %v2545_v34  ;;  %v2895_v46 = vpack.c.bf16 %v2272_v54, %v2269_v7  ;;  %v2508_v63 = vadd.f32 %v2507_v31, %v2272_v54  ;;  %v2546_v50 = vmul.f32 %v2272_v54, %v2272_v54 }
 0x231   : > { %2955 = vst [vmem:[%s4807_s27 + $0x48] sm:$0xff] %v2900_v48  }
 0x232   : > { %2954 = vst [vmem:[%s4807_s27 + $0x40] sm:$0xff] %v2895_v46   ;;  %v2509_v52 = vadd.f32 %v3011_v24, %v2508_v63  ;;  %v2577_v44 = vadd.f32 %v2576_v39, %v2546_v50 }
 0x234   : > { %v2578_v9 = vadd.f32 %v2577_v44, %v2547_v47  ;;  %v2510_v58 = vadd.f32 %v3012_v55, %v2509_v52 }
 0x236   : > { %v2579_v62 = vadd.f32 %v2578_v9, %v2548_v56 }
 0x244   : > { %v3015_v57 = vpop.f32.mrb[4].mxu1 }
 0x245   : > { %v2285_v45 = vpop.f32.mrb[5].mxu1  ;;  %v2551_v41 = vmul.f32 %v3015_v57, %v3015_v57 }
 0x246   : > { %v2511_v43 = vadd.f32 %v2510_v58, %v2285_v45  ;;  %v2549_v35 = vmul.f32 %v2285_v45, %v2285_v45  ;;  %v3016_v60 = vpop.f32.mrb[6].mxu1 }
 0x247   : > { %v2910_v28 = vpack.c.bf16 %v3016_v60, %v3015_v57  ;;  %v2288_v53 = vpop.f32.mrb[7].mxu1  ;;  %v2552_v15 = vmul.f32 %v3016_v60, %v3016_v60 }
 0x248   : > { %v2580_v61 = vadd.f32 %v2579_v62, %v2549_v35  ;;  %v2905_v29 = vpack.c.bf16 %v2288_v53, %v2285_v45  ;;  %v2512_v12 = vadd.f32 %v2511_v43, %v2288_v53  ;;  %v2550_v21 = vmul.f32 %v2288_v53, %v2288_v53 }
 0x249   : > { %2957 = vst [vmem:[%s4807_s27 + $0x58] sm:$0xff] %v2910_v28  }
 0x24a   : > { %2956 = vst [vmem:[%s4807_s27 + $0x50] sm:$0xff] %v2905_v29   ;;  %v2513_v19 = vadd.f32 %v3015_v57, %v2512_v12  ;;  %v2581_v40 = vadd.f32 %v2580_v61, %v2550_v21 }
 0x24c   : > { %v2582_v37 = vadd.f32 %v2581_v40, %v2551_v41  ;;  %v2514_v11 = vadd.f32 %v3016_v60, %v2513_v19 }
 0x24e   : > { %v2583_v14 = vadd.f32 %v2582_v37, %v2552_v15 }
 0x25c   : > { %v3019_v16 = vpop.f32.mrb[8].mxu1 }
 0x25d   : > { %v2301_v33 = vpop.f32.mrb[9].mxu1  ;;  %v2555_v8 = vmul.f32 %v3019_v16, %v3019_v16 }
 0x25e   : > { %v2515_v27 = vadd.f32 %v2514_v11, %v2301_v33  ;;  %v2553_v20 = vmul.f32 %v2301_v33, %v2301_v33  ;;  %v3020_v17 = vpop.f32.mrb[10].mxu1 }
 0x25f   : > { %v2920_v49 = vpack.c.bf16 %v3020_v17, %v3019_v16  ;;  %v2304_v59 = vpop.f32.mrb[11].mxu1  ;;  %v2556_v10 = vmul.f32 %v3020_v17, %v3020_v17 }
 0x260   : > { %v2584_v51 = vadd.f32 %v2583_v14, %v2553_v20  ;;  %v2915_v22 = vpack.c.bf16 %v2304_v59, %v2301_v33  ;;  %v2516_v18 = vadd.f32 %v2515_v27, %v2304_v59  ;;  %v2554_v25 = vmul.f32 %v2304_v59, %v2304_v59 }
 0x261   : > { %2959 = vst [vmem:[%s4807_s27 + $0x68] sm:$0xff] %v2920_v49  }
 0x262   : > { %2958 = vst [vmem:[%s4807_s27 + $0x60] sm:$0xff] %v2915_v22   ;;  %v2517_v13 = vadd.f32 %v3019_v16, %v2516_v18  ;;  %v2585_v0 = vadd.f32 %v2584_v51, %v2554_v25 }
 0x264   : > { %v2586_v26 = vadd.f32 %v2585_v0, %v2555_v8  ;;  %v2518_v3 = vadd.f32 %v3020_v17, %v2517_v13 }
 0x266   : > { %v2587_v23 = vadd.f32 %v2586_v26, %v2556_v10 }
 0x274   : > { %v3023_v38 = vpop.f32.mrb[12].mxu1 }
 0x275   : > { %v2317_v42 = vpop.f32.mrb[13].mxu1  ;;  %v2559_v7 = vmul.f32 %v3023_v38, %v3023_v38 }
 0x276   : > { %v2519_v2 = vadd.f32 %v2518_v3, %v2317_v42  ;;  %v2557_v1 = vmul.f32 %v2317_v42, %v2317_v42  ;;  %v3024_v6 = vpop.f32.mrb[14].mxu1 }
 0x277   : > { %v2930_v32 = vpack.c.bf16 %v3024_v6, %v3023_v38  ;;  %v2320_v30 = vpop.f32.mrb[15].mxu1  ;;  %v2560_v55 = vmul.f32 %v3024_v6, %v3024_v6 }
 0x278   : > { %v2588_v5 = vadd.f32 %v2587_v23, %v2557_v1  ;;  %v2925_v4 = vpack.c.bf16 %v2320_v30, %v2317_v42  ;;  %v2520_v36 = vadd.f32 %v2519_v2, %v2320_v30  ;;  %v2558_v24 = vmul.f32 %v2320_v30, %v2320_v30 }
 0x279   : > { %2961 = vst [vmem:[%s4807_s27 + $0x78] sm:$0xff] %v2930_v32  }
 0x27a   : > { %2960 = vst [vmem:[%s4807_s27 + $0x70] sm:$0xff] %v2925_v4   ;;  %v2521_v31 = vadd.f32 %v3023_v38, %v2520_v36  ;;  %v2589_v34 = vadd.f32 %v2588_v5, %v2558_v24 }
 0x27c   : > { %v2522_v48 = vadd.f32 %v3024_v6, %v2521_v31  ;;  %v2590_v54 = vadd.f32 %v2589_v34, %v2559_v7 }
 0x27e   : > { %v2523_v39 = vrot.slane %v2522_v48, 4  ;;  %v2591_v46 = vadd.f32 %v2590_v54, %v2560_v55 }
 0x280   : > { %v2524_v63 = vadd.f32 %v2523_v39, %v2522_v48  ;;  %v2592_v50 = vrot.slane %v2591_v46, 4 }
 0x282   : > { %v2525_v47 = vrot.slane %v2524_v63, 2  ;;  %v2593_v52 = vadd.f32 %v2592_v50, %v2591_v46 }
 0x284   : > { %v2526_v44 = vadd.f32 %v2525_v47, %v2524_v63  ;;  %v2594_v56 = vrot.slane %v2593_v52, 2 }
 0x286   : > { %v2527_v9 = vrot.slane %v2526_v44, 1  ;;  %v2595_v58 = vadd.f32 %v2594_v56, %v2593_v52 }
 0x288   : > { %v2596_v62 = vrot.slane %v2595_v58, 1  ;;  %v2528_v57 = vadd.f32 %v2527_v9, %v2526_v44 }
 0x28a   : > { %v2597_v45 = vadd.f32 %v2596_v62, %v2595_v58 }
 0x28c   : > { %v2599_v43 = vsel %vm2598_vm12, %v2528_v57, %v2597_v45 }
 0x28d   : > { %2600 = vst [vmem:[%s235_s30] sm:$0x3] %v2599_v43 }
 0x28e PF: > { %s16_s18 = sadd.s32 1, %s3720_s18  }
 0x28f   : > { %p13_p4 = scmp.ge.s32.totalorder %s16_s18, 4  }
 0x291   :  { %15 = sbr.rel (!%p13_p4) target bundleno = 1 (0x1), region = 81 }

</bundles_post_ra>
